<compile_context>
chip_gen: v7x
topology: tpu7x:2x2x1
jax: 0.10.0
libtpu: 0.0.40
codegen_flags: <defaults>
</compile_context>

<pallas_src>
import functools

import jax
import jax.numpy as jnp
from jax.experimental import pallas as pl
from jax.experimental.pallas import tpu as pltpu

_MATMUL_DTYPE = jnp.bfloat16      # MXU input dtype (all matmuls accumulate in f32)
_CROSS_DTYPE = jnp.bfloat16       # dtype of activations crossing HBM between kernels
_BN_EPS = 1e-5
_PAD_L = 8                        # left margin in the conv2 scratch -> sublane-aligned store

_CPARAMS = pltpu.CompilerParams(
    dimension_semantics=("parallel",),           # batch axis: shards across v7x's 2 TCs
    vmem_limit_bytes=48 * 1024 * 1024)


# ------------------------------ small shared helpers ------------------------------

def _silu(t):
    return t * (1.0 / (1.0 + jnp.exp(-t)))


def _mxu(a, b):
    """bf16-in / f32-accumulate MXU matmul."""
    return jnp.dot(a.astype(_MATMUL_DTYPE), b.astype(_MATMUL_DTYPE),
                   preferred_element_type=jnp.float32)


def _finalize_bn(s, ss, count, gamma, beta):
    """(sum, sum-of-squares, count) -> training-mode BatchNorm affine (mul, add)."""
    mean = s / count
    var = jnp.maximum(ss / count - mean * mean, 0.0)
    mul = gamma * jax.lax.rsqrt(var + _BN_EPS)            # (1, C)
    add = beta - mean * mul
    return mul.astype(jnp.float32), add.astype(jnp.float32)


def _affine_from_partials(s_tiles, ss_tiles, count, gamma, beta):
    """Fold per-image (N, 1, C) partial sums into a global BN affine."""
    return _finalize_bn(jnp.sum(s_tiles, axis=(0, 1)),
                        jnp.sum(ss_tiles, axis=(0, 1)), count, gamma, beta)


def _img_spec(*dims):
    """Per-image block: leading batch dim squeezed, remaining dims full."""
    zeros = (0,) * len(dims)
    return pl.BlockSpec((None,) + tuple(dims), lambda n, _z=zeros: (n,) + _z)


def _const_spec(shape):
    """Whole-array block with a constant index map (weights fetched once)."""
    zeros = (0,) * len(shape)
    return pl.BlockSpec(tuple(shape), lambda n, _z=zeros: _z)


# ---------------------------------- Pallas kernels ----------------------------------

def _make_head_kernel(has_proj):
    """time-MLP + modulation; writes xmod and bn1 / bn_sc partial statistics."""
    def kernel(x_ref, temb_ref, ws_ref, bs_ref, wsh_ref, bsh_ref, w1_ref, *rest):
        if has_proj:
            (wsc_ref, xmod_ref, s1_ref, ss1_ref, ssc_ref, sssc_ref) = rest
        else:
            (xmod_ref, s1_ref, ss1_ref) = rest
        # mlp = Sequential(SiLU, Linear); columns pre-split into the chunk(2, dim=1) halves.
        t = _silu(temb_ref[...])                                            # (1, T)
        scale = jnp.dot(t, ws_ref[...], preferred_element_type=jnp.float32) + bs_ref[...]
        shift = jnp.dot(t, wsh_ref[...], preferred_element_type=jnp.float32) + bsh_ref[...]
        # x = x * (scale + 1) + shift, broadcast in-kernel (no HBM broadcast array).
        xm = (x_ref[...] * (scale + 1.0) + shift).astype(xmod_ref.dtype)    # (R, Cin)
        xmod_ref[...] = xm
        # bn1 / bn_sc partial stats: sum and sum-of-squares in one sweep.
        y1 = _mxu(xm, w1_ref[...])                                          # (R, P)
        s1_ref[...] = jnp.sum(y1, axis=0, keepdims=True)
        ss1_ref[...] = jnp.sum(y1 * y1, axis=0, keepdims=True)
        if has_proj:
            ysc = _mxu(xm, wsc_ref[...])                                    # (R, Cout)
            ssc_ref[...] = jnp.sum(ysc, axis=0, keepdims=True)
            sssc_ref[...] = jnp.sum(ysc * ysc, axis=0, keepdims=True)
    return kernel


def _make_conv2_kernel(h, w):
    """conv1-apply (recomputed) + bn1 + relu + fused 3x3 conv2 + bn2 partial statistics."""
    def kernel(xmod_ref, w1_ref, mul1_ref, add1_ref, w2_ref,
               y2_ref, s2_ref, ss2_ref, pad_ref):
        r = h * w
        p = w2_ref.shape[1]
        y1 = _mxu(xmod_ref[...], w1_ref[...])
        out1 = jnp.maximum(y1 * mul1_ref[...] + add1_ref[...], 0.0)         # (R, P) f32
        # Zero-padded operand lives only in VMEM: interior store at column offset _PAD_L
        # (sublane-aligned); logical pad column c maps to buffer column c + _PAD_L - 1.
        pad_ref[...] = jnp.zeros(pad_ref.shape, pad_ref.dtype)
        pad_ref[1:h + 1, _PAD_L:_PAD_L + w, :] = out1.reshape(h, w, p)
        # conv2 (3x3, pad=1, stride=1): 9 shifted taps sliced from the scratch, fused into
        # one (R, 9P) x (9P, P) MXU contraction.
        taps = [pad_ref[kh:kh + h, _PAD_L - 1 + kw:_PAD_L - 1 + kw + w, :].reshape(r, p)
                for kh in range(3) for kw in range(3)]
        big = jnp.concatenate(taps, axis=-1)                                # (R, 9P)
        y2 = _mxu(big, w2_ref[...])                                         # (R, P) f32
        y2_ref[...] = y2.astype(y2_ref.dtype)
        s2_ref[...] = jnp.sum(y2, axis=0, keepdims=True)
        ss2_ref[...] = jnp.sum(y2 * y2, axis=0, keepdims=True)
    return kernel


def _stats3_kernel(y2_ref, mul2_ref, add2_ref, w3_ref, s3_ref, ss3_ref):
    """bn2-apply + conv3, emitting bn3 partial statistics (conv3 is recomputed in pass 4)."""
    y2 = y2_ref[...].astype(jnp.float32)
    out2 = jnp.maximum(y2 * mul2_ref[...] + add2_ref[...], 0.0)
    y3 = _mxu(out2, w3_ref[...])                                            # (R, Cout)
    s3_ref[...] = jnp.sum(y3, axis=0, keepdims=True)
    ss3_ref[...] = jnp.sum(y3 * y3, axis=0, keepdims=True)


def _make_final_kernel(has_proj):
    """bn2-apply + conv3 + bn3 + shortcut (1x1 conv + BN or identity) + residual + relu."""
    def kernel(y2_ref, xmod_ref, mul2_ref, add2_ref, w3_ref, mul3_ref, add3_ref, *rest):
        if has_proj:
            (wsc_ref, mulsc_ref, addsc_ref, out_ref) = rest
        else:
            (out_ref,) = rest
        y2 = y2_ref[...].astype(jnp.float32)
        out2 = jnp.maximum(y2 * mul2_ref[...] + add2_ref[...], 0.0)         # relu(bn2)
        y3 = _mxu(out2, w3_ref[...]) * mul3_ref[...] + add3_ref[...]        # bn3(conv3)
        if has_proj:
            # shortcut = Dropout(0.0) [identity] -> 1x1 conv -> BN, on the modulated x.
            sc = _mxu(xmod_ref[...], wsc_ref[...]) * mulsc_ref[...] + addsc_ref[...]
        else:
            sc = xmod_ref[...].astype(jnp.float32)                          # identity shortcut
        out_ref[...] = jnp.maximum(y3 + sc, 0.0)
    return kernel


# ------------------------------------- wrapper -------------------------------------

def bottleneck_time_emb_forward(params, x_nchw, time_emb, *, stride=1):
    """Forward of BottleneckTimeEmb (expansion=4).  x: (N, Cin, H, W), time_emb: (N, T)."""
    if stride != 1:
        # TODO(synk): stride > 1 needs strided tap reads in the conv2 kernel.
        raise NotImplementedError("only stride=1 (the module default) is implemented")
    n, cin, h, w = x_nchw.shape
    planes = params["w1"].shape[1]
    cout = params["w3"].shape[1]
    r = h * w
    m = n * r
    has_proj = "wsc" in params
    xmod_dtype = _CROSS_DTYPE if has_proj else jnp.float32
    tdim = time_emb.shape[-1]

    # NCHW -> NHWC once so channels sit on the 128-lane axis.
    x = jnp.transpose(x_nchw, (0, 2, 3, 1)).astype(jnp.float32).reshape(n, r, cin)
    temb = time_emb.astype(jnp.float32).reshape(n, 1, tdim)

    # ---- pass 1: time modulation + bn1 / bn_sc partial statistics -------------------
    head_in = [x, temb, params["mlp_w_scale"], params["mlp_b_scale"],
               params["mlp_w_shift"], params["mlp_b_shift"], params["w1"]]
    head_in_specs = [_img_spec(r, cin), _img_spec(1, tdim),
                     _const_spec((tdim, cin)), _const_spec((1, cin)),
                     _const_spec((tdim, cin)), _const_spec((1, cin)),
                     _const_spec((cin, planes))]
    head_out_shape = [jax.ShapeDtypeStruct((n, r, cin), xmod_dtype),
                      jax.ShapeDtypeStruct((n, 1, planes), jnp.float32),
                      jax.ShapeDtypeStruct((n, 1, planes), jnp.float32)]
    head_out_specs = [_img_spec(r, cin), _img_spec(1, planes), _img_spec(1, planes)]
    if has_proj:
        head_in.append(params["wsc"])
        head_in_specs.append(_const_spec((cin, cout)))
        head_out_shape += [jax.ShapeDtypeStruct((n, 1, cout), jnp.float32)] * 2
        head_out_specs += [_img_spec(1, cout)] * 2

    head_out = pl.pallas_call(
        _make_head_kernel(has_proj),
        grid=(n,),
        in_specs=head_in_specs,
        out_specs=tuple(head_out_specs),
        out_shape=tuple(head_out_shape),
        compiler_params=_CPARAMS,
    )(*head_in)
    if has_proj:
        xmod, s1, ss1, ssc, sssc = head_out
    else:
        xmod, s1, ss1 = head_out

    mul1, add1 = _affine_from_partials(s1, ss1, m, params["g1"], params["b1"])

    # ---- pass 2: conv1-apply + fused 3x3 conv2 + bn2 partial statistics -------------
    y2pre, s2, ss2 = pl.pallas_call(
        _make_conv2_kernel(h, w),
        grid=(n,),
        in_specs=[_img_spec(r, cin), _const_spec((cin, planes)),
                  _const_spec((1, planes)), _const_spec((1, planes)),
                  _const_spec((9 * planes, planes))],
        out_specs=(_img_spec(r, planes), _img_spec(1, planes), _img_spec(1, planes)),
        out_shape=(jax.ShapeDtypeStruct((n, r, planes), _CROSS_DTYPE),
                   jax.ShapeDtypeStruct((n, 1, planes), jnp.float32),
                   jax.ShapeDtypeStruct((n, 1, planes), jnp.float32)),
        scratch_shapes=[pltpu.VMEM((h + 2, w + _PAD_L + 8, planes), jnp.float32)],
        compiler_params=_CPARAMS,
    )(xmod, params["w1"], mul1, add1, params["w2"])

    mul2, add2 = _affine_from_partials(s2, ss2, m, params["g2"], params["b2"])

    # ---- pass 3: bn2-apply + conv3 -> bn3 partial statistics -------------------------
    s3, ss3 = pl.pallas_call(
        _stats3_kernel,
        grid=(n,),
        in_specs=[_img_spec(r, planes), _const_spec((1, planes)),
                  _const_spec((1, planes)), _const_spec((planes, cout))],
        out_specs=(_img_spec(1, cout), _img_spec(1, cout)),
        out_shape=(jax.ShapeDtypeStruct((n, 1, cout), jnp.float32),
                   jax.ShapeDtypeStruct((n, 1, cout), jnp.float32)),
        compiler_params=_CPARAMS,
    )(y2pre, mul2, add2, params["w3"])

    mul3, add3 = _affine_from_partials(s3, ss3, m, params["g3"], params["b3"])

    # ---- pass 4: bn2 + conv3 + bn3 + shortcut + residual + relu ----------------------
    final_in = [y2pre, xmod, mul2, add2, params["w3"], mul3, add3]
    final_specs = [_img_spec(r, planes), _img_spec(r, cin),
                   _const_spec((1, planes)), _const_spec((1, planes)),
                   _const_spec((planes, cout)),
                   _const_spec((1, cout)), _const_spec((1, cout))]
    if has_proj:
        mulsc, addsc = _affine_from_partials(ssc, sssc, m, params["gsc"], params["bsc"])
        final_in += [params["wsc"], mulsc, addsc]
        final_specs += [_const_spec((cin, cout)),
                        _const_spec((1, cout)), _const_spec((1, cout))]

    out2d = pl.pallas_call(
        _make_final_kernel(has_proj),
        grid=(n,),
        in_specs=final_specs,
        out_specs=_img_spec(r, cout),
        out_shape=jax.ShapeDtypeStruct((n, r, cout), jnp.float32),
        compiler_params=_CPARAMS,
    )(*final_in)

    # rows -> NHWC -> NCHW (matches the PyTorch output layout)
    return jnp.transpose(out2d.reshape(n, h, w, cout), (0, 3, 1, 2))


# ----------------------------------- parameters ------------------------------------

def init_params(key, *, in_planes, planes, time_emb_dim, stride=1, expansion=4):
    cout = expansion * planes
    ks = jax.random.split(key, 8)

    def rnd(k, shape, s):
        return jax.random.normal(k, shape, jnp.float32) * s

    p = {
        # mlp = Sequential(SiLU, Linear(T, 2*in_planes)); output columns split into the
        # chunk(2, dim=1) halves: [:in_planes] -> scale, [in_planes:] -> shift.
        "mlp_w_scale": rnd(ks[0], (time_emb_dim, in_planes), 0.2),
        "mlp_w_shift": rnd(ks[1], (time_emb_dim, in_planes), 0.2),
        "mlp_b_scale": rnd(ks[2], (1, in_planes), 0.1),
        "mlp_b_shift": rnd(ks[3], (1, in_planes), 0.1),
        # conv1 1x1: (Cin, P)  == torch conv1.weight[:, :, 0, 0].T
        "w1": rnd(ks[4], (in_planes, planes), 0.2).astype(_MATMUL_DTYPE),
        "g1": jnp.ones((1, planes), jnp.float32),
        "b1": jnp.zeros((1, planes), jnp.float32),
        # conv2 3x3: (kh, kw, Cin, Cout) flattened to (9P, P); row (kh*3+kw)*P + ci matches
        # the in-kernel tap/column ordering (== torch conv2.weight.permute(2, 3, 1, 0)).
        "w2": rnd(ks[5], (3, 3, planes, planes), 0.1)
        .reshape(9 * planes, planes).astype(_MATMUL_DTYPE),
        "g2": jnp.ones((1, planes), jnp.float32),
        "b2": jnp.zeros((1, planes), jnp.float32),
        # conv3 1x1: (P, expansion*P)
        "w3": rnd(ks[6], (planes, cout), 0.15).astype(_MATMUL_DTYPE),
        "g3": jnp.ones((1, cout), jnp.float32),
        "b3": jnp.zeros((1, cout), jnp.float32),
    }
    if stride != 1 or in_planes != cout:
        p["wsc"] = rnd(ks[7], (in_planes, cout), 0.15).astype(_MATMUL_DTYPE)
        p["gsc"] = jnp.ones((1, cout), jnp.float32)
        p["bsc"] = jnp.zeros((1, cout), jnp.float32)
    return p


# ------------------------------ pure-JAX reference (check) --------------------------

def _reference_forward(params, x_nchw, time_emb, *, stride=1):
    assert stride == 1
    n, cin, h, w = x_nchw.shape
    planes = params["w1"].shape[1]
    cout = params["w3"].shape[1]
    has_proj = "wsc" in params
    m = n * h * w
    xmod_dtype = _CROSS_DTYPE if has_proj else jnp.float32

    x = jnp.transpose(x_nchw, (0, 2, 3, 1)).astype(jnp.float32)             # NHWC
    t = _silu(time_emb.astype(jnp.float32))
    scale = t @ params["mlp_w_scale"] + params["mlp_b_scale"]
    shift = t @ params["mlp_w_shift"] + params["mlp_b_shift"]
    xm = x * (scale[:, None, None, :] + 1.0) + shift[:, None, None, :]
    xm2 = xm.reshape(m, cin).astype(xmod_dtype)        # same rounding as the HBM crossing

    y1 = _mxu(xm2, params["w1"])
    mul1, add1 = _finalize_bn(jnp.sum(y1, 0), jnp.sum(y1 * y1, 0), m,
                              params["g1"], params["b1"])
    out1 = jnp.maximum(y1 * mul1 + add1, 0.0)
    pad1 = jnp.pad(out1.reshape(n, h, w, planes), ((0, 0), (1, 1), (1, 1), (0, 0)))
    taps = [pad1[:, kh:kh + h, kw:kw + w, :].reshape(m, planes)
            for kh in range(3) for kw in range(3)]
    y2 = _mxu(jnp.concatenate(taps, axis=-1), params["w2"])
    mul2, add2 = _finalize_bn(jnp.sum(y2, 0), jnp.sum(y2 * y2, 0), m,
                              params["g2"], params["b2"])
    y2 = y2.astype(_CROSS_DTYPE).astype(jnp.float32)   # same rounding as the HBM crossing
    out2 = jnp.maximum(y2 * mul2 + add2, 0.0)
    y3 = _mxu(out2, params["w3"])
    mul3, add3 = _finalize_bn(jnp.sum(y3, 0), jnp.sum(y3 * y3, 0), m,
                              params["g3"], params["b3"])
    y3 = y3 * mul3 + add3
    if has_proj:
        ysc = _mxu(xm2, params["wsc"])
        mulsc, addsc = _finalize_bn(jnp.sum(ysc, 0), jnp.sum(ysc * ysc, 0), m,
                                    params["gsc"], params["bsc"])
        sc = ysc * mulsc + addsc
    else:
        sc = xm2.astype(jnp.float32)
    out = jnp.maximum(y3 + sc, 0.0)
    return jnp.transpose(out.reshape(n, h, w, cout), (0, 3, 1, 2))


# --------------------------------------- main ---------------------------------------

if __name__ == "__main__":
    key = jax.random.PRNGKey(0)
    kp, kx, kt = jax.random.split(key, 3)

    N, H, W = 2, 16, 16
    in_planes, planes, time_emb_dim, stride = 16, 32, 32, 1     # expansion*planes = 128

    params = init_params(kp, in_planes=in_planes, planes=planes,
                         time_emb_dim=time_emb_dim, stride=stride)
    x = jax.random.normal(kx, (N, in_planes, H, W), jnp.float32)            # NCHW like torch
    t_emb = jax.random.normal(kt, (N, time_emb_dim), jnp.float32)

    fwd = jax.jit(functools.partial(bottleneck_time_emb_forward, stride=stride))
    out = jax.block_until_ready(fwd(params, x, t_emb))
    assert out.shape == (N, 4 * planes, H, W), out.shape

    ref = _reference_forward(params, x, t_emb, stride=stride)
    max_err = float(jnp.max(jnp.abs(out - ref)))
    assert max_err < 2e-2, f"mismatch vs pure-JAX reference: max abs err {max_err}"

    print("KERNEL_OK")
</pallas_src>

<mosaic_0001>
module attributes {stable_mosaic.version = 11 : i64} {
  func.func @kernel(%arg0: i32, %arg1: memref<1x256x16xf32, #tpu.memory_space<vmem>>, %arg2: memref<1x1x32xf32, #tpu.memory_space<vmem>>, %arg3: memref<32x16xf32, #tpu.memory_space<vmem>>, %arg4: memref<1x16xf32, #tpu.memory_space<vmem>>, %arg5: memref<32x16xf32, #tpu.memory_space<vmem>>, %arg6: memref<1x16xf32, #tpu.memory_space<vmem>>, %arg7: memref<16x32xbf16, #tpu.memory_space<vmem>>, %arg8: memref<16x128xbf16, #tpu.memory_space<vmem>>, %arg9: memref<1x256x16xbf16, #tpu.memory_space<vmem>>, %arg10: memref<1x1x32xf32, #tpu.memory_space<vmem>>, %arg11: memref<1x1x32xf32, #tpu.memory_space<vmem>>, %arg12: memref<1x1x128xf32, #tpu.memory_space<vmem>>, %arg13: memref<1x1x128xf32, #tpu.memory_space<vmem>>) attributes {dimension_semantics = [#tpu.dimension_semantics<parallel>], iteration_bounds = array<i64: 2>, scalar_prefetch = 0 : i64, scratch_operands = 0 : i64, tpu.core_type = #tpu.core_type<tc>, window_params = [{transform_indices = @transform_0, window_bounds = array<i64: 1, 256, 16>}, {transform_indices = @transform_1, window_bounds = array<i64: 1, 1, 32>}, {pipeline_mode = #tpu.pipeline_mode<synchronous>, transform_indices = @transform_2, window_bounds = array<i64: 32, 16>}, {pipeline_mode = #tpu.pipeline_mode<synchronous>, transform_indices = @transform_3, window_bounds = array<i64: 1, 16>}, {pipeline_mode = #tpu.pipeline_mode<synchronous>, transform_indices = @transform_4, window_bounds = array<i64: 32, 16>}, {pipeline_mode = #tpu.pipeline_mode<synchronous>, transform_indices = @transform_5, window_bounds = array<i64: 1, 16>}, {pipeline_mode = #tpu.pipeline_mode<synchronous>, transform_indices = @transform_6, window_bounds = array<i64: 16, 32>}, {pipeline_mode = #tpu.pipeline_mode<synchronous>, transform_indices = @transform_7, window_bounds = array<i64: 16, 128>}, {transform_indices = @transform_8, window_bounds = array<i64: 1, 256, 16>}, {transform_indices = @transform_9, window_bounds = array<i64: 1, 1, 32>}, {transform_indices = @transform_10, window_bounds = array<i64: 1, 1, 32>}, {transform_indices = @transform_11, window_bounds = array<i64: 1, 1, 128>}, {transform_indices = @transform_12, window_bounds = array<i64: 1, 1, 128>}]} {
    %c0 = arith.constant 0 : index
    %c0_0 = arith.constant 0 : index
    %c0_1 = arith.constant 0 : index
    %0 = vector.load %arg2[%c0, %c0_0, %c0_1] : memref<1x1x32xf32, #tpu.memory_space<vmem>>, vector<1x1x32xf32>
    %1 = vector.shape_cast %0 : vector<1x1x32xf32> to vector<1x32xf32>
    %cst = arith.constant 0.000000e+00 : f32
    %2 = vector.broadcast %cst : f32 to vector<1x32xf32>
    %3 = arith.subf %2, %1 : vector<1x32xf32>
    %4 = math.exp %3 : vector<1x32xf32>
    %cst_2 = arith.constant 1.000000e+00 : f32
    %5 = vector.broadcast %cst_2 : f32 to vector<1x32xf32>
    %6 = arith.addf %5, %4 : vector<1x32xf32>
    %cst_3 = arith.constant 1.000000e+00 : f32
    %7 = vector.broadcast %cst_3 : f32 to vector<1x32xf32>
    %8 = arith.divf %7, %6 : vector<1x32xf32>
    %9 = arith.mulf %1, %8 : vector<1x32xf32>
    %c0_4 = arith.constant 0 : index
    %c0_5 = arith.constant 0 : index
    %10 = vector.load %arg3[%c0_4, %c0_5] : memref<32x16xf32, #tpu.memory_space<vmem>>, vector<32x16xf32>
    %cst_6 = arith.constant dense<0.000000e+00> : vector<1x16xf32>
    %11 = tpu.matmul %9, %10, %cst_6 {dimension_numbers = #tpu.dot_dimension_numbers<[1], [0], [0], [1], [0, 0, 1, 1], [], []>} : vector<1x32xf32>, vector<32x16xf32>, vector<1x16xf32> -> vector<1x16xf32>
    %c0_7 = arith.constant 0 : index
    %c0_8 = arith.constant 0 : index
    %12 = vector.load %arg4[%c0_7, %c0_8] : memref<1x16xf32, #tpu.memory_space<vmem>>, vector<1x16xf32>
    %13 = arith.addf %11, %12 : vector<1x16xf32>
    %c0_9 = arith.constant 0 : index
    %c0_10 = arith.constant 0 : index
    %14 = vector.load %arg5[%c0_9, %c0_10] : memref<32x16xf32, #tpu.memory_space<vmem>>, vector<32x16xf32>
    %cst_11 = arith.constant dense<0.000000e+00> : vector<1x16xf32>
    %15 = tpu.matmul %9, %14, %cst_11 {dimension_numbers = #tpu.dot_dimension_numbers<[1], [0], [0], [1], [0, 0, 1, 1], [], []>} : vector<1x32xf32>, vector<32x16xf32>, vector<1x16xf32> -> vector<1x16xf32>
    %c0_12 = arith.constant 0 : index
    %c0_13 = arith.constant 0 : index
    %16 = vector.load %arg6[%c0_12, %c0_13] : memref<1x16xf32, #tpu.memory_space<vmem>>, vector<1x16xf32>
    %17 = arith.addf %15, %16 : vector<1x16xf32>
    %c0_14 = arith.constant 0 : index
    %c0_15 = arith.constant 0 : index
    %c0_16 = arith.constant 0 : index
    %18 = vector.load %arg1[%c0_14, %c0_15, %c0_16] : memref<1x256x16xf32, #tpu.memory_space<vmem>>, vector<1x256x16xf32>
    %19 = vector.shape_cast %18 : vector<1x256x16xf32> to vector<256x16xf32>
    %cst_17 = arith.constant 1.000000e+00 : f32
    %20 = vector.broadcast %cst_17 : f32 to vector<1x16xf32>
    %21 = arith.addf %13, %20 : vector<1x16xf32>
    %22 = vector.broadcast %21 : vector<1x16xf32> to vector<256x16xf32>
    %23 = arith.mulf %19, %22 : vector<256x16xf32>
    %24 = vector.broadcast %17 : vector<1x16xf32> to vector<256x16xf32>
    %25 = arith.addf %23, %24 : vector<256x16xf32>
    %26 = arith.truncf %25 : vector<256x16xf32> to vector<256x16xbf16>
    %c0_18 = arith.constant 0 : index
    %c0_19 = arith.constant 0 : index
    %c0_20 = arith.constant 0 : index
    %27 = vector.load %arg9[%c0_18, %c0_19, %c0_20] : memref<1x256x16xbf16, #tpu.memory_space<vmem>>, vector<1x256x16xbf16>
    %28 = vector.shape_cast %27 : vector<1x256x16xbf16> to vector<256x16xbf16>
    %29 = vector.shape_cast %26 : vector<256x16xbf16> to vector<1x256x16xbf16>
    tpu.vector_store %arg9[%c0_18, %c0_19, %c0_20], %29 {strides = array<i32>} : memref<1x256x16xbf16, #tpu.memory_space<vmem>>, vector<1x256x16xbf16>,
    %c0_21 = arith.constant 0 : index
    %c0_22 = arith.constant 0 : index
    %30 = vector.load %arg7[%c0_21, %c0_22] : memref<16x32xbf16, #tpu.memory_space<vmem>>, vector<16x32xbf16>
    %cst_23 = arith.constant dense<0.000000e+00> : vector<256x32xf32>
    %31 = tpu.matmul %26, %30, %cst_23 {dimension_numbers = #tpu.dot_dimension_numbers<[1], [0], [0], [1], [0, 0, 1, 1], [], []>} : vector<256x16xbf16>, vector<16x32xbf16>, vector<256x32xf32> -> vector<256x32xf32>
    %cst_24 = arith.constant dense<0.000000e+00> : vector<32xf32>
    %32 = vector.multi_reduction <add>, %31, %cst_24 [0] : vector<256x32xf32> to vector<32xf32>
    %33 = vector.shape_cast %32 : vector<32xf32> to vector<1x32xf32>
    %c0_25 = arith.constant 0 : index
    %c0_26 = arith.constant 0 : index
    %c0_27 = arith.constant 0 : index
    %34 = vector.load %arg10[%c0_25, %c0_26, %c0_27] : memref<1x1x32xf32, #tpu.memory_space<vmem>>, vector<1x1x32xf32>
    %35 = vector.shape_cast %34 : vector<1x1x32xf32> to vector<1x32xf32>
    %36 = vector.shape_cast %33 : vector<1x32xf32> to vector<1x1x32xf32>
    tpu.vector_store %arg10[%c0_25, %c0_26, %c0_27], %36 {strides = array<i32>} : memref<1x1x32xf32, #tpu.memory_space<vmem>>, vector<1x1x32xf32>,
    %37 = arith.mulf %31, %31 : vector<256x32xf32>
    %cst_28 = arith.constant dense<0.000000e+00> : vector<32xf32>
    %38 = vector.multi_reduction <add>, %37, %cst_28 [0] : vector<256x32xf32> to vector<32xf32>
    %39 = vector.shape_cast %38 : vector<32xf32> to vector<1x32xf32>
    %c0_29 = arith.constant 0 : index
    %c0_30 = arith.constant 0 : index
    %c0_31 = arith.constant 0 : index
    %40 = vector.load %arg11[%c0_29, %c0_30, %c0_31] : memref<1x1x32xf32, #tpu.memory_space<vmem>>, vector<1x1x32xf32>
    %41 = vector.shape_cast %40 : vector<1x1x32xf32> to vector<1x32xf32>
    %42 = vector.shape_cast %39 : vector<1x32xf32> to vector<1x1x32xf32>
    tpu.vector_store %arg11[%c0_29, %c0_30, %c0_31], %42 {strides = array<i32>} : memref<1x1x32xf32, #tpu.memory_space<vmem>>, vector<1x1x32xf32>,
    %c0_32 = arith.constant 0 : index
    %c0_33 = arith.constant 0 : index
    %43 = vector.load %arg8[%c0_32, %c0_33] : memref<16x128xbf16, #tpu.memory_space<vmem>>, vector<16x128xbf16>
    %cst_34 = arith.constant dense<0.000000e+00> : vector<256x128xf32>
    %44 = tpu.matmul %26, %43, %cst_34 {dimension_numbers = #tpu.dot_dimension_numbers<[1], [0], [0], [1], [0, 0, 1, 1], [], []>} : vector<256x16xbf16>, vector<16x128xbf16>, vector<256x128xf32> -> vector<256x128xf32>
    %cst_35 = arith.constant dense<0.000000e+00> : vector<128xf32>
    %45 = vector.multi_reduction <add>, %44, %cst_35 [0] : vector<256x128xf32> to vector<128xf32>
    %46 = vector.shape_cast %45 : vector<128xf32> to vector<1x128xf32>
    %c0_36 = arith.constant 0 : index
    %c0_37 = arith.constant 0 : index
    %c0_38 = arith.constant 0 : index
    %47 = vector.load %arg12[%c0_36, %c0_37, %c0_38] : memref<1x1x128xf32, #tpu.memory_space<vmem>>, vector<1x1x128xf32>
    %48 = vector.shape_cast %47 : vector<1x1x128xf32> to vector<1x128xf32>
    %49 = vector.shape_cast %46 : vector<1x128xf32> to vector<1x1x128xf32>
    tpu.vector_store %arg12[%c0_36, %c0_37, %c0_38], %49 {strides = array<i32>} : memref<1x1x128xf32, #tpu.memory_space<vmem>>, vector<1x1x128xf32>,
    %50 = arith.mulf %44, %44 : vector<256x128xf32>
    %cst_39 = arith.constant dense<0.000000e+00> : vector<128xf32>
    %51 = vector.multi_reduction <add>, %50, %cst_39 [0] : vector<256x128xf32> to vector<128xf32>
    %52 = vector.shape_cast %51 : vector<128xf32> to vector<1x128xf32>
    %c0_40 = arith.constant 0 : index
    %c0_41 = arith.constant 0 : index
    %c0_42 = arith.constant 0 : index
    %53 = vector.load %arg13[%c0_40, %c0_41, %c0_42] : memref<1x1x128xf32, #tpu.memory_space<vmem>>, vector<1x1x128xf32>
    %54 = vector.shape_cast %53 : vector<1x1x128xf32> to vector<1x128xf32>
    %55 = vector.shape_cast %52 : vector<1x128xf32> to vector<1x1x128xf32>
    tpu.vector_store %arg13[%c0_40, %c0_41, %c0_42], %55 {strides = array<i32>} : memref<1x1x128xf32, #tpu.memory_space<vmem>>, vector<1x1x128xf32>,
    return
  }
  func.func @transform_0(%arg0: i32) -> (i32, i32, i32) {
    %c0_i32 = arith.constant 0 : i32
    %c0_i32_0 = arith.constant 0 : i32
    %c0_i32_1 = arith.constant 0 : i32
    return %arg0, %c0_i32, %c0_i32_0 : i32, i32, i32
  }
  func.func @transform_1(%arg0: i32) -> (i32, i32, i32) {
    %c0_i32 = arith.constant 0 : i32
    %c0_i32_0 = arith.constant 0 : i32
    %c0_i32_1 = arith.constant 0 : i32
    return %arg0, %c0_i32, %c0_i32_0 : i32, i32, i32
  }
  func.func @transform_2(%arg0: i32) -> (i32, i32) {
    %c0_i32 = arith.constant 0 : i32
    %c0_i32_0 = arith.constant 0 : i32
    %c0_i32_1 = arith.constant 0 : i32
    return %c0_i32, %c0_i32_0 : i32, i32
  }
  func.func @transform_3(%arg0: i32) -> (i32, i32) {
    %c0_i32 = arith.constant 0 : i32
    %c0_i32_0 = arith.constant 0 : i32
    %c0_i32_1 = arith.constant 0 : i32
    return %c0_i32, %c0_i32_0 : i32, i32
  }
  func.func @transform_4(%arg0: i32) -> (i32, i32) {
    %c0_i32 = arith.constant 0 : i32
    %c0_i32_0 = arith.constant 0 : i32
    %c0_i32_1 = arith.constant 0 : i32
    return %c0_i32, %c0_i32_0 : i32, i32
  }
  func.func @transform_5(%arg0: i32) -> (i32, i32) {
    %c0_i32 = arith.constant 0 : i32
    %c0_i32_0 = arith.constant 0 : i32
    %c0_i32_1 = arith.constant 0 : i32
    return %c0_i32, %c0_i32_0 : i32, i32
  }
  func.func @transform_6(%arg0: i32) -> (i32, i32) {
    %c0_i32 = arith.constant 0 : i32
    %c0_i32_0 = arith.constant 0 : i32
    %c0_i32_1 = arith.constant 0 : i32
    return %c0_i32, %c0_i32_0 : i32, i32
  }
  func.func @transform_7(%arg0: i32) -> (i32, i32) {
    %c0_i32 = arith.constant 0 : i32
    %c0_i32_0 = arith.constant 0 : i32
    %c0_i32_1 = arith.constant 0 : i32
    return %c0_i32, %c0_i32_0 : i32, i32
  }
  func.func @transform_8(%arg0: i32) -> (i32, i32, i32) {
    %c0_i32 = arith.constant 0 : i32
    %c0_i32_0 = arith.constant 0 : i32
    %c0_i32_1 = arith.constant 0 : i32
    return %arg0, %c0_i32, %c0_i32_0 : i32, i32, i32
  }
  func.func @transform_9(%arg0: i32) -> (i32, i32, i32) {
    %c0_i32 = arith.constant 0 : i32
    %c0_i32_0 = arith.constant 0 : i32
    %c0_i32_1 = arith.constant 0 : i32
    return %arg0, %c0_i32, %c0_i32_0 : i32, i32, i32
  }
  func.func @transform_10(%arg0: i32) -> (i32, i32, i32) {
    %c0_i32 = arith.constant 0 : i32
    %c0_i32_0 = arith.constant 0 : i32
    %c0_i32_1 = arith.constant 0 : i32
    return %arg0, %c0_i32, %c0_i32_0 : i32, i32, i32
  }
  func.func @transform_11(%arg0: i32) -> (i32, i32, i32) {
    %c0_i32 = arith.constant 0 : i32
    %c0_i32_0 = arith.constant 0 : i32
    %c0_i32_1 = arith.constant 0 : i32
    return %arg0, %c0_i32, %c0_i32_0 : i32, i32, i32
  }
  func.func @transform_12(%arg0: i32) -> (i32, i32, i32) {
    %c0_i32 = arith.constant 0 : i32
    %c0_i32_0 = arith.constant 0 : i32
    %c0_i32_1 = arith.constant 0 : i32
    return %arg0, %c0_i32, %c0_i32_0 : i32, i32, i32
  }
}

module attributes {stable_mosaic.version = 11 : i64} {
  func.func @_stats3_kernel(%arg0: i32, %arg1: memref<1x256x32xbf16, #tpu.memory_space<vmem>>, %arg2: memref<1x32xf32, #tpu.memory_space<vmem>>, %arg3: memref<1x32xf32, #tpu.memory_space<vmem>>, %arg4: memref<32x128xbf16, #tpu.memory_space<vmem>>, %arg5: memref<1x1x128xf32, #tpu.memory_space<vmem>>, %arg6: memref<1x1x128xf32, #tpu.memory_space<vmem>>) attributes {dimension_semantics = [#tpu.dimension_semantics<parallel>], iteration_bounds = array<i64: 2>, scalar_prefetch = 0 : i64, scratch_operands = 0 : i64, tpu.core_type = #tpu.core_type<tc>, window_params = [{transform_indices = @transform_0, window_bounds = array<i64: 1, 256, 32>}, {pipeline_mode = #tpu.pipeline_mode<synchronous>, transform_indices = @transform_1, window_bounds = array<i64: 1, 32>}, {pipeline_mode = #tpu.pipeline_mode<synchronous>, transform_indices = @transform_2, window_bounds = array<i64: 1, 32>}, {pipeline_mode = #tpu.pipeline_mode<synchronous>, transform_indices = @transform_3, window_bounds = array<i64: 32, 128>}, {transform_indices = @transform_4, window_bounds = array<i64: 1, 1, 128>}, {transform_indices = @transform_5, window_bounds = array<i64: 1, 1, 128>}]} {
    %c0 = arith.constant 0 : index
    %c0_0 = arith.constant 0 : index
    %c0_1 = arith.constant 0 : index
    %0 = vector.load %arg1[%c0, %c0_0, %c0_1] : memref<1x256x32xbf16, #tpu.memory_space<vmem>>, vector<1x256x32xbf16>
    %1 = vector.shape_cast %0 : vector<1x256x32xbf16> to vector<256x32xbf16>
    %2 = arith.extf %1 : vector<256x32xbf16> to vector<256x32xf32>
    %c0_2 = arith.constant 0 : index
    %c0_3 = arith.constant 0 : index
    %3 = vector.load %arg2[%c0_2, %c0_3] : memref<1x32xf32, #tpu.memory_space<vmem>>, vector<1x32xf32>
    %4 = vector.broadcast %3 : vector<1x32xf32> to vector<256x32xf32>
    %5 = arith.mulf %2, %4 : vector<256x32xf32>
    %c0_4 = arith.constant 0 : index
    %c0_5 = arith.constant 0 : index
    %6 = vector.load %arg3[%c0_4, %c0_5] : memref<1x32xf32, #tpu.memory_space<vmem>>, vector<1x32xf32>
    %7 = vector.broadcast %6 : vector<1x32xf32> to vector<256x32xf32>
    %8 = arith.addf %5, %7 : vector<256x32xf32>
    %cst = arith.constant 0.000000e+00 : f32
    %9 = vector.broadcast %cst : f32 to vector<256x32xf32>
    %10 = arith.maximumf %8, %9 : vector<256x32xf32>
    %c0_6 = arith.constant 0 : index
    %c0_7 = arith.constant 0 : index
    %11 = vector.load %arg4[%c0_6, %c0_7] : memref<32x128xbf16, #tpu.memory_space<vmem>>, vector<32x128xbf16>
    %12 = arith.truncf %10 : vector<256x32xf32> to vector<256x32xbf16>
    %cst_8 = arith.constant dense<0.000000e+00> : vector<256x128xf32>
    %13 = tpu.matmul %12, %11, %cst_8 {dimension_numbers = #tpu.dot_dimension_numbers<[1], [0], [0], [1], [0, 0, 1, 1], [], []>} : vector<256x32xbf16>, vector<32x128xbf16>, vector<256x128xf32> -> vector<256x128xf32>
    %cst_9 = arith.constant dense<0.000000e+00> : vector<128xf32>
    %14 = vector.multi_reduction <add>, %13, %cst_9 [0] : vector<256x128xf32> to vector<128xf32>
    %15 = vector.shape_cast %14 : vector<128xf32> to vector<1x128xf32>
    %c0_10 = arith.constant 0 : index
    %c0_11 = arith.constant 0 : index
    %c0_12 = arith.constant 0 : index
    %16 = vector.load %arg5[%c0_10, %c0_11, %c0_12] : memref<1x1x128xf32, #tpu.memory_space<vmem>>, vector<1x1x128xf32>
    %17 = vector.shape_cast %16 : vector<1x1x128xf32> to vector<1x128xf32>
    %18 = vector.shape_cast %15 : vector<1x128xf32> to vector<1x1x128xf32>
    tpu.vector_store %arg5[%c0_10, %c0_11, %c0_12], %18 {strides = array<i32>} : memref<1x1x128xf32, #tpu.memory_space<vmem>>, vector<1x1x128xf32>,
    %19 = arith.mulf %13, %13 : vector<256x128xf32>
    %cst_13 = arith.constant dense<0.000000e+00> : vector<128xf32>
    %20 = vector.multi_reduction <add>, %19, %cst_13 [0] : vector<256x128xf32> to vector<128xf32>
    %21 = vector.shape_cast %20 : vector<128xf32> to vector<1x128xf32>
    %c0_14 = arith.constant 0 : index
    %c0_15 = arith.constant 0 : index
    %c0_16 = arith.constant 0 : index
    %22 = vector.load %arg6[%c0_14, %c0_15, %c0_16] : memref<1x1x128xf32, #tpu.memory_space<vmem>>, vector<1x1x128xf32>
    %23 = vector.shape_cast %22 : vector<1x1x128xf32> to vector<1x128xf32>
    %24 = vector.shape_cast %21 : vector<1x128xf32> to vector<1x1x128xf32>
    tpu.vector_store %arg6[%c0_14, %c0_15, %c0_16], %24 {strides = array<i32>} : memref<1x1x128xf32, #tpu.memory_space<vmem>>, vector<1x1x128xf32>,
    return
  }
  func.func @transform_0(%arg0: i32) -> (i32, i32, i32) {
    %c0_i32 = arith.constant 0 : i32
    %c0_i32_0 = arith.constant 0 : i32
    %c0_i32_1 = arith.constant 0 : i32
    return %arg0, %c0_i32, %c0_i32_0 : i32, i32, i32
  }
  func.func @transform_1(%arg0: i32) -> (i32, i32) {
    %c0_i32 = arith.constant 0 : i32
    %c0_i32_0 = arith.constant 0 : i32
    %c0_i32_1 = arith.constant 0 : i32
    return %c0_i32, %c0_i32_0 : i32, i32
  }
  func.func @transform_2(%arg0: i32) -> (i32, i32) {
    %c0_i32 = arith.constant 0 : i32
    %c0_i32_0 = arith.constant 0 : i32
    %c0_i32_1 = arith.constant 0 : i32
    return %c0_i32, %c0_i32_0 : i32, i32
  }
  func.func @transform_3(%arg0: i32) -> (i32, i32) {
    %c0_i32 = arith.constant 0 : i32
    %c0_i32_0 = arith.constant 0 : i32
    %c0_i32_1 = arith.constant 0 : i32
    return %c0_i32, %c0_i32_0 : i32, i32
  }
  func.func @transform_4(%arg0: i32) -> (i32, i32, i32) {
    %c0_i32 = arith.constant 0 : i32
    %c0_i32_0 = arith.constant 0 : i32
    %c0_i32_1 = arith.constant 0 : i32
    return %arg0, %c0_i32, %c0_i32_0 : i32, i32, i32
  }
  func.func @transform_5(%arg0: i32) -> (i32, i32, i32) {
    %c0_i32 = arith.constant 0 : i32
    %c0_i32_0 = arith.constant 0 : i32
    %c0_i32_1 = arith.constant 0 : i32
    return %arg0, %c0_i32, %c0_i32_0 : i32, i32, i32
  }
}

module attributes {stable_mosaic.version = 11 : i64} {
  func.func @kernel(%arg0: i32, %arg1: memref<1x256x16xbf16, #tpu.memory_space<vmem>>, %arg2: memref<16x32xbf16, #tpu.memory_space<vmem>>, %arg3: memref<1x32xf32, #tpu.memory_space<vmem>>, %arg4: memref<1x32xf32, #tpu.memory_space<vmem>>, %arg5: memref<288x32xbf16, #tpu.memory_space<vmem>>, %arg6: memref<1x256x32xbf16, #tpu.memory_space<vmem>>, %arg7: memref<1x1x32xf32, #tpu.memory_space<vmem>>, %arg8: memref<1x1x32xf32, #tpu.memory_space<vmem>>, %arg9: memref<18x32x32xf32, #tpu.memory_space<vmem>>) attributes {dimension_semantics = [#tpu.dimension_semantics<parallel>], iteration_bounds = array<i64: 2>, scalar_prefetch = 0 : i64, scratch_operands = 1 : i64, tpu.core_type = #tpu.core_type<tc>, window_params = [{transform_indices = @transform_0, window_bounds = array<i64: 1, 256, 16>}, {pipeline_mode = #tpu.pipeline_mode<synchronous>, transform_indices = @transform_1, window_bounds = array<i64: 16, 32>}, {pipeline_mode = #tpu.pipeline_mode<synchronous>, transform_indices = @transform_2, window_bounds = array<i64: 1, 32>}, {pipeline_mode = #tpu.pipeline_mode<synchronous>, transform_indices = @transform_3, window_bounds = array<i64: 1, 32>}, {pipeline_mode = #tpu.pipeline_mode<synchronous>, transform_indices = @transform_4, window_bounds = array<i64: 288, 32>}, {transform_indices = @transform_5, window_bounds = array<i64: 1, 256, 32>}, {transform_indices = @transform_6, window_bounds = array<i64: 1, 1, 32>}, {transform_indices = @transform_7, window_bounds = array<i64: 1, 1, 32>}]} {
    %c0 = arith.constant 0 : index
    %c0_0 = arith.constant 0 : index
    %c0_1 = arith.constant 0 : index
    %0 = vector.load %arg1[%c0, %c0_0, %c0_1] : memref<1x256x16xbf16, #tpu.memory_space<vmem>>, vector<1x256x16xbf16>
    %1 = vector.shape_cast %0 : vector<1x256x16xbf16> to vector<256x16xbf16>
    %c0_2 = arith.constant 0 : index
    %c0_3 = arith.constant 0 : index
    %2 = vector.load %arg2[%c0_2, %c0_3] : memref<16x32xbf16, #tpu.memory_space<vmem>>, vector<16x32xbf16>
    %cst = arith.constant dense<0.000000e+00> : vector<256x32xf32>
    %3 = tpu.matmul %1, %2, %cst {dimension_numbers = #tpu.dot_dimension_numbers<[1], [0], [0], [1], [0, 0, 1, 1], [], []>} : vector<256x16xbf16>, vector<16x32xbf16>, vector<256x32xf32> -> vector<256x32xf32>
    %c0_4 = arith.constant 0 : index
    %c0_5 = arith.constant 0 : index
    %4 = vector.load %arg3[%c0_4, %c0_5] : memref<1x32xf32, #tpu.memory_space<vmem>>, vector<1x32xf32>
    %5 = vector.broadcast %4 : vector<1x32xf32> to vector<256x32xf32>
    %6 = arith.mulf %3, %5 : vector<256x32xf32>
    %c0_6 = arith.constant 0 : index
    %c0_7 = arith.constant 0 : index
    %7 = vector.load %arg4[%c0_6, %c0_7] : memref<1x32xf32, #tpu.memory_space<vmem>>, vector<1x32xf32>
    %8 = vector.broadcast %7 : vector<1x32xf32> to vector<256x32xf32>
    %9 = arith.addf %6, %8 : vector<256x32xf32>
    %cst_8 = arith.constant 0.000000e+00 : f32
    %10 = vector.broadcast %cst_8 : f32 to vector<256x32xf32>
    %11 = arith.maximumf %9, %10 : vector<256x32xf32>
    %cst_9 = arith.constant 0.000000e+00 : f32
    %12 = vector.broadcast %cst_9 : f32 to vector<18x32x32xf32>
    %c0_10 = arith.constant 0 : index
    %c0_11 = arith.constant 0 : index
    %c0_12 = arith.constant 0 : index
    %13 = vector.load %arg9[%c0_10, %c0_11, %c0_12] : memref<18x32x32xf32, #tpu.memory_space<vmem>>, vector<18x32x32xf32>
    tpu.vector_store %arg9[%c0_10, %c0_11, %c0_12], %12 {strides = array<i32>} : memref<18x32x32xf32, #tpu.memory_space<vmem>>, vector<18x32x32xf32>,
    %14 = vector.shape_cast %11 : vector<256x32xf32> to vector<16x16x32xf32>
    %c1 = arith.constant 1 : index
    %c8 = arith.constant 8 : index
    %c0_13 = arith.constant 0 : index
    %15 = vector.load %arg9[%c1, %c8, %c0_13] : memref<18x32x32xf32, #tpu.memory_space<vmem>>, vector<16x16x32xf32>
    tpu.vector_store %arg9[%c1, %c8, %c0_13], %14 {strides = array<i32>} : memref<18x32x32xf32, #tpu.memory_space<vmem>>, vector<16x16x32xf32>,
    %c0_14 = arith.constant 0 : index
    %c7 = arith.constant 7 : index
    %c0_15 = arith.constant 0 : index
    %16 = vector.load %arg9[%c0_14, %c7, %c0_15] : memref<18x32x32xf32, #tpu.memory_space<vmem>>, vector<16x16x32xf32>
    %17 = vector.shape_cast %16 : vector<16x16x32xf32> to vector<256x32xf32>
    %c0_16 = arith.constant 0 : index
    %c8_17 = arith.constant 8 : index
    %c0_18 = arith.constant 0 : index
    %18 = vector.load %arg9[%c0_16, %c8_17, %c0_18] : memref<18x32x32xf32, #tpu.memory_space<vmem>>, vector<16x16x32xf32>
    %19 = vector.shape_cast %18 : vector<16x16x32xf32> to vector<256x32xf32>
    %c0_19 = arith.constant 0 : index
    %c9 = arith.constant 9 : index
    %c0_20 = arith.constant 0 : index
    %20 = vector.load %arg9[%c0_19, %c9, %c0_20] : memref<18x32x32xf32, #tpu.memory_space<vmem>>, vector<16x16x32xf32>
    %21 = vector.shape_cast %20 : vector<16x16x32xf32> to vector<256x32xf32>
    %c1_21 = arith.constant 1 : index
    %c7_22 = arith.constant 7 : index
    %c0_23 = arith.constant 0 : index
    %22 = vector.load %arg9[%c1_21, %c7_22, %c0_23] : memref<18x32x32xf32, #tpu.memory_space<vmem>>, vector<16x16x32xf32>
    %23 = vector.shape_cast %22 : vector<16x16x32xf32> to vector<256x32xf32>
    %c1_24 = arith.constant 1 : index
    %c8_25 = arith.constant 8 : index
    %c0_26 = arith.constant 0 : index
    %24 = vector.load %arg9[%c1_24, %c8_25, %c0_26] : memref<18x32x32xf32, #tpu.memory_space<vmem>>, vector<16x16x32xf32>
    %25 = vector.shape_cast %24 : vector<16x16x32xf32> to vector<256x32xf32>
    %c1_27 = arith.constant 1 : index
    %c9_28 = arith.constant 9 : index
    %c0_29 = arith.constant 0 : index
    %26 = vector.load %arg9[%c1_27, %c9_28, %c0_29] : memref<18x32x32xf32, #tpu.memory_space<vmem>>, vector<16x16x32xf32>
    %27 = vector.shape_cast %26 : vector<16x16x32xf32> to vector<256x32xf32>
    %c2 = arith.constant 2 : index
    %c7_30 = arith.constant 7 : index
    %c0_31 = arith.constant 0 : index
    %28 = vector.load %arg9[%c2, %c7_30, %c0_31] : memref<18x32x32xf32, #tpu.memory_space<vmem>>, vector<16x16x32xf32>
    %29 = vector.shape_cast %28 : vector<16x16x32xf32> to vector<256x32xf32>
    %c2_32 = arith.constant 2 : index
    %c8_33 = arith.constant 8 : index
    %c0_34 = arith.constant 0 : index
    %30 = vector.load %arg9[%c2_32, %c8_33, %c0_34] : memref<18x32x32xf32, #tpu.memory_space<vmem>>, vector<16x16x32xf32>
    %31 = vector.shape_cast %30 : vector<16x16x32xf32> to vector<256x32xf32>
    %c2_35 = arith.constant 2 : index
    %c9_36 = arith.constant 9 : index
    %c0_37 = arith.constant 0 : index
    %32 = vector.load %arg9[%c2_35, %c9_36, %c0_37] : memref<18x32x32xf32, #tpu.memory_space<vmem>>, vector<16x16x32xf32>
    %33 = vector.shape_cast %32 : vector<16x16x32xf32> to vector<256x32xf32>
    %34 = tpu.concatenate %17, %19, %21, %23, %25, %27, %29, %31, %33 in 1 : vector<256x32xf32>, vector<256x32xf32>, vector<256x32xf32>, vector<256x32xf32>, vector<256x32xf32>, vector<256x32xf32>, vector<256x32xf32>, vector<256x32xf32>, vector<256x32xf32> -> vector<256x288xf32>
    %c0_38 = arith.constant 0 : index
    %c0_39 = arith.constant 0 : index
    %35 = vector.load %arg5[%c0_38, %c0_39] : memref<288x32xbf16, #tpu.memory_space<vmem>>, vector<288x32xbf16>
    %36 = arith.truncf %34 : vector<256x288xf32> to vector<256x288xbf16>
    %cst_40 = arith.constant dense<0.000000e+00> : vector<256x32xf32>
    %37 = tpu.matmul %36, %35, %cst_40 {dimension_numbers = #tpu.dot_dimension_numbers<[1], [0], [0], [1], [0, 0, 1, 1], [], []>} : vector<256x288xbf16>, vector<288x32xbf16>, vector<256x32xf32> -> vector<256x32xf32>
    %38 = arith.truncf %37 : vector<256x32xf32> to vector<256x32xbf16>
    %c0_41 = arith.constant 0 : index
    %c0_42 = arith.constant 0 : index
    %c0_43 = arith.constant 0 : index
    %39 = vector.load %arg6[%c0_41, %c0_42, %c0_43] : memref<1x256x32xbf16, #tpu.memory_space<vmem>>, vector<1x256x32xbf16>
    %40 = vector.shape_cast %39 : vector<1x256x32xbf16> to vector<256x32xbf16>
    %41 = vector.shape_cast %38 : vector<256x32xbf16> to vector<1x256x32xbf16>
    tpu.vector_store %arg6[%c0_41, %c0_42, %c0_43], %41 {strides = array<i32>} : memref<1x256x32xbf16, #tpu.memory_space<vmem>>, vector<1x256x32xbf16>,
    %cst_44 = arith.constant dense<0.000000e+00> : vector<32xf32>
    %42 = vector.multi_reduction <add>, %37, %cst_44 [0] : vector<256x32xf32> to vector<32xf32>
    %43 = vector.shape_cast %42 : vector<32xf32> to vector<1x32xf32>
    %c0_45 = arith.constant 0 : index
    %c0_46 = arith.constant 0 : index
    %c0_47 = arith.constant 0 : index
    %44 = vector.load %arg7[%c0_45, %c0_46, %c0_47] : memref<1x1x32xf32, #tpu.memory_space<vmem>>, vector<1x1x32xf32>
    %45 = vector.shape_cast %44 : vector<1x1x32xf32> to vector<1x32xf32>
    %46 = vector.shape_cast %43 : vector<1x32xf32> to vector<1x1x32xf32>
    tpu.vector_store %arg7[%c0_45, %c0_46, %c0_47], %46 {strides = array<i32>} : memref<1x1x32xf32, #tpu.memory_space<vmem>>, vector<1x1x32xf32>,
    %47 = arith.mulf %37, %37 : vector<256x32xf32>
    %cst_48 = arith.constant dense<0.000000e+00> : vector<32xf32>
    %48 = vector.multi_reduction <add>, %47, %cst_48 [0] : vector<256x32xf32> to vector<32xf32>
    %49 = vector.shape_cast %48 : vector<32xf32> to vector<1x32xf32>
    %c0_49 = arith.constant 0 : index
    %c0_50 = arith.constant 0 : index
    %c0_51 = arith.constant 0 : index
    %50 = vector.load %arg8[%c0_49, %c0_50, %c0_51] : memref<1x1x32xf32, #tpu.memory_space<vmem>>, vector<1x1x32xf32>
    %51 = vector.shape_cast %50 : vector<1x1x32xf32> to vector<1x32xf32>
    %52 = vector.shape_cast %49 : vector<1x32xf32> to vector<1x1x32xf32>
    tpu.vector_store %arg8[%c0_49, %c0_50, %c0_51], %52 {strides = array<i32>} : memref<1x1x32xf32, #tpu.memory_space<vmem>>, vector<1x1x32xf32>,
    return
  }
  func.func @transform_0(%arg0: i32) -> (i32, i32, i32) {
    %c0_i32 = arith.constant 0 : i32
    %c0_i32_0 = arith.constant 0 : i32
    %c0_i32_1 = arith.constant 0 : i32
    return %arg0, %c0_i32, %c0_i32_0 : i32, i32, i32
  }
  func.func @transform_1(%arg0: i32) -> (i32, i32) {
    %c0_i32 = arith.constant 0 : i32
    %c0_i32_0 = arith.constant 0 : i32
    %c0_i32_1 = arith.constant 0 : i32
    return %c0_i32, %c0_i32_0 : i32, i32
  }
  func.func @transform_2(%arg0: i32) -> (i32, i32) {
    %c0_i32 = arith.constant 0 : i32
    %c0_i32_0 = arith.constant 0 : i32
    %c0_i32_1 = arith.constant 0 : i32
    return %c0_i32, %c0_i32_0 : i32, i32
  }
  func.func @transform_3(%arg0: i32) -> (i32, i32) {
    %c0_i32 = arith.constant 0 : i32
    %c0_i32_0 = arith.constant 0 : i32
    %c0_i32_1 = arith.constant 0 : i32
    return %c0_i32, %c0_i32_0 : i32, i32
  }
  func.func @transform_4(%arg0: i32) -> (i32, i32) {
    %c0_i32 = arith.constant 0 : i32
    %c0_i32_0 = arith.constant 0 : i32
    %c0_i32_1 = arith.constant 0 : i32
    return %c0_i32, %c0_i32_0 : i32, i32
  }
  func.func @transform_5(%arg0: i32) -> (i32, i32, i32) {
    %c0_i32 = arith.constant 0 : i32
    %c0_i32_0 = arith.constant 0 : i32
    %c0_i32_1 = arith.constant 0 : i32
    return %arg0, %c0_i32, %c0_i32_0 : i32, i32, i32
  }
  func.func @transform_6(%arg0: i32) -> (i32, i32, i32) {
    %c0_i32 = arith.constant 0 : i32
    %c0_i32_0 = arith.constant 0 : i32
    %c0_i32_1 = arith.constant 0 : i32
    return %arg0, %c0_i32, %c0_i32_0 : i32, i32, i32
  }
  func.func @transform_7(%arg0: i32) -> (i32, i32, i32) {
    %c0_i32 = arith.constant 0 : i32
    %c0_i32_0 = arith.constant 0 : i32
    %c0_i32_1 = arith.constant 0 : i32
    return %arg0, %c0_i32, %c0_i32_0 : i32, i32, i32
  }
}

module attributes {stable_mosaic.version = 11 : i64} {
  func.func @kernel(%arg0: i32, %arg1: memref<1x256x32xbf16, #tpu.memory_space<vmem>>, %arg2: memref<1x256x16xbf16, #tpu.memory_space<vmem>>, %arg3: memref<1x32xf32, #tpu.memory_space<vmem>>, %arg4: memref<1x32xf32, #tpu.memory_space<vmem>>, %arg5: memref<32x128xbf16, #tpu.memory_space<vmem>>, %arg6: memref<1x128xf32, #tpu.memory_space<vmem>>, %arg7: memref<1x128xf32, #tpu.memory_space<vmem>>, %arg8: memref<16x128xbf16, #tpu.memory_space<vmem>>, %arg9: memref<1x128xf32, #tpu.memory_space<vmem>>, %arg10: memref<1x128xf32, #tpu.memory_space<vmem>>, %arg11: memref<1x256x128xf32, #tpu.memory_space<vmem>>) attributes {dimension_semantics = [#tpu.dimension_semantics<parallel>], iteration_bounds = array<i64: 2>, scalar_prefetch = 0 : i64, scratch_operands = 0 : i64, tpu.core_type = #tpu.core_type<tc>, window_params = [{transform_indices = @transform_0, window_bounds = array<i64: 1, 256, 32>}, {transform_indices = @transform_1, window_bounds = array<i64: 1, 256, 16>}, {pipeline_mode = #tpu.pipeline_mode<synchronous>, transform_indices = @transform_2, window_bounds = array<i64: 1, 32>}, {pipeline_mode = #tpu.pipeline_mode<synchronous>, transform_indices = @transform_3, window_bounds = array<i64: 1, 32>}, {pipeline_mode = #tpu.pipeline_mode<synchronous>, transform_indices = @transform_4, window_bounds = array<i64: 32, 128>}, {pipeline_mode = #tpu.pipeline_mode<synchronous>, transform_indices = @transform_5, window_bounds = array<i64: 1, 128>}, {pipeline_mode = #tpu.pipeline_mode<synchronous>, transform_indices = @transform_6, window_bounds = array<i64: 1, 128>}, {pipeline_mode = #tpu.pipeline_mode<synchronous>, transform_indices = @transform_7, window_bounds = array<i64: 16, 128>}, {pipeline_mode = #tpu.pipeline_mode<synchronous>, transform_indices = @transform_8, window_bounds = array<i64: 1, 128>}, {pipeline_mode = #tpu.pipeline_mode<synchronous>, transform_indices = @transform_9, window_bounds = array<i64: 1, 128>}, {transform_indices = @transform_10, window_bounds = array<i64: 1, 256, 128>}]} {
    %c0 = arith.constant 0 : index
    %c0_0 = arith.constant 0 : index
    %c0_1 = arith.constant 0 : index
    %0 = vector.load %arg1[%c0, %c0_0, %c0_1] : memref<1x256x32xbf16, #tpu.memory_space<vmem>>, vector<1x256x32xbf16>
    %1 = vector.shape_cast %0 : vector<1x256x32xbf16> to vector<256x32xbf16>
    %2 = arith.extf %1 : vector<256x32xbf16> to vector<256x32xf32>
    %c0_2 = arith.constant 0 : index
    %c0_3 = arith.constant 0 : index
    %3 = vector.load %arg3[%c0_2, %c0_3] : memref<1x32xf32, #tpu.memory_space<vmem>>, vector<1x32xf32>
    %4 = vector.broadcast %3 : vector<1x32xf32> to vector<256x32xf32>
    %5 = arith.mulf %2, %4 : vector<256x32xf32>
    %c0_4 = arith.constant 0 : index
    %c0_5 = arith.constant 0 : index
    %6 = vector.load %arg4[%c0_4, %c0_5] : memref<1x32xf32, #tpu.memory_space<vmem>>, vector<1x32xf32>
    %7 = vector.broadcast %6 : vector<1x32xf32> to vector<256x32xf32>
    %8 = arith.addf %5, %7 : vector<256x32xf32>
    %cst = arith.constant 0.000000e+00 : f32
    %9 = vector.broadcast %cst : f32 to vector<256x32xf32>
    %10 = arith.maximumf %8, %9 : vector<256x32xf32>
    %c0_6 = arith.constant 0 : index
    %c0_7 = arith.constant 0 : index
    %11 = vector.load %arg5[%c0_6, %c0_7] : memref<32x128xbf16, #tpu.memory_space<vmem>>, vector<32x128xbf16>
    %12 = arith.truncf %10 : vector<256x32xf32> to vector<256x32xbf16>
    %cst_8 = arith.constant dense<0.000000e+00> : vector<256x128xf32>
    %13 = tpu.matmul %12, %11, %cst_8 {dimension_numbers = #tpu.dot_dimension_numbers<[1], [0], [0], [1], [0, 0, 1, 1], [], []>} : vector<256x32xbf16>, vector<32x128xbf16>, vector<256x128xf32> -> vector<256x128xf32>
    %c0_9 = arith.constant 0 : index
    %c0_10 = arith.constant 0 : index
    %14 = vector.load %arg6[%c0_9, %c0_10] : memref<1x128xf32, #tpu.memory_space<vmem>>, vector<1x128xf32>
    %15 = vector.broadcast %14 : vector<1x128xf32> to vector<256x128xf32>
    %16 = arith.mulf %13, %15 : vector<256x128xf32>
    %c0_11 = arith.constant 0 : index
    %c0_12 = arith.constant 0 : index
    %17 = vector.load %arg7[%c0_11, %c0_12] : memref<1x128xf32, #tpu.memory_space<vmem>>, vector<1x128xf32>
    %18 = vector.broadcast %17 : vector<1x128xf32> to vector<256x128xf32>
    %19 = arith.addf %16, %18 : vector<256x128xf32>
    %c0_13 = arith.constant 0 : index
    %c0_14 = arith.constant 0 : index
    %c0_15 = arith.constant 0 : index
    %20 = vector.load %arg2[%c0_13, %c0_14, %c0_15] : memref<1x256x16xbf16, #tpu.memory_space<vmem>>, vector<1x256x16xbf16>
    %21 = vector.shape_cast %20 : vector<1x256x16xbf16> to vector<256x16xbf16>
    %c0_16 = arith.constant 0 : index
    %c0_17 = arith.constant 0 : index
    %22 = vector.load %arg8[%c0_16, %c0_17] : memref<16x128xbf16, #tpu.memory_space<vmem>>, vector<16x128xbf16>
    %cst_18 = arith.constant dense<0.000000e+00> : vector<256x128xf32>
    %23 = tpu.matmul %21, %22, %cst_18 {dimension_numbers = #tpu.dot_dimension_numbers<[1], [0], [0], [1], [0, 0, 1, 1], [], []>} : vector<256x16xbf16>, vector<16x128xbf16>, vector<256x128xf32> -> vector<256x128xf32>
    %c0_19 = arith.constant 0 : index
    %c0_20 = arith.constant 0 : index
    %24 = vector.load %arg9[%c0_19, %c0_20] : memref<1x128xf32, #tpu.memory_space<vmem>>, vector<1x128xf32>
    %25 = vector.broadcast %24 : vector<1x128xf32> to vector<256x128xf32>
    %26 = arith.mulf %23, %25 : vector<256x128xf32>
    %c0_21 = arith.constant 0 : index
    %c0_22 = arith.constant 0 : index
    %27 = vector.load %arg10[%c0_21, %c0_22] : memref<1x128xf32, #tpu.memory_space<vmem>>, vector<1x128xf32>
    %28 = vector.broadcast %27 : vector<1x128xf32> to vector<256x128xf32>
    %29 = arith.addf %26, %28 : vector<256x128xf32>
    %30 = arith.addf %19, %29 : vector<256x128xf32>
    %cst_23 = arith.constant 0.000000e+00 : f32
    %31 = vector.broadcast %cst_23 : f32 to vector<256x128xf32>
    %32 = arith.maximumf %30, %31 : vector<256x128xf32>
    %c0_24 = arith.constant 0 : index
    %c0_25 = arith.constant 0 : index
    %c0_26 = arith.constant 0 : index
    %33 = vector.load %arg11[%c0_24, %c0_25, %c0_26] : memref<1x256x128xf32, #tpu.memory_space<vmem>>, vector<1x256x128xf32>
    %34 = vector.shape_cast %33 : vector<1x256x128xf32> to vector<256x128xf32>
    %35 = vector.shape_cast %32 : vector<256x128xf32> to vector<1x256x128xf32>
    tpu.vector_store %arg11[%c0_24, %c0_25, %c0_26], %35 {strides = array<i32>} : memref<1x256x128xf32, #tpu.memory_space<vmem>>, vector<1x256x128xf32>,
    return
  }
  func.func @transform_0(%arg0: i32) -> (i32, i32, i32) {
    %c0_i32 = arith.constant 0 : i32
    %c0_i32_0 = arith.constant 0 : i32
    %c0_i32_1 = arith.constant 0 : i32
    return %arg0, %c0_i32, %c0_i32_0 : i32, i32, i32
  }
  func.func @transform_1(%arg0: i32) -> (i32, i32, i32) {
    %c0_i32 = arith.constant 0 : i32
    %c0_i32_0 = arith.constant 0 : i32
    %c0_i32_1 = arith.constant 0 : i32
    return %arg0, %c0_i32, %c0_i32_0 : i32, i32, i32
  }
  func.func @transform_2(%arg0: i32) -> (i32, i32) {
    %c0_i32 = arith.constant 0 : i32
    %c0_i32_0 = arith.constant 0 : i32
    %c0_i32_1 = arith.constant 0 : i32
    return %c0_i32, %c0_i32_0 : i32, i32
  }
  func.func @transform_3(%arg0: i32) -> (i32, i32) {
    %c0_i32 = arith.constant 0 : i32
    %c0_i32_0 = arith.constant 0 : i32
    %c0_i32_1 = arith.constant 0 : i32
    return %c0_i32, %c0_i32_0 : i32, i32
  }
  func.func @transform_4(%arg0: i32) -> (i32, i32) {
    %c0_i32 = arith.constant 0 : i32
    %c0_i32_0 = arith.constant 0 : i32
    %c0_i32_1 = arith.constant 0 : i32
    return %c0_i32, %c0_i32_0 : i32, i32
  }
  func.func @transform_5(%arg0: i32) -> (i32, i32) {
    %c0_i32 = arith.constant 0 : i32
    %c0_i32_0 = arith.constant 0 : i32
    %c0_i32_1 = arith.constant 0 : i32
    return %c0_i32, %c0_i32_0 : i32, i32
  }
  func.func @transform_6(%arg0: i32) -> (i32, i32) {
    %c0_i32 = arith.constant 0 : i32
    %c0_i32_0 = arith.constant 0 : i32
    %c0_i32_1 = arith.constant 0 : i32
    return %c0_i32, %c0_i32_0 : i32, i32
  }
  func.func @transform_7(%arg0: i32) -> (i32, i32) {
    %c0_i32 = arith.constant 0 : i32
    %c0_i32_0 = arith.constant 0 : i32
    %c0_i32_1 = arith.constant 0 : i32
    return %c0_i32, %c0_i32_0 : i32, i32
  }
  func.func @transform_8(%arg0: i32) -> (i32, i32) {
    %c0_i32 = arith.constant 0 : i32
    %c0_i32_0 = arith.constant 0 : i32
    %c0_i32_1 = arith.constant 0 : i32
    return %c0_i32, %c0_i32_0 : i32, i32
  }
  func.func @transform_9(%arg0: i32) -> (i32, i32) {
    %c0_i32 = arith.constant 0 : i32
    %c0_i32_0 = arith.constant 0 : i32
    %c0_i32_1 = arith.constant 0 : i32
    return %c0_i32, %c0_i32_0 : i32, i32
  }
  func.func @transform_10(%arg0: i32) -> (i32, i32, i32) {
    %c0_i32 = arith.constant 0 : i32
    %c0_i32_0 = arith.constant 0 : i32
    %c0_i32_1 = arith.constant 0 : i32
    return %arg0, %c0_i32, %c0_i32_0 : i32, i32, i32
  }
}

</mosaic_0001>

<bundles_post_ra>
// kernel: bottleneck_time_emb_forward.6
= control target key start
LH: loop header
LB: loop body
LE: loop exit
PB: predicated region body
PF: predicated region fallthrough
CT: control target
= control target key end

     0   :  { %s1042_s18 = smov 0   ;;  %s1189_s0 = inlined_call_operand.vmem [shape: bf16[2,256,32], index: 0, kind: input, shape index: {}]   ;;  %s1190_s1 = inlined_call_operand.vmem [shape: f32[1,32], index: 1, kind: input, shape index: {}]   ;;  %s1191_s2 = inlined_call_operand.vmem [shape: f32[1,32], index: 2, kind: input, shape index: {}]   ;;  %s1192_s3 = inlined_call_operand.vmem [shape: bf16[32,128], index: 3, kind: input, shape index: {}]   ;;  %s1193_s4 = inlined_call_operand.vmem [shape: f32[2,1,128], index: 4, kind: output, shape index: {0}]   ;;  %s1194_s5 = inlined_call_operand.vmem [shape: f32[2,1,128], index: 5, kind: output, shape index: {1}]  }
   0x1 LB: > { %s827_s19 = sadd.s32 4294967295, %s1010_s18   ;;  %p831_p0 = scmp.ge.s32.totalorder %s1010_s18, 1  ;;  %s1010_s18 = sphi %s1042_s18, %s16_s18  }
   0x2   : > { %p190_p1 = scmp.lt.s32.totalorder %s1010_s18, 3 }
   0x4   : > { %p191_p2 = pnand %p831_p0, %p190_p1 }
   0x5   : > { %v1002_v0 = vld [vmem:[%s1192_s3] sm:$0xff] (!%p191_p2)   ;;  %p219_p3 = scmp.lt.s32.totalorder (!%p191_p2), %s827_s19, 1  ;;  %v1003_v1 = vld [vmem:[%s1192_s3 + $0x8] sm:$0xff] (!%p191_p2)   ;;  %vm437_vm0 = vcmask (!%p191_p2), 261120  }
   0x6   : > { %194 = sbr.rel (%p191_p2) target bundleno = 320 (0x140), region = 36  ;;  %954 = vmatprep.subr.bf16.mxu0 (!%p191_p2), %v1002_v0  ;;  %990 = vmatprep.subr.bf16.mxu1 (!%p191_p2), %v1002_v0  ;;  %v1067_v2 = vld [vmem:[%s1190_s1] ss:$0 sm:$0xff] (!%p191_p2) }
   0x7   : > { %955 = vmatpush3.bf16.msra.mxu0 (!%p191_p2), %v1002_v0  ;;  %992 = vmatpush3.bf16.msra.mxu1 (!%p191_p2), %v1002_v0  ;;  %v1076_v11 = vld [vmem:[%s1191_s2] ss:$0 sm:$0xff] (!%p191_p2) }
   0x8   : > { %956 = vmatprep.subr.bf16.mxu0 (!%p191_p2), %v1003_v1  ;;  %991 = vmatprep.subr.bf16.mxu1 (!%p191_p2), %v1003_v1 }
   0xb   : > { %957 = vmatpush3.bf16.msra.mxu0 (!%p191_p2), %v1003_v1  ;;  %993 = vmatpush3.bf16.msra.mxu1 (!%p191_p2), %v1003_v1 }
   0xd   : > { %s1196_s19 = smov (!%p219_p3, %s827_s19), 1 }
   0xe   : > { %s856_s24 = sshll.u32 %s1196_s19, 7  ;;  %s226_s9 = scalar_lea.vmem %s1193_s4, %s1196_s19 }
   0xf   : > { %s1062_s27 = scalar_lea.vmem %s1189_s0, %s856_s24  ;;  %s229_s12 = scalar_lea.vmem %s1194_s5, %s1196_s19 }
  0x10   : > { %v858_v3 = vld [vmem:[%s1062_s27] sm:$0xff]   ;;  %v921_v4 = vld [vmem:[%s1062_s27 + $0x8] sm:$0xff]   ;;  %v922_v5 = vld [vmem:[%s1062_s27 + $0x10] sm:$0xff]  }
  0x11   : > { %v859_v6 = vunpack.c.l.bf16 %v858_v3  ;;  %v860_v7 = vunpack.c.h.bf16 %v858_v3  ;;  %v863_v8 = vunpack.c.l.bf16 %v921_v4  ;;  %v864_v9 = vunpack.c.h.bf16 %v921_v4  ;;  %v923_v10 = vld [vmem:[%s1062_s27 + $0x18] sm:$0xff]   ;;  %v924_v32 = vld [vmem:[%s1062_s27 + $0x20] sm:$0xff]   ;;  %v925_v37 = vld [vmem:[%s1062_s27 + $0x28] sm:$0xff]  }
  0x12   : > { %v867_v12 = vunpack.c.l.bf16 %v922_v5  ;;  %v868_v13 = vunpack.c.h.bf16 %v922_v5  ;;  %v871_v14 = vunpack.c.l.bf16 %v923_v10  ;;  %v872_v15 = vunpack.c.h.bf16 %v923_v10  ;;  %v926_v42 = vld [vmem:[%s1062_s27 + $0x30] sm:$0xff]   ;;  %v927_v47 = vld [vmem:[%s1062_s27 + $0x38] sm:$0xff]   ;;  %v928_v5 = vld [vmem:[%s1062_s27 + $0x40] sm:$0xff]  }
  0x13   : > { %v302_v16 = vmul.f32 %v859_v6, %v1067_v2  ;;  %v303_v17 = vmul.f32 %v860_v7, %v1067_v2  ;;  %v304_v18 = vmul.f32 %v863_v8, %v1067_v2  ;;  %v305_v19 = vmul.f32 %v864_v9, %v1067_v2 }
  0x14   : > { %v306_v20 = vmul.f32 %v867_v12, %v1067_v2  ;;  %v307_v21 = vmul.f32 %v868_v13, %v1067_v2  ;;  %v308_v22 = vmul.f32 %v871_v14, %v1067_v2  ;;  %v309_v23 = vmul.f32 %v872_v15, %v1067_v2  ;;  %v929_v15 = vld [vmem:[%s1062_s27 + $0x48] sm:$0xff]  }
  0x15   : > { %v341_v24 = vadd.f32 %v1076_v11, %v302_v16  ;;  %v342_v25 = vadd.f32 %v1076_v11, %v303_v17  ;;  %v343_v26 = vadd.f32 %v1076_v11, %v304_v18  ;;  %v344_v27 = vadd.f32 %v1076_v11, %v305_v19 }
  0x16   : > { %v345_v28 = vadd.f32 %v1076_v11, %v306_v20  ;;  %v346_v29 = vadd.f32 %v1076_v11, %v307_v21  ;;  %v347_v30 = vadd.f32 %v1076_v11, %v308_v22  ;;  %v348_v31 = vadd.f32 %v1076_v11, %v309_v23  ;;  %v930_v20 = vld [vmem:[%s1062_s27 + $0x50] sm:$0xff]  }
  0x17   : > { %v373_v33 = vmax.f32 %v341_v24, 0.0  ;;  %v374_v34 = vmax.f32 %v342_v25, 0.0  ;;  %v375_v35 = vmax.f32 %v343_v26, 0.0  ;;  %v376_v36 = vmax.f32 %v344_v27, 0.0  ;;  %v931_v24 = vld [vmem:[%s1062_s27 + $0x58] sm:$0xff]  }
  0x18   : > { %v377_v38 = vmax.f32 %v345_v28, 0.0  ;;  %v378_v39 = vmax.f32 %v346_v29, 0.0  ;;  %v379_v40 = vmax.f32 %v347_v30, 0.0  ;;  %v380_v41 = vmax.f32 %v348_v31, 0.0 }
  0x19   : > { %v409_v43 = vpack.c.bf16 %v374_v34, %v373_v33  ;;  %v410_v44 = vpack.c.bf16 %v376_v36, %v375_v35  ;;  %v875_v45 = vunpack.c.l.bf16 %v924_v32  ;;  %v876_v46 = vunpack.c.h.bf16 %v924_v32 }
  0x1a   : > { %v411_v48 = vpack.c.bf16 %v378_v39, %v377_v38  ;;  %v412_v49 = vpack.c.bf16 %v380_v41, %v379_v40  ;;  %v879_v50 = vunpack.c.l.bf16 %v925_v37  ;;  %v880_v51 = vunpack.c.h.bf16 %v925_v37  ;;  %v932_v41 = vld [vmem:[%s1062_s27 + $0x60] sm:$0xff]  }
  0x1b   : > { %958 = vmatprep.mubr.msk.bf16.mxu0 %vm437_vm0, %v409_v43  ;;  %v310_v52 = vmul.f32 %v875_v45, %v1067_v2  ;;  %v311_v53 = vmul.f32 %v876_v46, %v1067_v2  ;;  %v883_v54 = vunpack.c.l.bf16 %v926_v42  ;;  %v884_v55 = vunpack.c.h.bf16 %v926_v42 }
  0x1c   : > { %959 = vmatmul.mubr.msk.bf16.vlgmr.msra.gmra.mrb[0].mxu0 %vm437_vm0, %v410_v44  ;;  %v312_v56 = vmul.f32 %v879_v50, %v1067_v2  ;;  %v313_v57 = vmul.f32 %v880_v51, %v1067_v2  ;;  %v887_v58 = vunpack.c.l.bf16 %v927_v47  ;;  %v888_v59 = vunpack.c.h.bf16 %v927_v47 }
  0x1d   : > { %962 = vmatprep.mubr.msk.bf16.mxu0 %vm437_vm0, %v411_v48  ;;  %v349_v60 = vadd.f32 %v1076_v11, %v310_v52  ;;  %v350_v61 = vadd.f32 %v1076_v11, %v311_v53  ;;  %v314_v62 = vmul.f32 %v883_v54, %v1067_v2  ;;  %v315_v63 = vmul.f32 %v884_v55, %v1067_v2  ;;  %v933_v54 = vld [vmem:[%s1062_s27 + $0x68] sm:$0xff]  }
  0x1e   : > { %v351_v0 = vadd.f32 %v1076_v11, %v312_v56  ;;  %v352_v1 = vadd.f32 %v1076_v11, %v313_v57  ;;  %v316_v3 = vmul.f32 %v887_v58, %v1067_v2  ;;  %v317_v4 = vmul.f32 %v888_v59, %v1067_v2  ;;  %v934_v59 = vld [vmem:[%s1062_s27 + $0x70] sm:$0xff]  }
  0x1f   : > { %v381_v6 = vmax.f32 %v349_v60, 0.0  ;;  %v382_v7 = vmax.f32 %v350_v61, 0.0  ;;  %v353_v8 = vadd.f32 %v1076_v11, %v314_v62  ;;  %v354_v9 = vadd.f32 %v1076_v11, %v315_v63 }
  0x20   : > { %v383_v10 = vmax.f32 %v351_v0, 0.0  ;;  %v384_v12 = vmax.f32 %v352_v1, 0.0  ;;  %v1117_v13 = vadd.f32 %v1076_v11, %v316_v3  ;;  %v1120_v14 = vadd.f32 %v1076_v11, %v317_v4 }
  0x21   : > { %v413_v16 = vpack.c.bf16 %v382_v7, %v381_v6  ;;  %v385_v17 = vmax.f32 %v353_v8, 0.0  ;;  %v386_v18 = vmax.f32 %v354_v9, 0.0  ;;  %v891_v19 = vunpack.c.l.bf16 %v928_v5  ;;  %v935_v9 = vld [vmem:[%s1062_s27 + $0x78] sm:$0xff]  }
  0x22   : > { %v414_v21 = vpack.c.bf16 %v384_v12, %v383_v10  ;;  %v387_v22 = vmax.f32 %v1117_v13, 0.0  ;;  %v892_v23 = vunpack.c.h.bf16 %v928_v5  ;;  %v388_v25 = vmax.f32 %v1120_v14, 0.0 }
  0x23   : > { %v318_v26 = vmul.f32 %v891_v19, %v1067_v2  ;;  %v895_v27 = vunpack.c.l.bf16 %v929_v15  ;;  %v896_v28 = vunpack.c.h.bf16 %v929_v15  ;;  %v415_v29 = vpack.c.bf16 %v386_v18, %v385_v17 }
  0x24   : > { %963 = vmatmul.mubr.msk.bf16.gmra.mrb[4].mxu0 %vm437_vm0, %v412_v49  ;;  %v319_v30 = vmul.f32 %v892_v23, %v1067_v2  ;;  %v899_v31 = vunpack.c.l.bf16 %v930_v20  ;;  %v900_v32 = vunpack.c.h.bf16 %v930_v20  ;;  %v903_v36 = vunpack.c.l.bf16 %v931_v24 }
  0x25   : > { %966 = vmatprep.mubr.msk.bf16.mxu0 %vm437_vm0, %v413_v16  ;;  %v357_v33 = vadd.f32 %v1076_v11, %v318_v26  ;;  %v320_v34 = vmul.f32 %v895_v27, %v1067_v2  ;;  %v321_v35 = vmul.f32 %v896_v28, %v1067_v2  ;;  %v904_v40 = vunpack.c.h.bf16 %v931_v24 }
  0x26   : > { %v358_v37 = vadd.f32 %v1076_v11, %v319_v30  ;;  %v322_v38 = vmul.f32 %v899_v31, %v1067_v2  ;;  %v323_v39 = vmul.f32 %v900_v32, %v1067_v2  ;;  %v324_v45 = vmul.f32 %v903_v36, %v1067_v2 }
  0x27   : > { %v389_v42 = vmax.f32 %v357_v33, 0.0  ;;  %v359_v43 = vadd.f32 %v1076_v11, %v320_v34  ;;  %v360_v44 = vadd.f32 %v1076_v11, %v321_v35  ;;  %v325_v49 = vmul.f32 %v904_v40, %v1067_v2 }
  0x28   : > { %v390_v46 = vmax.f32 %v358_v37, 0.0  ;;  %v361_v47 = vadd.f32 %v1076_v11, %v322_v38  ;;  %v362_v48 = vadd.f32 %v1076_v11, %v323_v39  ;;  %v363_v52 = vadd.f32 %v1076_v11, %v324_v45 }
  0x29   : > { %v391_v50 = vmax.f32 %v359_v43, 0.0  ;;  %v392_v51 = vmax.f32 %v360_v44, 0.0  ;;  %v907_v53 = vunpack.c.l.bf16 %v932_v41  ;;  %v364_v58 = vadd.f32 %v1076_v11, %v325_v49 }
  0x2a   : > { %v417_v55 = vpack.c.bf16 %v390_v46, %v389_v42  ;;  %v393_v56 = vmax.f32 %v361_v47, 0.0  ;;  %v394_v57 = vmax.f32 %v362_v48, 0.0  ;;  %v395_v61 = vmax.f32 %v363_v52, 0.0 }
  0x2b   : > { %v418_v60 = vpack.c.bf16 %v392_v51, %v391_v50  ;;  %v908_v62 = vunpack.c.h.bf16 %v932_v41  ;;  %v326_v63 = vmul.f32 %v907_v53, %v1067_v2  ;;  %v396_v1 = vmax.f32 %v364_v58, 0.0 }
  0x2c   : > { %967 = vmatmul.mubr.msk.bf16.gmra.mrb[8].mxu0 %vm437_vm0, %v414_v21  ;;  %974 = vmatprep.mubr.msk.bf16.mxu1 %vm437_vm0, %v417_v55  ;;  %v419_v0 = vpack.c.bf16 %v394_v57, %v393_v56  ;;  %v911_v3 = vunpack.c.l.bf16 %v933_v54  ;;  %v912_v4 = vunpack.c.h.bf16 %v933_v54  ;;  %v915_v7 = vunpack.c.l.bf16 %v934_v59 }
  0x2d   : > { %970 = vmatprep.mubr.msk.bf16.mxu0 %vm437_vm0, %v415_v29  ;;  %975 = vmatmul.mubr.msk.bf16.vlgmr.msra.gmra.mrb[0].mxu1 %vm437_vm0, %v418_v60  ;;  %v327_v5 = vmul.f32 %v908_v62, %v1067_v2  ;;  %v365_v6 = vadd.f32 %v1076_v11, %v326_v63  ;;  %v916_v8 = vunpack.c.h.bf16 %v934_v59  ;;  %v416_v18 = vpack.c.bf16 %v388_v25, %v387_v22 }
  0x2e   : > { %978 = vmatprep.mubr.msk.bf16.mxu1 %vm437_vm0, %v419_v0  ;;  %v328_v10 = vmul.f32 %v911_v3, %v1067_v2  ;;  %v329_v12 = vmul.f32 %v912_v4, %v1067_v2  ;;  %v330_v16 = vmul.f32 %v915_v7, %v1067_v2  ;;  %v420_v19 = vpack.c.bf16 %v396_v1, %v395_v61 }
  0x2f   : > { %v366_v14 = vadd.f32 %v1076_v11, %v327_v5  ;;  %v397_v15 = vmax.f32 %v365_v6, 0.0  ;;  %v331_v17 = vmul.f32 %v916_v8, %v1067_v2  ;;  %v919_v20 = vunpack.c.l.bf16 %v935_v9 }
  0x30   : > { %v367_v23 = vadd.f32 %v1076_v11, %v328_v10  ;;  %v368_v24 = vadd.f32 %v1076_v11, %v329_v12  ;;  %v920_v26 = vunpack.c.h.bf16 %v935_v9  ;;  %v369_v27 = vadd.f32 %v1076_v11, %v330_v16 }
  0x31   : > { %v398_v21 = vmax.f32 %v366_v14, 0.0  ;;  %v370_v28 = vadd.f32 %v1076_v11, %v331_v17  ;;  %v332_v22 = vmul.f32 %v919_v20, %v1067_v2 }
  0x32   : > { %v399_v30 = vmax.f32 %v367_v23, 0.0  ;;  %v400_v13 = vmax.f32 %v368_v24, 0.0  ;;  %v333_v25 = vmul.f32 %v920_v26, %v1067_v2  ;;  %v401_v31 = vmax.f32 %v369_v27, 0.0 }
  0x33   : > { %v421_v29 = vpack.c.bf16 %v398_v21, %v397_v15  ;;  %v402_v32 = vmax.f32 %v370_v28, 0.0  ;;  %v371_v34 = vadd.f32 %v1076_v11, %v332_v22 }
  0x34   : > { %971 = vmatmul.mubr.msk.bf16.gmra.mrb[12].mxu0 %vm437_vm0, %v416_v18  ;;  %v422_v33 = vpack.c.bf16 %v400_v13, %v399_v30  ;;  %v372_v35 = vadd.f32 %v1076_v11, %v333_v25 }
  0x35   : > { %979 = vmatmul.mubr.msk.bf16.gmra.mrb[4].mxu1 %vm437_vm0, %v420_v19  ;;  %v423_v36 = vpack.c.bf16 %v402_v32, %v401_v31  ;;  %v403_v37 = vmax.f32 %v371_v34, 0.0 }
  0x36   : > { %982 = vmatprep.mubr.msk.bf16.mxu1 %vm437_vm0, %v421_v29  ;;  %v404_v38 = vmax.f32 %v372_v35, 0.0 }
  0x38   : > { %v424_v39 = vpack.c.bf16 %v404_v38, %v403_v37 }
  0x3d   : > { %983 = vmatmul.mubr.msk.bf16.gmra.mrb[8].mxu1 %vm437_vm0, %v422_v33 }
  0x3e   : > { %986 = vmatprep.mubr.msk.bf16.mxu1 %vm437_vm0, %v423_v36 }
  0x45   : > { %987 = vmatmul.mubr.msk.bf16.gmra.mrb[12].mxu1 %vm437_vm0, %v424_v39 }
  0xef   : > { %v960_v2 = vpop.f32.mrb[0].mxu0 }
  0xf0   : > { %v520_v40 = vpop.f32.mrb[1].mxu0  ;;  %v687_v46 = vmul.f32 %v960_v2, %v960_v2 }
  0xf1   : > { %v961_v41 = vpop.f32.mrb[2].mxu0  ;;  %v685_v43 = vmul.f32 %v520_v40, %v520_v40 }
  0xf2   : > { %v523_v42 = vpop.f32.mrb[3].mxu0  ;;  %v688_v48 = vmul.f32 %v961_v41, %v961_v41 }
  0xf3   : > { %v647_v44 = vadd.f32 %v523_v42, %v520_v40  ;;  %v686_v45 = vmul.f32 %v523_v42, %v523_v42 }
  0xf5   : > { %v648_v47 = vadd.f32 %v960_v2, %v647_v44  ;;  %v717_v11 = vadd.f32 %v686_v45, %v685_v43 }
  0xf7   : > { %v718_v49 = vadd.f32 %v717_v11, %v687_v46  ;;  %v964_v50 = vpop.f32.mrb[4].mxu0  ;;  %v649_v51 = vadd.f32 %v961_v41, %v648_v47 }
  0xf8   : > { %v536_v52 = vpop.f32.mrb[5].mxu0  ;;  %v691_v61 = vmul.f32 %v964_v50, %v964_v50 }
  0xf9   : > { %v650_v53 = vadd.f32 %v649_v51, %v536_v52  ;;  %v689_v54 = vmul.f32 %v536_v52, %v536_v52  ;;  %v719_v55 = vadd.f32 %v718_v49, %v688_v48  ;;  %v965_v56 = vpop.f32.mrb[6].mxu0 }
  0xfa   : > { %v539_v57 = vpop.f32.mrb[7].mxu0  ;;  %v692_v0 = vmul.f32 %v965_v56, %v965_v56 }
  0xfb   : > { %v720_v58 = vadd.f32 %v719_v55, %v689_v54  ;;  %v651_v59 = vadd.f32 %v650_v53, %v539_v57  ;;  %v690_v60 = vmul.f32 %v539_v57, %v539_v57 }
  0xfd   : > { %v652_v62 = vadd.f32 %v964_v50, %v651_v59  ;;  %v721_v63 = vadd.f32 %v720_v58, %v690_v60 }
  0xff   : > { %v722_v1 = vadd.f32 %v721_v63, %v691_v61  ;;  %v968_v3 = vpop.f32.mrb[8].mxu0  ;;  %v653_v4 = vadd.f32 %v965_v56, %v652_v62 }
 0x100   : > { %v552_v5 = vpop.f32.mrb[9].mxu0  ;;  %v976_v6 = vpop.f32.mrb[0].mxu1  ;;  %v695_v20 = vmul.f32 %v968_v3, %v968_v3 }
 0x101   : > { %v654_v7 = vadd.f32 %v653_v4, %v552_v5  ;;  %v693_v8 = vmul.f32 %v552_v5, %v552_v5  ;;  %v723_v9 = vadd.f32 %v722_v1, %v692_v0  ;;  %v969_v10 = vpop.f32.mrb[10].mxu0  ;;  %v584_v12 = vpop.f32.mrb[1].mxu1  ;;  %v703_v53 = vmul.f32 %v976_v6, %v976_v6 }
 0x102   : > { %v555_v14 = vpop.f32.mrb[11].mxu0  ;;  %v977_v15 = vpop.f32.mrb[2].mxu1  ;;  %v696_v24 = vmul.f32 %v969_v10, %v969_v10  ;;  %v701_v44 = vmul.f32 %v584_v12, %v584_v12 }
 0x103   : > { %v724_v16 = vadd.f32 %v723_v9, %v693_v8  ;;  %v655_v17 = vadd.f32 %v654_v7, %v555_v14  ;;  %v694_v18 = vmul.f32 %v555_v14, %v555_v14  ;;  %v587_v19 = vpop.f32.mrb[3].mxu1  ;;  %v704_v56 = vmul.f32 %v977_v15, %v977_v15 }
 0x104   : > { %v702_v51 = vmul.f32 %v587_v19, %v587_v19 }
 0x105   : > { %v656_v21 = vadd.f32 %v968_v3, %v655_v17  ;;  %v725_v23 = vadd.f32 %v724_v16, %v694_v18 }
 0x107   : > { %v726_v26 = vadd.f32 %v725_v23, %v695_v20  ;;  %v972_v27 = vpop.f32.mrb[12].mxu0  ;;  %v657_v28 = vadd.f32 %v969_v10, %v656_v21 }
 0x108   : > { %v568_v29 = vpop.f32.mrb[13].mxu0  ;;  %v980_v30 = vpop.f32.mrb[4].mxu1  ;;  %v699_v39 = vmul.f32 %v972_v27, %v972_v27 }
 0x109   : > { %v658_v13 = vadd.f32 %v657_v28, %v568_v29  ;;  %v697_v22 = vmul.f32 %v568_v29, %v568_v29  ;;  %v727_v25 = vadd.f32 %v726_v26, %v696_v24  ;;  %v973_v31 = vpop.f32.mrb[14].mxu0  ;;  %v600_v32 = vpop.f32.mrb[5].mxu1  ;;  %v707_v7 = vmul.f32 %v980_v30, %v980_v30 }
 0x10a   : > { %v571_v33 = vpop.f32.mrb[15].mxu0  ;;  %v981_v34 = vpop.f32.mrb[6].mxu1  ;;  %v700_v41 = vmul.f32 %v973_v31, %v973_v31  ;;  %v705_v59 = vmul.f32 %v600_v32, %v600_v32 }
 0x10b   : > { %v728_v35 = vadd.f32 %v727_v25, %v697_v22  ;;  %v659_v36 = vadd.f32 %v658_v13, %v571_v33  ;;  %v698_v37 = vmul.f32 %v571_v33, %v571_v33  ;;  %v603_v38 = vpop.f32.mrb[7].mxu1  ;;  %v708_v10 = vmul.f32 %v981_v34, %v981_v34 }
 0x10c   : > { %v706_v4 = vmul.f32 %v603_v38, %v603_v38 }
 0x10d   : > { %v660_v2 = vadd.f32 %v972_v27, %v659_v36  ;;  %v729_v40 = vadd.f32 %v728_v35, %v698_v37 }
 0x10f   : > { %v730_v42 = vadd.f32 %v729_v40, %v699_v39  ;;  %v661_v43 = vadd.f32 %v973_v31, %v660_v2 }
 0x110   : > { %v984_v45 = vpop.f32.mrb[8].mxu1 }
 0x111   : > { %v662_v46 = vadd.f32 %v661_v43, %v584_v12  ;;  %v731_v47 = vadd.f32 %v730_v42, %v700_v41  ;;  %v616_v11 = vpop.f32.mrb[9].mxu1  ;;  %v711_v20 = vmul.f32 %v984_v45, %v984_v45 }
 0x112   : > { %v985_v48 = vpop.f32.mrb[10].mxu1  ;;  %v709_v14 = vmul.f32 %v616_v11, %v616_v11 }
 0x113   : > { %v732_v49 = vadd.f32 %v731_v47, %v701_v44  ;;  %v663_v50 = vadd.f32 %v662_v46, %v587_v19  ;;  %v619_v52 = vpop.f32.mrb[11].mxu1  ;;  %v712_v24 = vmul.f32 %v985_v48, %v985_v48 }
 0x114   : > { %v710_v19 = vmul.f32 %v619_v52, %v619_v52 }
 0x115   : > { %v664_v54 = vadd.f32 %v976_v6, %v663_v50  ;;  %v733_v55 = vadd.f32 %v732_v49, %v702_v51 }
 0x117   : > { %v734_v57 = vadd.f32 %v733_v55, %v703_v53  ;;  %v665_v58 = vadd.f32 %v977_v15, %v664_v54 }
 0x118   : > { %v988_v60 = vpop.f32.mrb[12].mxu1 }
 0x119   : > { %v666_v61 = vadd.f32 %v665_v58, %v600_v32  ;;  %v735_v62 = vadd.f32 %v734_v57, %v704_v56  ;;  %v632_v63 = vpop.f32.mrb[13].mxu1  ;;  %v715_v31 = vmul.f32 %v988_v60, %v988_v60 }
 0x11a   : > { %v989_v0 = vpop.f32.mrb[14].mxu1  ;;  %v713_v28 = vmul.f32 %v632_v63, %v632_v63 }
 0x11b   : > { %v736_v1 = vadd.f32 %v735_v62, %v705_v59  ;;  %v667_v3 = vadd.f32 %v666_v61, %v603_v38  ;;  %v635_v5 = vpop.f32.mrb[15].mxu1 }
 0x11c   : > { %v714_v25 = vmul.f32 %v635_v5, %v635_v5 }
 0x11d   : > { %v668_v8 = vadd.f32 %v980_v30, %v667_v3  ;;  %v737_v9 = vadd.f32 %v736_v1, %v706_v4 }
 0x11f   : > { %v738_v12 = vadd.f32 %v737_v9, %v707_v7  ;;  %v669_v6 = vadd.f32 %v981_v34, %v668_v8  ;;  %v716_v34 = vmul.f32 %v989_v0, %v989_v0 }
 0x121   : > { %v670_v16 = vadd.f32 %v669_v6, %v616_v11  ;;  %v739_v17 = vadd.f32 %v738_v12, %v708_v10 }
 0x123   : > { %v740_v15 = vadd.f32 %v739_v17, %v709_v14  ;;  %v671_v18 = vadd.f32 %v670_v16, %v619_v52 }
 0x125   : > { %v672_v21 = vadd.f32 %v984_v45, %v671_v18  ;;  %v741_v23 = vadd.f32 %v740_v15, %v710_v19 }
 0x127   : > { %v742_v26 = vadd.f32 %v741_v23, %v711_v20  ;;  %v673_v27 = vadd.f32 %v985_v48, %v672_v21 }
 0x129   : > { %v674_v29 = vadd.f32 %v673_v27, %v632_v63  ;;  %v743_v13 = vadd.f32 %v742_v26, %v712_v24 }
 0x12b   : > { %v744_v30 = vadd.f32 %v743_v13, %v713_v28  ;;  %v675_v22 = vadd.f32 %v674_v29, %v635_v5 }
 0x12d   : > { %v676_v32 = vadd.f32 %v988_v60, %v675_v22  ;;  %v745_v33 = vadd.f32 %v744_v30, %v714_v25 }
 0x12f   : > { %v677_v35 = vadd.f32 %v989_v0, %v676_v32  ;;  %v746_v36 = vadd.f32 %v745_v33, %v715_v31 }
 0x131   : > { %v678_v37 = vrot.slane %v677_v35, 4  ;;  %v747_v38 = vadd.f32 %v746_v36, %v716_v34 }
 0x133   : > { %v679_v39 = vadd.f32 %v678_v37, %v677_v35  ;;  %v748_v2 = vrot.slane %v747_v38, 4 }
 0x135   : > { %v680_v40 = vrot.slane %v679_v39, 2  ;;  %v749_v41 = vadd.f32 %v748_v2, %v747_v38 }
 0x137   : > { %v681_v42 = vadd.f32 %v680_v40, %v679_v39  ;;  %v750_v43 = vrot.slane %v749_v41, 2 }
 0x139   : > { %v682_v44 = vrot.slane %v681_v42, 1  ;;  %v751_v45 = vadd.f32 %v750_v43, %v749_v41 }
 0x13b   : > { %v683_v46 = vadd.f32 %v682_v44, %v681_v42  ;;  %v752_v47 = vrot.slane %v751_v45, 1 }
 0x13d   : > { %684 = vst [vmem:[%s226_s9] sm:$0x1] %v683_v46  ;;  %v753_v11 = vadd.f32 %v752_v47, %v751_v45 }
 0x13f   : > { %754 = vst [vmem:[%s229_s12] sm:$0x1] %v753_v11 }
 0x140 PF: > { %s16_s18 = sadd.s32 1, %s1010_s18  }
 0x141   : > { %p13_p4 = scmp.ge.s32.totalorder %s16_s18, 4  }
 0x143   :  { %15 = sbr.rel (!%p13_p4) target bundleno = 1 (0x1), region = 78 }

// kernel: bottleneck_time_emb_forward.4
= control target key start
LH: loop header
LB: loop body
LE: loop exit
PB: predicated region body
PF: predicated region fallthrough
CT: control target
= control target key end

     0   :  { %s2074_s21 = smov 0   ;;  %s2437_s0 = inlined_call_operand.vmem [shape: f32[2,256,16], index: 0, kind: input, shape index: {}]   ;;  %s2438_s1 = inlined_call_operand.vmem [shape: f32[2,1,32], index: 1, kind: input, shape index: {}]   ;;  %s2439_s2 = inlined_call_operand.vmem [shape: f32[32,16], index: 2, kind: input, shape index: {}]   ;;  %s2440_s3 = inlined_call_operand.vmem [shape: f32[1,16], index: 3, kind: input, shape index: {}]   ;;  %s2441_s4 = inlined_call_operand.vmem [shape: f32[32,16], index: 4, kind: input, shape index: {}]   ;;  %s2442_s5 = inlined_call_operand.vmem [shape: f32[1,16], index: 5, kind: input, shape index: {}]   ;;  %s2443_s6 = inlined_call_operand.vmem [shape: bf16[16,32], index: 6, kind: input, shape index: {}]   ;;  %s2444_s7 = inlined_call_operand.vmem [shape: bf16[16,128], index: 7, kind: input, shape index: {}]   ;;  %s2445_s8 = inlined_call_operand.vmem [shape: bf16[2,256,16], index: 8, kind: output, shape index: {0}]   ;;  %s2446_s9 = inlined_call_operand.vmem [shape: f32[2,1,32], index: 9, kind: output, shape index: {1}]   ;;  %s2447_s10 = inlined_call_operand.vmem [shape: f32[2,1,32], index: 10, kind: output, shape index: {2}]   ;;  %s2448_s11 = inlined_call_operand.vmem [shape: f32[2,1,128], index: 11, kind: output, shape index: {3}]   ;;  %s2449_s12 = inlined_call_operand.vmem [shape: f32[2,1,128], index: 12, kind: output, shape index: {4}]  }
   0x1 LB: > { %s1722_s22 = sadd.s32 4294967295, %s2004_s21   ;;  %p1726_p0 = scmp.ge.s32.totalorder %s2004_s21, 1  ;;  %s2004_s21 = sphi %s2074_s21, %s23_s21  }
   0x2   : > { %p379_p1 = scmp.lt.s32.totalorder %s2004_s21, 3 }
   0x4   : > { %p380_p2 = pnand %p1726_p0, %p379_p1 }
   0x5   : > { %v470_v0 = vld [vmem:[%s2439_s2] sm:$0xff] (!%p380_p2)  ;;  %v471_v1 = vld [vmem:[%s2439_s2 + $0x8] sm:$0xff] (!%p380_p2)  ;;  %v2006_v3 = vmov (!%p380_p2), 0.0|0.0   ;;  %v472_v6 = vld [vmem:[%s2439_s2 + $0x10] sm:$0xff] (!%p380_p2)  ;;  %p436_p3 = scmp.lt.s32.totalorder (!%p380_p2), %s1722_s22, 1  ;;  %vm2007_vm0 = vmmov (!%p380_p2), 0   ;;  %v657_v23 = vlaneseq (!%p380_p2) }
   0x6   : > { %383 = sbr.rel (%p380_p2) target bundleno = 568 (0x238), region = 52  ;;  %v549_v2 = vld [vmem:[%s2441_s4] sm:$0xff] (!%p380_p2)  ;;  %1969 = vmatprep.subr.bf16.mxu0 (!%p380_p2), %v2006_v3  ;;  %v1970_v4 = vpack.c.bf16 (!%p380_p2), %v471_v1, %v470_v0  ;;  %1975 = vmatprep.subr.bf16.mxu1 (!%p380_p2), %v2006_v3  ;;  %v550_v5 = vld [vmem:[%s2441_s4 + $0x8] sm:$0xff] (!%p380_p2)  ;;  %v473_v7 = vld [vmem:[%s2439_s2 + $0x18] sm:$0xff] (!%p380_p2)  ;;  %v2008_v9 = vmov (!%p380_p2), 0.0   ;;  %vm475_vm1 = vcmask (!%p380_p2), 261120  }
   0x7   : > { %v1976_v8 = vpack.c.bf16 (!%p380_p2), %v550_v5, %v549_v2  ;;  %1887 = vmatprep.mubr.msk.f32.mxu0 (!%p380_p2), %vm2007_vm0, %v2008_v9  ;;  %v551_v10 = vld [vmem:[%s2441_s4 + $0x10] sm:$0xff] (!%p380_p2)  ;;  %v552_v11 = vld [vmem:[%s2441_s4 + $0x18] sm:$0xff] (!%p380_p2)  ;;  %1898 = vmatprep.mubr.msk.f32.mxu1 (!%p380_p2), %vm2007_vm0, %v2008_v9  ;;  %v1973_v12 = vpack.c.bf16 (!%p380_p2), %v473_v7, %v472_v6  ;;  %v1992_v21 = vld [vmem:[%s2443_s6] sm:$0xff] (!%p380_p2)   ;;  %v658_v24 = vshrl.u32 (!%p380_p2), %v657_v23, 7  ;;  %vm857_vm2 = vcmask (!%p380_p2), 125952  }
   0x8   : > { %1971 = vmatpush3.bf16.msra.mxu0 (!%p380_p2), %v1970_v4  ;;  %v1979_v13 = vpack.c.bf16 (!%p380_p2), %v552_v11, %v551_v10  ;;  %v1993_v22 = vld [vmem:[%s2444_s7] sm:$0xff] (!%p380_p2)   ;;  %vm898_vm3 = vcmask (!%p380_p2), 130048   ;;  %vm1177_vm4 = vcmask (!%p380_p2), 253952  }
   0x9   : > { %1972 = vmatprep.subr.bf16.mxu0 (!%p380_p2), %v2006_v3  ;;  %1977 = vmatpush3.bf16.msra.mxu1 (!%p380_p2), %v1976_v8  ;;  %v474_v25 = vld [vmem:[%s2440_s3] sm:$0x1] (!%p380_p2)  ;;  %v659_v30 = vsub.s32 (!%p380_p2), 0, %v658_v24 }
   0xa   : > { %1978 = vmatprep.subr.bf16.mxu1 (!%p380_p2), %v2006_v3  ;;  %v553_v26 = vld [vmem:[%s2442_s5] sm:$0x1] (!%p380_p2) }
   0xc   : > { %1974 = vmatpush3.bf16.msra.mxu0 (!%p380_p2), %v1973_v12 }
   0xd   : > { %s2451_s22 = smov (!%p436_p3, %s1722_s22), 1  ;;  %1980 = vmatpush3.bf16.msra.mxu1 %v1979_v13  ;;  %1901 = vmatprep.subr.bf16.mxu0 %v1992_v21 }
   0xe   : > { %s443_s25 = scalar_lea.vmem %s2438_s1, %s2451_s22  ;;  %1935 = vmatprep.subr.bf16.mxu1 %v1993_v22  ;;  %s1801_s30 = sshll.u32 %s2451_s22, 8 }
   0xf   : > { %v462_v14 = vld [vmem:[%s443_s25] sm:$0x1]  ;;  %s2130_s19 = scalar_lea.vmem %s2437_s0, %s1801_s30  ;;  %s1802_s20 = sshll.u32 %s2451_s22, 7 }
  0x10   : > { %v463_v15 = vsub.f32 0.0, %v462_v14  ;;  %v624_v35 = vld [vmem:[%s2130_s19] sm:$0xff]  ;;  %v625_v36 = vld [vmem:[%s2130_s19 + $0x8] sm:$0xff]  ;;  %v626_v37 = vld [vmem:[%s2130_s19 + $0x10] sm:$0xff]  ;;  %s2160_s25 = scalar_lea.vmem %s2445_s8, %s1802_s20  ;;  %s451_s28 = scalar_lea.vmem %s2446_s9, %s2451_s22 }
  0x11   : > { %v627_v38 = vld [vmem:[%s2130_s19 + $0x18] sm:$0xff]  ;;  %v628_v39 = vld [vmem:[%s2130_s19 + $0x20] sm:$0xff]  ;;  %v629_v42 = vld [vmem:[%s2130_s19 + $0x28] sm:$0xff]  ;;  %s457_s13 = scalar_lea.vmem %s2448_s11, %s2451_s22  ;;  %s454_s16 = scalar_lea.vmem %s2447_s10, %s2451_s22 }
  0x12   : > { %v464_v16 = vmul.f32 1.442695, %v463_v15  ;;  %v630_v43 = vld [vmem:[%s2130_s19 + $0x30] sm:$0xff]  ;;  %v631_v44 = vld [vmem:[%s2130_s19 + $0x38] sm:$0xff]  ;;  %v632_v1 = vld [vmem:[%s2130_s19 + $0x40] sm:$0xff] }
  0x13   : > { %v633_v2 = vld [vmem:[%s2130_s19 + $0x48] sm:$0xff]  ;;  %v634_v7 = vld [vmem:[%s2130_s19 + $0x50] sm:$0xff]  ;;  %v635_v8 = vld [vmem:[%s2130_s19 + $0x58] sm:$0xff] }
  0x14   : > { %1994 = vpow2.f32 %v464_v16  ;;  %v636_v9 = vld [vmem:[%s2130_s19 + $0x60] sm:$0xff]  ;;  %v637_v13 = vld [vmem:[%s2130_s19 + $0x68] sm:$0xff] }
  0x1e   : > { %v1995_v17 = vpop.eup %1994 }
  0x1f   : > { %v466_v18 = vadd.f32 1.0, %v1995_v17 }
  0x21   : > { %1996 = vrcp.f32 %v466_v18  ;;  %v639_v18 = vld [vmem:[%s2130_s19 + $0x78] sm:$0xff] }
  0x2b   : > { %v1997_v19 = vpop.eup %1996 }
  0x2c   : > { %v469_v20 = vmul.f32 %v1997_v19, %v462_v14  ;;  %v638_v14 = vld [vmem:[%s2130_s19 + $0x70] sm:$0xff] }
  0x2e   : > { %1888 = vmatmul.mubr.msk.f32.vlgmr.msra.gmra.mrb[0].mxu0 %vm475_vm1, %v469_v20  ;;  %1899 = vmatmul.mubr.msk.f32.vlgmr.msra.gmra.mrb[0].mxu1 %vm475_vm1, %v469_v20 }
  0x2f   : > { %1902 = vmatpush3.bf16.msra.mxu0 %v1992_v21  ;;  %1936 = vmatpush3.bf16.msra.mxu1 %v1993_v22 }
 0x101   : > { %v545_v27 = vpop.f32.mrb[0].mxu0  ;;  %v620_v28 = vpop.f32.mrb[0].mxu1 }
 0x102   : > { %v546_v29 = vadd.f32 %v545_v27, %v474_v25  ;;  %v1889_v31 = vpop.f32.mrb[1].mxu0  ;;  %v621_v32 = vadd.f32 %v620_v28, %v553_v26  ;;  %v1900_v33 = vpop.f32.mrb[1].mxu1 }
 0x104   : > { %v656_v34 = vadd.f32 1.0, %v546_v29  ;;  %v2139_v41 = vrot.slane %v621_v32, %v659_v30 }
 0x106   : > { %v2137_v40 = vrot.slane %v656_v34, %v659_v30  ;;  %v640_v30 = vld [vmem:[%s2130_s19 + $0x80] sm:$0xff] }
 0x108   : > { %v661_v45 = vmul.f32 %v2137_v40, %v624_v35  ;;  %v662_v46 = vmul.f32 %v2137_v40, %v625_v36  ;;  %v663_v47 = vmul.f32 %v2137_v40, %v626_v37  ;;  %v664_v48 = vmul.f32 %v2137_v40, %v627_v38  ;;  %v641_v35 = vld [vmem:[%s2130_s19 + $0x88] sm:$0xff]  ;;  %v642_v36 = vld [vmem:[%s2130_s19 + $0x90] sm:$0xff]  ;;  %v643_v37 = vld [vmem:[%s2130_s19 + $0x98] sm:$0xff] }
 0x109   : > { %v665_v49 = vmul.f32 %v2137_v40, %v628_v39  ;;  %v666_v50 = vmul.f32 %v2137_v40, %v629_v42  ;;  %v667_v51 = vmul.f32 %v2137_v40, %v630_v43  ;;  %v668_v52 = vmul.f32 %v2137_v40, %v631_v44 }
 0x10a   : > { %v697_v53 = vadd.f32 %v2139_v41, %v661_v45  ;;  %v698_v54 = vadd.f32 %v2139_v41, %v662_v46  ;;  %v699_v55 = vadd.f32 %v2139_v41, %v663_v47  ;;  %v700_v56 = vadd.f32 %v2139_v41, %v664_v48 }
 0x10b   : > { %v701_v57 = vadd.f32 %v2139_v41, %v665_v49  ;;  %v702_v58 = vadd.f32 %v2139_v41, %v666_v50  ;;  %v703_v59 = vadd.f32 %v2139_v41, %v667_v51  ;;  %v704_v60 = vadd.f32 %v2139_v41, %v668_v52  ;;  %v644_v52 = vld [vmem:[%s2130_s19 + $0xa0] sm:$0xff] }
 0x10c   : > { %v729_v61 = vpack.c.bf16 %v698_v54, %v697_v53  ;;  %v1803_v62 = vpack.c.bf16 %v697_v53, %v697_v53  ;;  %v1804_v63 = vpack.c.bf16 %v698_v54, %v698_v54  ;;  %v730_v0 = vpack.c.bf16 %v700_v56, %v699_v55  ;;  %v645_v53 = vld [vmem:[%s2130_s19 + $0xa8] sm:$0xff]  ;;  %v646_v54 = vld [vmem:[%s2130_s19 + $0xb0] sm:$0xff] }
 0x10d   : > { %v1805_v3 = vpack.c.bf16 %v699_v55, %v699_v55  ;;  %v1806_v4 = vpack.c.bf16 %v700_v56, %v700_v56  ;;  %v731_v5 = vpack.c.bf16 %v702_v58, %v701_v57  ;;  %v1807_v6 = vpack.c.bf16 %v701_v57, %v701_v57 }
 0x10e   : > { %858 = vst.msk [vmem:[%s2160_s25] sm:$0xf] %vm857_vm2, %v1803_v62  ;;  %859 = vst.msk [vmem:[%s2160_s25 + $0x4] sm:$0xf] %vm857_vm2, %v1804_v63  ;;  %1903 = vmatprep.mubr.msk.bf16.mxu0 %vm898_vm3, %v729_v61  ;;  %1937 = vmatprep.mubr.msk.bf16.mxu1 %vm898_vm3, %v729_v61  ;;  %v1808_v10 = vpack.c.bf16 %v702_v58, %v702_v58  ;;  %v732_v11 = vpack.c.bf16 %v704_v60, %v703_v59 }
 0x10f   : > { %v1809_v12 = vpack.c.bf16 %v703_v59, %v703_v59  ;;  %860 = vst.msk [vmem:[%s2160_s25 + $0x8] sm:$0xf] %vm857_vm2, %v1805_v3  ;;  %861 = vst.msk [vmem:[%s2160_s25 + $0xc] sm:$0xf] %vm857_vm2, %v1806_v4  ;;  %1904 = vmatmul.mubr.msk.bf16.vlgmr.msra.gmra.mrb[4].mxu0 %vm898_vm3, %v730_v0  ;;  %1938 = vmatmul.mubr.msk.bf16.vlgmr.msra.gmra.mrb[4].mxu1 %vm898_vm3, %v730_v0  ;;  %v1810_v15 = vpack.c.bf16 %v704_v60, %v704_v60  ;;  %v647_v0 = vld [vmem:[%s2130_s19 + $0xb8] sm:$0xff]  ;;  %v649_v3 = vld [vmem:[%s2130_s19 + $0xc8] sm:$0xff] }
 0x110   : > { %862 = vst.msk [vmem:[%s2160_s25 + $0x10] sm:$0xf] %vm857_vm2, %v1807_v6  ;;  %v669_v16 = vmul.f32 %v2137_v40, %v632_v1  ;;  %v670_v17 = vmul.f32 %v2137_v40, %v633_v2  ;;  %863 = vst.msk [vmem:[%s2160_s25 + $0x14] sm:$0xf] %vm857_vm2, %v1808_v10  ;;  %1907 = vmatprep.mubr.msk.bf16.mxu0 %vm898_vm3, %v731_v5  ;;  %1941 = vmatprep.mubr.msk.bf16.mxu1 %vm898_vm3, %v731_v5  ;;  %v648_v2 = vld [vmem:[%s2130_s19 + $0xc0] sm:$0xff] }
 0x111   : > { %864 = vst.msk [vmem:[%s2160_s25 + $0x18] sm:$0xf] %vm857_vm2, %v1809_v12  ;;  %v671_v19 = vmul.f32 %v2137_v40, %v634_v7  ;;  %v672_v20 = vmul.f32 %v2137_v40, %v635_v8  ;;  %v673_v21 = vmul.f32 %v2137_v40, %v636_v9  ;;  %865 = vst.msk [vmem:[%s2160_s25 + $0x1c] sm:$0xf] %vm857_vm2, %v1810_v15  ;;  %v650_v8 = vld [vmem:[%s2130_s19 + $0xd0] sm:$0xff] }
 0x112   : > { %v705_v22 = vadd.f32 %v2139_v41, %v669_v16  ;;  %v706_v23 = vadd.f32 %v2139_v41, %v670_v17  ;;  %v674_v24 = vmul.f32 %v2137_v40, %v637_v13  ;;  %v675_v25 = vmul.f32 %v2137_v40, %v638_v14  ;;  %v651_v17 = vld [vmem:[%s2130_s19 + $0xd8] sm:$0xff] }
 0x113   : > { %v707_v26 = vadd.f32 %v2139_v41, %v671_v19  ;;  %v708_v27 = vadd.f32 %v2139_v41, %v672_v20  ;;  %v709_v28 = vadd.f32 %v2139_v41, %v673_v21  ;;  %v676_v29 = vmul.f32 %v2137_v40, %v639_v18  ;;  %v652_v18 = vld [vmem:[%s2130_s19 + $0xe0] sm:$0xff] }
 0x114   : > { %v733_v31 = vpack.c.bf16 %v706_v23, %v705_v22  ;;  %v1811_v32 = vpack.c.bf16 %v705_v22, %v705_v22  ;;  %v1812_v33 = vpack.c.bf16 %v706_v23, %v706_v23  ;;  %v710_v34 = vadd.f32 %v2139_v41, %v674_v24 }
 0x115   : > { %v2214_v38 = vpack.c.bf16 %v708_v27, %v707_v26  ;;  %v1813_v39 = vpack.c.bf16 %v707_v26, %v707_v26  ;;  %v1814_v42 = vpack.c.bf16 %v708_v27, %v708_v27  ;;  %v1815_v43 = vpack.c.bf16 %v709_v28, %v709_v28 }
 0x116   : > { %866 = vst.msk [vmem:[%s2160_s25 + $0x20] sm:$0xf] %vm857_vm2, %v1811_v32  ;;  %867 = vst.msk [vmem:[%s2160_s25 + $0x24] sm:$0xf] %vm857_vm2, %v1812_v33  ;;  %v2220_v44 = vpack.c.bf16 %v710_v34, %v709_v28  ;;  %v1816_v45 = vpack.c.bf16 %v710_v34, %v710_v34  ;;  %v711_v46 = vadd.f32 %v2139_v41, %v675_v25  ;;  %v655_v32 = vld [vmem:[%s2130_s19 + $0xf8] sm:$0xff] }
 0x117   : > { %v712_v47 = vadd.f32 %v2139_v41, %v676_v29  ;;  %868 = vst.msk [vmem:[%s2160_s25 + $0x28] sm:$0xf] %vm857_vm2, %v1813_v39  ;;  %869 = vst.msk [vmem:[%s2160_s25 + $0x2c] sm:$0xf] %vm857_vm2, %v1814_v42  ;;  %v677_v48 = vmul.f32 %v2137_v40, %v640_v30  ;;  %v678_v49 = vmul.f32 %v2137_v40, %v641_v35  ;;  %1908 = vmatmul.mubr.msk.bf16.gmra.mrb[8].mxu0 %vm898_vm3, %v732_v11  ;;  %v653_v29 = vld [vmem:[%s2130_s19 + $0xe8] sm:$0xff] }
 0x118   : > { %870 = vst.msk [vmem:[%s2160_s25 + $0x30] sm:$0xf] %vm857_vm2, %v1815_v43  ;;  %v679_v50 = vmul.f32 %v2137_v40, %v642_v36  ;;  %v680_v51 = vmul.f32 %v2137_v40, %v643_v37  ;;  %1942 = vmatmul.mubr.msk.bf16.gmra.mrb[8].mxu1 %vm898_vm3, %v732_v11  ;;  %871 = vst.msk [vmem:[%s2160_s25 + $0x34] sm:$0xf] %vm857_vm2, %v1816_v45  ;;  %v1817_v56 = vpack.c.bf16 %v711_v46, %v711_v46 }
 0x119   : > { %v2241_v55 = vpack.c.bf16 %v712_v47, %v711_v46  ;;  %v1818_v57 = vpack.c.bf16 %v712_v47, %v712_v47  ;;  %1911 = vmatprep.mubr.msk.bf16.mxu0 %vm898_vm3, %v733_v31  ;;  %1945 = vmatprep.mubr.msk.bf16.mxu1 %vm898_vm3, %v733_v31  ;;  %v713_v58 = vadd.f32 %v2139_v41, %v677_v48  ;;  %v654_v31 = vld [vmem:[%s2130_s19 + $0xf0] sm:$0xff]  ;;  %s460_s19 = scalar_lea.vmem %s2449_s12, %s2451_s22 }
 0x11a   : > { %v714_v59 = vadd.f32 %v2139_v41, %v678_v49  ;;  %v715_v60 = vadd.f32 %v2139_v41, %v679_v50  ;;  %872 = vst.msk [vmem:[%s2160_s25 + $0x38] sm:$0xf] %vm857_vm2, %v1817_v56  ;;  %v716_v61 = vadd.f32 %v2139_v41, %v680_v51  ;;  %v681_v62 = vmul.f32 %v2137_v40, %v644_v52 }
 0x11b   : > { %873 = vst.msk [vmem:[%s2160_s25 + $0x3c] sm:$0xf] %vm857_vm2, %v1818_v57  ;;  %v682_v63 = vmul.f32 %v2137_v40, %v645_v53  ;;  %v683_v1 = vmul.f32 %v2137_v40, %v646_v54  ;;  %v1819_v5 = vpack.c.bf16 %v713_v58, %v713_v58  ;;  %v684_v13 = vmul.f32 %v2137_v40, %v647_v0 }
 0x11c   : > { %v2259_v4 = vpack.c.bf16 %v714_v59, %v713_v58  ;;  %v1820_v6 = vpack.c.bf16 %v714_v59, %v714_v59  ;;  %v1821_v7 = vpack.c.bf16 %v715_v60, %v715_v60  ;;  %v2262_v9 = vpack.c.bf16 %v716_v61, %v715_v60 }
 0x11d   : > { %v1822_v10 = vpack.c.bf16 %v716_v61, %v716_v61  ;;  %v717_v11 = vadd.f32 %v2139_v41, %v681_v62  ;;  %v718_v12 = vadd.f32 %v2139_v41, %v682_v63  ;;  %874 = vst.msk [vmem:[%s2160_s25 + $0x40] sm:$0xf] %vm857_vm2, %v1819_v5  ;;  %v719_v14 = vadd.f32 %v2139_v41, %v683_v1 }
 0x11e   : > { %875 = vst.msk [vmem:[%s2160_s25 + $0x44] sm:$0xf] %vm857_vm2, %v1820_v6  ;;  %876 = vst.msk [vmem:[%s2160_s25 + $0x48] sm:$0xf] %vm857_vm2, %v1821_v7  ;;  %v685_v15 = vmul.f32 %v2137_v40, %v648_v2  ;;  %v686_v16 = vmul.f32 %v2137_v40, %v649_v3  ;;  %v687_v22 = vmul.f32 %v2137_v40, %v650_v8 }
 0x11f   : > { %877 = vst.msk [vmem:[%s2160_s25 + $0x4c] sm:$0xf] %vm857_vm2, %v1822_v10  ;;  %v739_v19 = vpack.c.bf16 %v718_v12, %v717_v11  ;;  %v1823_v20 = vpack.c.bf16 %v717_v11, %v717_v11  ;;  %v1824_v21 = vpack.c.bf16 %v718_v12, %v718_v12  ;;  %v720_v23 = vadd.f32 %v2139_v41, %v684_v13 }
 0x120   : > { %v1825_v24 = vpack.c.bf16 %v719_v14, %v719_v14  ;;  %v721_v25 = vadd.f32 %v2139_v41, %v685_v15  ;;  %v722_v26 = vadd.f32 %v2139_v41, %v686_v16  ;;  %1912 = vmatmul.mubr.msk.bf16.gmra.mrb[12].mxu0 %vm898_vm3, %v2214_v38  ;;  %1946 = vmatmul.mubr.msk.bf16.gmra.mrb[12].mxu1 %vm898_vm3, %v2214_v38 }
 0x121   : > { %878 = vst.msk [vmem:[%s2160_s25 + $0x50] sm:$0xf] %vm857_vm2, %v1823_v20  ;;  %879 = vst.msk [vmem:[%s2160_s25 + $0x54] sm:$0xf] %vm857_vm2, %v1824_v21  ;;  %v688_v27 = vmul.f32 %v2137_v40, %v651_v17  ;;  %v723_v28 = vadd.f32 %v2139_v41, %v687_v22  ;;  %v689_v30 = vmul.f32 %v2137_v40, %v652_v18  ;;  %1915 = vmatprep.mubr.msk.bf16.mxu0 %vm898_vm3, %v2220_v44 }
 0x122   : > { %1949 = vmatprep.mubr.msk.bf16.mxu1 %vm898_vm3, %v2220_v44  ;;  %v740_v33 = vpack.c.bf16 %v720_v23, %v719_v14  ;;  %v1826_v34 = vpack.c.bf16 %v720_v23, %v720_v23  ;;  %880 = vst.msk [vmem:[%s2160_s25 + $0x58] sm:$0xf] %vm857_vm2, %v1825_v24  ;;  %v741_v35 = vpack.c.bf16 %v722_v26, %v721_v25 }
 0x123   : > { %v1827_v36 = vpack.c.bf16 %v721_v25, %v721_v25  ;;  %v1828_v37 = vpack.c.bf16 %v722_v26, %v722_v26  ;;  %v724_v38 = vadd.f32 %v2139_v41, %v688_v27  ;;  %v1829_v39 = vpack.c.bf16 %v723_v28, %v723_v28 }
 0x124   : > { %881 = vst.msk [vmem:[%s2160_s25 + $0x5c] sm:$0xf] %vm857_vm2, %v1826_v34  ;;  %v690_v42 = vmul.f32 %v2137_v40, %v653_v29  ;;  %v725_v43 = vadd.f32 %v2139_v41, %v689_v30  ;;  %v691_v44 = vmul.f32 %v2137_v40, %v654_v31  ;;  %v692_v45 = vmul.f32 %v2137_v40, %v655_v32 }
 0x125   : > { %882 = vst.msk [vmem:[%s2160_s25 + $0x60] sm:$0xf] %vm857_vm2, %v1827_v36  ;;  %883 = vst.msk [vmem:[%s2160_s25 + $0x64] sm:$0xf] %vm857_vm2, %v1828_v37  ;;  %v742_v46 = vpack.c.bf16 %v724_v38, %v723_v28  ;;  %v1830_v47 = vpack.c.bf16 %v724_v38, %v724_v38 }
 0x126   : > { %884 = vst.msk [vmem:[%s2160_s25 + $0x68] sm:$0xf] %vm857_vm2, %v1829_v39  ;;  %v726_v48 = vadd.f32 %v2139_v41, %v690_v42  ;;  %v1831_v49 = vpack.c.bf16 %v725_v43, %v725_v43  ;;  %v727_v50 = vadd.f32 %v2139_v41, %v691_v44  ;;  %v728_v51 = vadd.f32 %v2139_v41, %v692_v45 }
 0x127   : > { %885 = vst.msk [vmem:[%s2160_s25 + $0x6c] sm:$0xf] %vm857_vm2, %v1830_v47 }
 0x128   : > { %v743_v40 = vpack.c.bf16 %v726_v48, %v725_v43  ;;  %v1832_v52 = vpack.c.bf16 %v726_v48, %v726_v48  ;;  %886 = vst.msk [vmem:[%s2160_s25 + $0x70] sm:$0xf] %vm857_vm2, %v1831_v49  ;;  %v744_v53 = vpack.c.bf16 %v728_v51, %v727_v50  ;;  %v1833_v54 = vpack.c.bf16 %v727_v50, %v727_v50 }
 0x129   : > { %1916 = vmatmul.mubr.msk.bf16.gmra.mrb[16].mxu0 %vm898_vm3, %v2241_v55  ;;  %1950 = vmatmul.mubr.msk.bf16.gmra.mrb[16].mxu1 %vm898_vm3, %v2241_v55  ;;  %v1834_v56 = vpack.c.bf16 %v728_v51, %v728_v51 }
 0x12a   : > { %1919 = vmatprep.mubr.msk.bf16.mxu0 %vm898_vm3, %v2259_v4  ;;  %1953 = vmatprep.mubr.msk.bf16.mxu1 %vm898_vm3, %v2259_v4  ;;  %887 = vst.msk [vmem:[%s2160_s25 + $0x74] sm:$0xf] %vm857_vm2, %v1832_v52  ;;  %888 = vst.msk [vmem:[%s2160_s25 + $0x78] sm:$0xf] %vm857_vm2, %v1833_v54 }
 0x12b   : > { %889 = vst.msk [vmem:[%s2160_s25 + $0x7c] sm:$0xf] %vm857_vm2, %v1834_v56 }
 0x131   : > { %1920 = vmatmul.mubr.msk.bf16.gmra.mrb[20].mxu0 %vm898_vm3, %v2262_v9  ;;  %1954 = vmatmul.mubr.msk.bf16.gmra.mrb[20].mxu1 %vm898_vm3, %v2262_v9 }
 0x132   : > { %1923 = vmatprep.mubr.msk.bf16.mxu0 %vm898_vm3, %v739_v19  ;;  %1957 = vmatprep.mubr.msk.bf16.mxu1 %vm898_vm3, %v739_v19 }
 0x139   : > { %1924 = vmatmul.mubr.msk.bf16.gmra.mrb[24].mxu0 %vm898_vm3, %v740_v33  ;;  %1958 = vmatmul.mubr.msk.bf16.gmra.mrb[24].mxu1 %vm898_vm3, %v740_v33 }
 0x13a   : > { %1927 = vmatprep.mubr.msk.bf16.mxu0 %vm898_vm3, %v741_v35  ;;  %1961 = vmatprep.mubr.msk.bf16.mxu1 %vm898_vm3, %v741_v35 }
 0x141   : > { %1928 = vmatmul.mubr.msk.bf16.gmra.mrb[28].mxu0 %vm898_vm3, %v742_v46  ;;  %1962 = vmatmul.mubr.msk.bf16.gmra.mrb[28].mxu1 %vm898_vm3, %v742_v46 }
 0x142   : > { %1931 = vmatprep.mubr.msk.bf16.mxu0 %vm898_vm3, %v743_v40  ;;  %1965 = vmatprep.mubr.msk.bf16.mxu1 %vm898_vm3, %v743_v40 }
 0x149   : > { %1932 = vmatmul.mubr.msk.bf16.gmra.mrb[32].mxu0 %vm898_vm3, %v744_v53  ;;  %1966 = vmatmul.mubr.msk.bf16.gmra.mrb[32].mxu1 %vm898_vm3, %v744_v53 }
 0x1e2   : > { %v1905_v41 = vpop.f32.mrb[4].mxu0  ;;  %v1939_v55 = vpop.f32.mrb[4].mxu1 }
 0x1e3   : > { %v981_v57 = vpop.f32.mrb[5].mxu0  ;;  %v1323_v58 = vpop.f32.mrb[5].mxu1  ;;  %v1181_v62 = vmul.f32 %v1905_v41, %v1905_v41  ;;  %v1111_v5 = vsel %vm475_vm1, %v1905_v41, 0.0  ;;  %v1490_v13 = vmul.f32 %v1939_v55, %v1939_v55 }
 0x1e4   : > { %v1179_v59 = vmul.f32 %v981_v57, %v981_v57  ;;  %v1906_v60 = vpop.f32.mrb[6].mxu0  ;;  %v1940_v61 = vpop.f32.mrb[6].mxu1  ;;  %v1108_v1 = vsel %vm475_vm1, %v981_v57, 0.0  ;;  %v1488_v6 = vmul.f32 %v1323_v58, %v1323_v58 }
 0x1e5   : > { %v984_v63 = vpop.f32.mrb[7].mxu0  ;;  %v1326_v0 = vpop.f32.mrb[7].mxu1  ;;  %v1182_v10 = vmul.f32 %v1906_v60, %v1906_v60  ;;  %v1214_v17 = vsel %vm475_vm1, %v1181_v62, 0.0  ;;  %v1113_v21 = vsel %vm475_vm1, %v1906_v60, 0.0  ;;  %v1491_v22 = vmul.f32 %v1940_v61, %v1940_v61 }
 0x1e6   : > { %v1109_v2 = vsel %vm475_vm1, %v984_v63, 0.0  ;;  %v1180_v3 = vmul.f32 %v984_v63, %v984_v63  ;;  %v1450_v4 = vadd.f32 %v1326_v0, %v1323_v58  ;;  %v1489_v8 = vmul.f32 %v1326_v0, %v1326_v0 }
 0x1e7   : > { %v1110_v7 = vadd.f32 %v1109_v2, %v1108_v1  ;;  %v1211_v9 = vsel %vm475_vm1, %v1179_v59, 0.0  ;;  %v1216_v27 = vsel %vm475_vm1, %v1182_v10, 0.0 }
 0x1e8   : > { %v1212_v11 = vsel %vm475_vm1, %v1180_v3, 0.0  ;;  %v1451_v12 = vadd.f32 %v1939_v55, %v1450_v4  ;;  %v1520_v16 = vadd.f32 %v1489_v8, %v1488_v6 }
 0x1e9   : > { %v1112_v14 = vadd.f32 %v1111_v5, %v1110_v7  ;;  %v1213_v15 = vadd.f32 %v1212_v11, %v1211_v9 }
 0x1ea   : > { %v1909_v18 = vpop.f32.mrb[8].mxu0  ;;  %v1452_v20 = vadd.f32 %v1940_v61, %v1451_v12  ;;  %v1521_v24 = vadd.f32 %v1520_v16, %v1490_v13 }
 0x1eb   : > { %v1943_v19 = vpop.f32.mrb[8].mxu1  ;;  %v1215_v23 = vadd.f32 %v1214_v17, %v1213_v15  ;;  %v997_v25 = vpop.f32.mrb[9].mxu0  ;;  %v1114_v28 = vadd.f32 %v1113_v21, %v1112_v14  ;;  %v1185_v43 = vmul.f32 %v1909_v18, %v1909_v18  ;;  %v1119_v50 = vsel %vm475_vm1, %v1909_v18, 0.0 }
 0x1ec   : > { %v1339_v26 = vpop.f32.mrb[9].mxu1  ;;  %v1115_v29 = vsel %vm475_vm1, %v997_v25, 0.0  ;;  %v1183_v30 = vmul.f32 %v997_v25, %v997_v25  ;;  %v1910_v31 = vpop.f32.mrb[10].mxu0  ;;  %v1522_v42 = vadd.f32 %v1521_v24, %v1491_v22  ;;  %v1494_v55 = vmul.f32 %v1943_v19, %v1943_v19 }
 0x1ed   : > { %v1944_v32 = vpop.f32.mrb[10].mxu1  ;;  %v1217_v33 = vadd.f32 %v1216_v27, %v1215_v23  ;;  %v1453_v34 = vadd.f32 %v1452_v20, %v1339_v26  ;;  %v1492_v35 = vmul.f32 %v1339_v26, %v1339_v26  ;;  %v1000_v36 = vpop.f32.mrb[11].mxu0  ;;  %v1116_v38 = vadd.f32 %v1115_v29, %v1114_v28 }
 0x1ee   : > { %v1342_v37 = vpop.f32.mrb[11].mxu1  ;;  %v1218_v39 = vsel %vm475_vm1, %v1183_v30, 0.0  ;;  %v1117_v45 = vsel %vm475_vm1, %v1000_v36, 0.0  ;;  %v1184_v48 = vmul.f32 %v1000_v36, %v1000_v36  ;;  %v1186_v40 = vmul.f32 %v1910_v31, %v1910_v31 }
 0x1ef   : > { %v1219_v44 = vadd.f32 %v1218_v39, %v1217_v33  ;;  %v1523_v46 = vadd.f32 %v1522_v42, %v1492_v35  ;;  %v1118_v47 = vadd.f32 %v1117_v45, %v1116_v38  ;;  %v1454_v49 = vadd.f32 %v1453_v34, %v1342_v37 }
 0x1f0   : > { %v1493_v51 = vmul.f32 %v1342_v37, %v1342_v37  ;;  %v1220_v53 = vsel %vm475_vm1, %v1184_v48, 0.0  ;;  %v1121_v57 = vsel %vm475_vm1, %v1910_v31, 0.0  ;;  %v1222_v62 = vsel %vm475_vm1, %v1185_v43, 0.0 }
 0x1f1   : > { %v1120_v52 = vadd.f32 %v1119_v50, %v1118_v47  ;;  %v1455_v54 = vadd.f32 %v1943_v19, %v1454_v49  ;;  %v1221_v58 = vadd.f32 %v1220_v53, %v1219_v44  ;;  %v1495_v4 = vmul.f32 %v1944_v32, %v1944_v32 }
 0x1f2   : > { %v1524_v59 = vadd.f32 %v1523_v46, %v1493_v51  ;;  %v1224_v10 = vsel %vm475_vm1, %v1186_v40, 0.0 }
 0x1f3   : > { %v1913_v56 = vpop.f32.mrb[12].mxu0  ;;  %v1947_v41 = vpop.f32.mrb[12].mxu1  ;;  %v1122_v63 = vadd.f32 %v1121_v57, %v1120_v52  ;;  %v1223_v5 = vadd.f32 %v1222_v62, %v1221_v58  ;;  %v1456_v7 = vadd.f32 %v1944_v32, %v1455_v54 }
 0x1f4   : > { %v1013_v60 = vpop.f32.mrb[13].mxu0  ;;  %v1355_v61 = vpop.f32.mrb[13].mxu1  ;;  %v1525_v6 = vadd.f32 %v1524_v59, %v1494_v55  ;;  %v1189_v14 = vmul.f32 %v1913_v56, %v1913_v56  ;;  %v1127_v21 = vsel %vm475_vm1, %v1913_v56, 0.0  ;;  %v1498_v25 = vmul.f32 %v1947_v41, %v1947_v41 }
 0x1f5   : > { %v1123_v0 = vsel %vm475_vm1, %v1013_v60, 0.0  ;;  %v1187_v1 = vmul.f32 %v1013_v60, %v1013_v60  ;;  %v1914_v2 = vpop.f32.mrb[14].mxu0  ;;  %v1948_v3 = vpop.f32.mrb[14].mxu1  ;;  %v1496_v13 = vmul.f32 %v1355_v61, %v1355_v61  ;;  %v1225_v15 = vadd.f32 %v1224_v10, %v1223_v5 }
 0x1f6   : > { %v1016_v8 = vpop.f32.mrb[15].mxu0  ;;  %v1358_v9 = vpop.f32.mrb[15].mxu1  ;;  %v1124_v11 = vadd.f32 %v1123_v0, %v1122_v63  ;;  %v1457_v16 = vadd.f32 %v1456_v7, %v1355_v61  ;;  %v1526_v17 = vadd.f32 %v1525_v6, %v1495_v4  ;;  %v1190_v26 = vmul.f32 %v1914_v2, %v1914_v2 }
 0x1f7   : > { %v1226_v12 = vsel %vm475_vm1, %v1187_v1, 0.0  ;;  %v1125_v18 = vsel %vm475_vm1, %v1016_v8, 0.0  ;;  %v1188_v19 = vmul.f32 %v1016_v8, %v1016_v8  ;;  %v1497_v20 = vmul.f32 %v1358_v9, %v1358_v9 }
 0x1f8   : > { %v1227_v22 = vadd.f32 %v1226_v12, %v1225_v15  ;;  %v1527_v23 = vadd.f32 %v1526_v17, %v1496_v13  ;;  %v1126_v24 = vadd.f32 %v1125_v18, %v1124_v11  ;;  %v1458_v28 = vadd.f32 %v1457_v16, %v1358_v9 }
 0x1f9   : > { %v1228_v27 = vsel %vm475_vm1, %v1188_v19, 0.0  ;;  %v1230_v31 = vsel %vm475_vm1, %v1189_v14, 0.0  ;;  %v1129_v37 = vsel %vm475_vm1, %v1914_v2, 0.0  ;;  %v1499_v38 = vmul.f32 %v1948_v3, %v1948_v3 }
 0x1fa   : > { %v1128_v32 = vadd.f32 %v1127_v21, %v1126_v24  ;;  %v1229_v33 = vadd.f32 %v1228_v27, %v1227_v22  ;;  %v1528_v34 = vadd.f32 %v1527_v23, %v1497_v20  ;;  %v1459_v39 = vadd.f32 %v1947_v41, %v1458_v28 }
 0x1fb   : > { %v1232_v51 = vsel %vm475_vm1, %v1190_v26, 0.0 }
 0x1fc   : > { %v1917_v29 = vpop.f32.mrb[16].mxu0  ;;  %v1951_v30 = vpop.f32.mrb[16].mxu1  ;;  %v1231_v45 = vadd.f32 %v1230_v31, %v1229_v33  ;;  %v1529_v46 = vadd.f32 %v1528_v34, %v1498_v25  ;;  %v1130_v47 = vadd.f32 %v1129_v37, %v1128_v32  ;;  %v1460_v52 = vadd.f32 %v1948_v3, %v1459_v39 }
 0x1fd   : > { %v1029_v35 = vpop.f32.mrb[17].mxu0  ;;  %v1371_v36 = vpop.f32.mrb[17].mxu1  ;;  %v1193_v40 = vmul.f32 %v1917_v29, %v1917_v29  ;;  %v1135_v63 = vsel %vm475_vm1, %v1917_v29, 0.0  ;;  %v1502_v0 = vmul.f32 %v1951_v30, %v1951_v30 }
 0x1fe   : > { %v1131_v42 = vsel %vm475_vm1, %v1029_v35, 0.0  ;;  %v1918_v43 = vpop.f32.mrb[18].mxu0  ;;  %v1952_v44 = vpop.f32.mrb[18].mxu1  ;;  %v1191_v48 = vmul.f32 %v1029_v35, %v1029_v35  ;;  %v1500_v53 = vmul.f32 %v1371_v36, %v1371_v36  ;;  %v1233_v56 = vadd.f32 %v1232_v51, %v1231_v45 }
 0x1ff   : > { %v1032_v49 = vpop.f32.mrb[19].mxu0  ;;  %v1374_v50 = vpop.f32.mrb[19].mxu1  ;;  %v1132_v54 = vadd.f32 %v1131_v42, %v1130_v47  ;;  %v1530_v41 = vadd.f32 %v1529_v46, %v1499_v38  ;;  %v1461_v57 = vadd.f32 %v1460_v52, %v1371_v36  ;;  %v1238_v5 = vsel %vm475_vm1, %v1193_v40, 0.0 }
 0x200   : > { %v1234_v55 = vsel %vm475_vm1, %v1191_v48, 0.0  ;;  %v1133_v58 = vsel %vm475_vm1, %v1032_v49, 0.0  ;;  %v1192_v62 = vmul.f32 %v1032_v49, %v1032_v49  ;;  %v1501_v2 = vmul.f32 %v1374_v50, %v1374_v50 }
 0x201   : > { %v1235_v59 = vadd.f32 %v1234_v55, %v1233_v56  ;;  %v1531_v60 = vadd.f32 %v1530_v41, %v1500_v53  ;;  %v1134_v61 = vadd.f32 %v1133_v58, %v1132_v54  ;;  %v1462_v1 = vadd.f32 %v1461_v57, %v1374_v50 }
 0x202   : > { %v1194_v6 = vmul.f32 %v1918_v43, %v1918_v43  ;;  %v1236_v8 = vsel %vm475_vm1, %v1192_v62, 0.0  ;;  %v1137_v11 = vsel %vm475_vm1, %v1918_v43, 0.0  ;;  %v1503_v17 = vmul.f32 %v1952_v44, %v1952_v44 }
 0x203   : > { %v1136_v7 = vadd.f32 %v1135_v63, %v1134_v61  ;;  %v1237_v12 = vadd.f32 %v1236_v8, %v1235_v59  ;;  %v1463_v13 = vadd.f32 %v1951_v30, %v1462_v1  ;;  %v1532_v14 = vadd.f32 %v1531_v60, %v1501_v2 }
 0x204   : > { %v1921_v4 = vpop.f32.mrb[20].mxu0  ;;  %v1955_v3 = vpop.f32.mrb[20].mxu1  ;;  %v1240_v27 = vsel %vm475_vm1, %v1194_v6, 0.0 }
 0x205   : > { %v1045_v9 = vpop.f32.mrb[21].mxu0  ;;  %v1387_v10 = vpop.f32.mrb[21].mxu1  ;;  %v1138_v18 = vadd.f32 %v1137_v11, %v1136_v7  ;;  %v1239_v23 = vadd.f32 %v1238_v5, %v1237_v12  ;;  %v1533_v24 = vadd.f32 %v1532_v14, %v1502_v0  ;;  %v1464_v25 = vadd.f32 %v1952_v44, %v1463_v13 }
 0x206   : > { %v1922_v15 = vpop.f32.mrb[22].mxu0  ;;  %v1956_v16 = vpop.f32.mrb[22].mxu1  ;;  %v1139_v19 = vsel %vm475_vm1, %v1045_v9, 0.0  ;;  %v1195_v20 = vmul.f32 %v1045_v9, %v1045_v9  ;;  %v1504_v26 = vmul.f32 %v1387_v10, %v1387_v10  ;;  %v1197_v28 = vmul.f32 %v1921_v4, %v1921_v4 }
 0x207   : > { %v1048_v21 = vpop.f32.mrb[23].mxu0  ;;  %v1390_v22 = vpop.f32.mrb[23].mxu1  ;;  %v1140_v29 = vadd.f32 %v1139_v19, %v1138_v18  ;;  %v1143_v31 = vsel %vm475_vm1, %v1921_v4, 0.0  ;;  %v1241_v32 = vadd.f32 %v1240_v27, %v1239_v23  ;;  %v1465_v33 = vadd.f32 %v1464_v25, %v1387_v10 }
 0x208   : > { %v1242_v30 = vsel %vm475_vm1, %v1195_v20, 0.0  ;;  %v1534_v34 = vadd.f32 %v1533_v24, %v1503_v17  ;;  %v1506_v35 = vmul.f32 %v1955_v3, %v1955_v3  ;;  %v1141_v36 = vsel %vm475_vm1, %v1048_v21, 0.0 }
 0x209   : > { %v1196_v37 = vmul.f32 %v1048_v21, %v1048_v21  ;;  %v1505_v38 = vmul.f32 %v1390_v22, %v1390_v22  ;;  %v1243_v39 = vadd.f32 %v1242_v30, %v1241_v32  ;;  %v1142_v43 = vadd.f32 %v1141_v36, %v1140_v29 }
 0x20a   : > { %v1535_v42 = vadd.f32 %v1534_v34, %v1504_v26  ;;  %v1466_v44 = vadd.f32 %v1465_v33, %v1390_v22  ;;  %v1246_v47 = vsel %vm475_vm1, %v1197_v28, 0.0  ;;  %v1145_v48 = vsel %vm475_vm1, %v1922_v15, 0.0 }
 0x20b   : > { %v1198_v49 = vmul.f32 %v1922_v15, %v1922_v15  ;;  %v1244_v50 = vsel %vm475_vm1, %v1196_v37, 0.0  ;;  %v1144_v52 = vadd.f32 %v1143_v31, %v1142_v43  ;;  %v1507_v57 = vmul.f32 %v1956_v16, %v1956_v16 }
 0x20c   : > { %v1925_v45 = vpop.f32.mrb[24].mxu0  ;;  %v1959_v46 = vpop.f32.mrb[24].mxu1  ;;  %v1245_v53 = vadd.f32 %v1244_v50, %v1243_v39  ;;  %v1467_v54 = vadd.f32 %v1955_v3, %v1466_v44  ;;  %v1536_v56 = vadd.f32 %v1535_v42, %v1505_v38 }
 0x20d   : > { %v1061_v51 = vpop.f32.mrb[25].mxu0  ;;  %v1403_v40 = vpop.f32.mrb[25].mxu1  ;;  %v1146_v1 = vadd.f32 %v1145_v48, %v1144_v52  ;;  %v1248_v4 = vsel %vm475_vm1, %v1198_v49, 0.0  ;;  %v1151_v5 = vsel %vm475_vm1, %v1925_v45, 0.0  ;;  %v1201_v6 = vmul.f32 %v1925_v45, %v1925_v45 }
 0x20e   : > { %v1926_v55 = vpop.f32.mrb[26].mxu0  ;;  %v1960_v41 = vpop.f32.mrb[26].mxu1  ;;  %v1147_v58 = vsel %vm475_vm1, %v1061_v51, 0.0  ;;  %v1199_v59 = vmul.f32 %v1061_v51, %v1061_v51  ;;  %v1508_v60 = vmul.f32 %v1403_v40, %v1403_v40  ;;  %v1247_v63 = vadd.f32 %v1246_v47, %v1245_v53 }
 0x20f   : > { %v1064_v61 = vpop.f32.mrb[27].mxu0  ;;  %v1406_v62 = vpop.f32.mrb[27].mxu1  ;;  %v1537_v0 = vadd.f32 %v1536_v56, %v1506_v35  ;;  %v1468_v2 = vadd.f32 %v1956_v16, %v1467_v54  ;;  %v1148_v7 = vadd.f32 %v1147_v58, %v1146_v1  ;;  %v1510_v11 = vmul.f32 %v1959_v46, %v1959_v46 }
 0x210   : > { %v1250_v3 = vsel %vm475_vm1, %v1199_v59, 0.0  ;;  %v1249_v8 = vadd.f32 %v1248_v4, %v1247_v63  ;;  %v1149_v12 = vsel %vm475_vm1, %v1064_v61, 0.0  ;;  %v1200_v13 = vmul.f32 %v1064_v61, %v1064_v61 }
 0x211   : > { %v1469_v9 = vadd.f32 %v1468_v2, %v1403_v40  ;;  %v1538_v10 = vadd.f32 %v1537_v0, %v1507_v57  ;;  %v1509_v14 = vmul.f32 %v1406_v62, %v1406_v62  ;;  %v1150_v18 = vadd.f32 %v1149_v12, %v1148_v7 }
 0x212   : > { %v1251_v15 = vadd.f32 %v1250_v3, %v1249_v8  ;;  %v1254_v21 = vsel %vm475_vm1, %v1201_v6, 0.0  ;;  %v1153_v22 = vsel %vm475_vm1, %v1926_v55, 0.0  ;;  %v1202_v23 = vmul.f32 %v1926_v55, %v1926_v55 }
 0x213   : > { %v1539_v17 = vadd.f32 %v1538_v10, %v1508_v60  ;;  %v1470_v16 = vadd.f32 %v1469_v9, %v1406_v62  ;;  %v1252_v24 = vsel %vm475_vm1, %v1200_v13, 0.0  ;;  %v1152_v27 = vadd.f32 %v1151_v5, %v1150_v18 }
 0x214   : > { %v1929_v19 = vpop.f32.mrb[28].mxu0  ;;  %v1963_v20 = vpop.f32.mrb[28].mxu1  ;;  %v1253_v28 = vadd.f32 %v1252_v24, %v1251_v15  ;;  %v1511_v33 = vmul.f32 %v1960_v41, %v1960_v41  ;;  %v1256_v45 = vsel %vm475_vm1, %v1202_v23, 0.0 }
 0x215   : > { %v1077_v25 = vpop.f32.mrb[29].mxu0  ;;  %v1419_v26 = vpop.f32.mrb[29].mxu1  ;;  %v1471_v29 = vadd.f32 %v1959_v46, %v1470_v16  ;;  %v1540_v30 = vadd.f32 %v1539_v17, %v1509_v14  ;;  %v1154_v43 = vadd.f32 %v1153_v22, %v1152_v27  ;;  %v1159_v47 = vsel %vm475_vm1, %v1929_v19, 0.0 }
 0x216   : > { %v1930_v31 = vpop.f32.mrb[30].mxu0  ;;  %v1964_v32 = vpop.f32.mrb[30].mxu1  ;;  %v1155_v34 = vsel %vm475_vm1, %v1077_v25, 0.0  ;;  %v1203_v35 = vmul.f32 %v1077_v25, %v1077_v25  ;;  %v1512_v36 = vmul.f32 %v1419_v26, %v1419_v26  ;;  %v1255_v39 = vadd.f32 %v1254_v21, %v1253_v28 }
 0x217   : > { %v1080_v37 = vpop.f32.mrb[31].mxu0  ;;  %v1422_v38 = vpop.f32.mrb[31].mxu1  ;;  %v1541_v42 = vadd.f32 %v1540_v30, %v1510_v11  ;;  %v1472_v44 = vadd.f32 %v1960_v41, %v1471_v29  ;;  %v1205_v48 = vmul.f32 %v1929_v19, %v1929_v19  ;;  %v1156_v49 = vadd.f32 %v1155_v34, %v1154_v43 }
 0x218   : > { %v1258_v46 = vsel %vm475_vm1, %v1203_v35, 0.0  ;;  %v1257_v50 = vadd.f32 %v1256_v45, %v1255_v39  ;;  %v1514_v52 = vmul.f32 %v1963_v20, %v1963_v20  ;;  %v1157_v53 = vsel %vm475_vm1, %v1080_v37, 0.0 }
 0x219   : > { %v1473_v51 = vadd.f32 %v1472_v44, %v1419_v26  ;;  %v1542_v40 = vadd.f32 %v1541_v42, %v1511_v33  ;;  %v1204_v54 = vmul.f32 %v1080_v37, %v1080_v37  ;;  %v1513_v56 = vmul.f32 %v1422_v38, %v1422_v38 }
 0x21a   : > { %v1259_v55 = vadd.f32 %v1258_v46, %v1257_v50  ;;  %v1158_v58 = vadd.f32 %v1157_v53, %v1156_v49  ;;  %v1262_v61 = vsel %vm475_vm1, %v1205_v48, 0.0  ;;  %v1161_v62 = vsel %vm475_vm1, %v1930_v31, 0.0 }
 0x21b   : > { %v1543_v57 = vadd.f32 %v1542_v40, %v1512_v36  ;;  %v1474_v41 = vadd.f32 %v1473_v51, %v1422_v38  ;;  %v1206_v63 = vmul.f32 %v1930_v31, %v1930_v31  ;;  %v1260_v0 = vsel %vm475_vm1, %v1204_v54, 0.0 }
 0x21c   : > { %v1933_v59 = vpop.f32.mrb[32].mxu0  ;;  %v1967_v60 = vpop.f32.mrb[32].mxu1  ;;  %v1160_v4 = vadd.f32 %v1159_v47, %v1158_v58  ;;  %v1261_v5 = vadd.f32 %v1260_v0, %v1259_v55  ;;  %v1515_v9 = vmul.f32 %v1964_v32, %v1964_v32 }
 0x21d   : > { %v1093_v1 = vpop.f32.mrb[33].mxu0  ;;  %v1435_v2 = vpop.f32.mrb[33].mxu1  ;;  %v1475_v6 = vadd.f32 %v1963_v20, %v1474_v41  ;;  %v1544_v3 = vadd.f32 %v1543_v57, %v1513_v56  ;;  %v1264_v19 = vsel %vm475_vm1, %v1206_v63, 0.0  ;;  %v1209_v25 = vmul.f32 %v1933_v59, %v1933_v59 }
 0x21e   : > { %v1934_v7 = vpop.f32.mrb[34].mxu0  ;;  %v1968_v8 = vpop.f32.mrb[34].mxu1  ;;  %v1163_v10 = vsel %vm475_vm1, %v1093_v1, 0.0  ;;  %v1207_v11 = vmul.f32 %v1093_v1, %v1093_v1  ;;  %v1516_v12 = vmul.f32 %v1435_v2, %v1435_v2  ;;  %v1263_v15 = vadd.f32 %v1262_v61, %v1261_v5 }
 0x21f   : > { %v1096_v13 = vpop.f32.mrb[35].mxu0  ;;  %v1438_v14 = vpop.f32.mrb[35].mxu1  ;;  %v1545_v17 = vadd.f32 %v1544_v3, %v1514_v52  ;;  %v1162_v18 = vadd.f32 %v1161_v62, %v1160_v4  ;;  %v1476_v16 = vadd.f32 %v1964_v32, %v1475_v6  ;;  %v1167_v34 = vsel %vm475_vm1, %v1933_v59, 0.0 }
 0x220   : > { %v1266_v21 = vsel %vm475_vm1, %v1207_v11, 0.0  ;;  %v1265_v20 = vadd.f32 %v1264_v19, %v1263_v15  ;;  %v1165_v26 = vsel %vm475_vm1, %v1096_v13, 0.0  ;;  %v1208_v27 = vmul.f32 %v1096_v13, %v1096_v13 }
 0x221   : > { %v1164_v22 = vadd.f32 %v1163_v10, %v1162_v18  ;;  %v1477_v23 = vadd.f32 %v1476_v16, %v1435_v2  ;;  %v1546_v24 = vadd.f32 %v1545_v17, %v1515_v9  ;;  %v1517_v28 = vmul.f32 %v1438_v14, %v1438_v14 }
 0x222   : > { %v1267_v29 = vadd.f32 %v1266_v21, %v1265_v20  ;;  %v1518_v32 = vmul.f32 %v1967_v60, %v1967_v60  ;;  %v1210_v35 = vmul.f32 %v1934_v7, %v1934_v7  ;;  %v1268_v36 = vsel %vm475_vm1, %v1208_v27, 0.0 }
 0x223   : > { %v1547_v30 = vadd.f32 %v1546_v24, %v1516_v12  ;;  %v1166_v31 = vadd.f32 %v1165_v26, %v1164_v22  ;;  %v1478_v33 = vadd.f32 %v1477_v23, %v1438_v14  ;;  %v1270_v43 = vsel %vm475_vm1, %v1209_v25, 0.0 }
 0x224   : > { %v1269_v38 = vadd.f32 %v1268_v36, %v1267_v29  ;;  %v1169_v44 = vsel %vm475_vm1, %v1934_v7, 0.0  ;;  %v1519_v45 = vmul.f32 %v1968_v8, %v1968_v8  ;;  %v1272_v50 = vsel %vm475_vm1, %v1210_v35, 0.0 }
 0x225   : > { %v1168_v37 = vadd.f32 %v1167_v34, %v1166_v31  ;;  %v1479_v39 = vadd.f32 %v1967_v60, %v1478_v33  ;;  %v1548_v42 = vadd.f32 %v1547_v30, %v1517_v28 }
 0x226   : > { %v1271_v48 = vadd.f32 %v1270_v43, %v1269_v38 }
 0x227   : > { %v1170_v47 = vadd.f32 %v1169_v44, %v1168_v37  ;;  %v1480_v46 = vadd.f32 %v1968_v8, %v1479_v39  ;;  %v1549_v49 = vadd.f32 %v1548_v42, %v1518_v32 }
 0x228   : > { %v1273_v40 = vadd.f32 %v1272_v50, %v1271_v48 }
 0x229   : > { %v1171_v51 = vrot.slane %v1170_v47, 4  ;;  %v1481_v52 = vrot.slane %v1480_v46, 4  ;;  %v1550_v53 = vadd.f32 %v1549_v49, %v1519_v45 }
 0x22a   : > { %v1274_v56 = vrot.slane %v1273_v40, 4 }
 0x22b   : > { %v1172_v54 = vadd.f32 %v1171_v51, %v1170_v47  ;;  %v1482_v55 = vadd.f32 %v1481_v52, %v1480_v46  ;;  %v1551_v57 = vrot.slane %v1550_v53, 4 }
 0x22c   : > { %v1275_v41 = vadd.f32 %v1274_v56, %v1273_v40 }
 0x22d   : > { %v1173_v58 = vrot.slane %v1172_v54, 2  ;;  %v1483_v59 = vrot.slane %v1482_v55, 2  ;;  %v1552_v60 = vadd.f32 %v1551_v57, %v1550_v53 }
 0x22e   : > { %v1276_v62 = vrot.slane %v1275_v41, 2 }
 0x22f   : > { %v1174_v61 = vadd.f32 %v1173_v58, %v1172_v54  ;;  %v1484_v63 = vadd.f32 %v1483_v59, %v1482_v55  ;;  %v1553_v0 = vrot.slane %v1552_v60, 2 }
 0x230   : > { %v1277_v2 = vadd.f32 %v1276_v62, %v1275_v41 }
 0x231   : > { %v1175_v1 = vrot.slane %v1174_v61, 1  ;;  %v1485_v4 = vrot.slane %v1484_v63, 1  ;;  %v1554_v5 = vadd.f32 %v1553_v0, %v1552_v60 }
 0x232   : > { %v1278_v3 = vrot.slane %v1277_v2, 1 }
 0x233   : > { %v1176_v6 = vadd.f32 %v1175_v1, %v1174_v61  ;;  %v1486_v7 = vadd.f32 %v1485_v4, %v1484_v63  ;;  %v1555_v8 = vrot.slane %v1554_v5, 1 }
 0x234   : > { %v1279_v9 = vadd.f32 %v1278_v3, %v1277_v2 }
 0x235   : > { %1178 = vst.msk [vmem:[%s451_s28] sm:$0x1] %vm1177_vm4, %v1176_v6  ;;  %1487 = vst [vmem:[%s457_s13] sm:$0x1] %v1486_v7  ;;  %v1556_v10 = vadd.f32 %v1555_v8, %v1554_v5 }
 0x236   : > { %1280 = vst.msk [vmem:[%s454_s16] sm:$0x1] %vm1177_vm4, %v1279_v9 }
 0x237   : > { %1557 = vst [vmem:[%s460_s19] sm:$0x1] %v1556_v10 }
 0x238 PF: > { %s23_s21 = sadd.s32 1, %s2004_s21  }
 0x239   : > { %p20_p4 = scmp.ge.s32.totalorder %s23_s21, 4  }
 0x23b   :  { %22 = sbr.rel (!%p20_p4) target bundleno = 1 (0x1), region = 133 }

// kernel: bottleneck_time_emb_forward.7
= control target key start
LH: loop header
LB: loop body
LE: loop exit
PB: predicated region body
PF: predicated region fallthrough
CT: control target
= control target key end

     0   :  { %15 = vsyncpa [#allocation3], 0  ;;  %s2349_s0 = inlined_call_operand.vmem [shape: bf16[2,256,32], index: 0, kind: input, shape index: {}]   ;;  %s2350_s1 = inlined_call_operand.vmem [shape: bf16[2,256,16], index: 1, kind: input, shape index: {}]   ;;  %s2351_s2 = inlined_call_operand.vmem [shape: f32[1,32], index: 2, kind: input, shape index: {}]   ;;  %s2352_s3 = inlined_call_operand.vmem [shape: f32[1,32], index: 3, kind: input, shape index: {}]   ;;  %s2353_s4 = inlined_call_operand.vmem [shape: bf16[32,128], index: 4, kind: input, shape index: {}]   ;;  %s2354_s5 = inlined_call_operand.vmem [shape: f32[1,128], index: 5, kind: input, shape index: {}]   ;;  %s2355_s6 = inlined_call_operand.vmem [shape: f32[1,128], index: 6, kind: input, shape index: {}]   ;;  %s2356_s7 = inlined_call_operand.vmem [shape: bf16[16,128], index: 7, kind: input, shape index: {}]   ;;  %s2357_s8 = inlined_call_operand.vmem [shape: f32[1,128], index: 8, kind: input, shape index: {}]   ;;  %s2358_s9 = inlined_call_operand.vmem [shape: f32[1,128], index: 9, kind: input, shape index: {}]   ;;  %s2359_s10 = inlined_call_operand.hbm [shape: f32[2,256,128], index: 10, kind: output, shape index: {}]  }
   0x1   :  { %17 = vsyncpa [#allocation3 + $0x1], 0  ;;  %s1905_s13 = smov 0   ;;  %s1907_s14 = smov 0  }
   0x2   :  { %s1909_s15 = smov 0   ;;  %s1911_s16 = smov 0  }
   0x3 LB: > { %s1926_s17 = sadd.s32 4294967295, %s1845_s16   ;;  %s1465_s18 = sadd.s32 4294967294, %s1845_s16   ;;  %s1845_s16 = sphi %s1911_s16, %s2365_s16   ;;  %s1841_s15 = sphi %s1909_s15, %s2364_s15   ;;  %s1837_s14 = sphi %s1907_s14, %s2363_s14   ;;  %s1833_s13 = sphi %s1905_s13, %s2362_s13  }
   0x4   : > { %s1930_s19 = sadd.s32 1, %s1845_s16   ;;  %s250_s20 = sadd.s32 1, %s1841_s15 }
   0x5   : > { %s247_s21 = ssub.s32 %s1845_s16, %s1930_s19  ;;  %p260_p0 = scmp.ne.s32.totalorder %s1841_s15, %s1837_s14 }
   0x6   : > { %p248_p1 = scmp.eq.s32.totalorder %s247_s21, 0  ;;  %p261_p2 = scmp.eq.s32.totalorder %s1926_s17, 1 }
   0x7   : > { %p266_p3 = scmp.ne.s32.totalorder %s1837_s14, %s1833_s13  ;;  %p267_p4 = scmp.eq.s32.totalorder %s1465_s18, 1 }
   0x8   : > { %s1941_s22 = scalar_select %p248_p1, %s1841_s15, %s250_s20  }
   0x9   : > { %p1943_p5 = por %p261_p2, %p260_p0  ;;  %p1947_p6 = por %p267_p4, %p266_p3 }
   0xa   : > { %p1468_p7 = scmp.ge.s32.totalorder %s1845_s16, 1  ;;  %p325_p8 = scmp.lt.s32.totalorder %s1845_s16, 3 }
   0xc   : > { %p326_p9 = pnand %p1468_p7, %p325_p8 }
   0xd   : > { %v1764_v0 = vld [vmem:[%s2353_s4] sm:$0xff] (!%p326_p9)   ;;  %p368_p10 = scmp.lt.s32.totalorder (!%p326_p9), %s1926_s17, 1  ;;  %v1766_v2 = vld [vmem:[%s2353_s4 + $0x8] sm:$0xff] (!%p326_p9)   ;;  %vm993_vm0 = vcmask (!%p326_p9), 130048   ;;  %vm585_vm1 = vcmask (!%p326_p9), 261120   ;;  %s1847_s28 = smov (!%p326_p9), [#allocation2]  }
   0xe   : > { %329 = sbr.rel (%p326_p9) target bundleno = 332 (0x14c), region = 60  ;;  %v1765_v1 = vld [vmem:[%s2356_s7] sm:$0xff] (!%p326_p9)   ;;  %1653 = vmatprep.subr.bf16.mxu0 (!%p326_p9), %v1764_v0  ;;  %s1787_s29 = sshll.u32 (!%p326_p9), %s1847_s28, 4  ;;  %s1788_s29 = int_to_ptr.vmem [resolvable:$false] %s1787_s29 }
   0xf   : > { %1654 = vmatpush3.bf16.msra.mxu0 (!%p326_p9), %v1764_v0  ;;  %1689 = vmatprep.subr.bf16.mxu1 (!%p326_p9), %v1765_v1  ;;  %v1978_v4 = vld [vmem:[%s2351_s2] ss:$0 sm:$0xff] (!%p326_p9) }
  0x10   : > { %1690 = vmatpush3.bf16.msra.mxu1 (!%p326_p9), %v1765_v1  ;;  %1655 = vmatprep.subr.bf16.mxu0 (!%p326_p9), %v1766_v2  ;;  %v1989_v13 = vld [vmem:[%s2352_s3] ss:$0 sm:$0xff] (!%p326_p9) }
  0x13   : > { %1656 = vmatpush3.bf16.msra.mxu0 (!%p326_p9), %v1766_v2 }
  0x15   : > { %s369_s11 = scalar_select %p368_p10, %s1926_s17, 1 }
  0x17   : > { %s1536_s12 = sshll.u32 %s369_s11, 7 }
  0x18   : > { %s1967_s21 = scalar_lea.vmem %s2350_s1, %s1536_s12  ;;  %s1972_s27 = scalar_lea.vmem %s2349_s0, %s1536_s12 }
  0x19   : > { %v1767_v3 = vld [vmem:[%s1967_s21] sm:$0xff]   ;;  %v1768_v5 = vld [vmem:[%s1967_s21 + $0x8] sm:$0xff]   ;;  %v1769_v12 = vld [vmem:[%s1967_s21 + $0x10] sm:$0xff]   ;;  %s1538_s12 = sshll.u32 %s1926_s17, 12 }
  0x1a   : > { %1691 = vmatprep.mubr.msk.bf16.mxu1 %vm993_vm0, %v1767_v3  ;;  %v1540_v6 = vld [vmem:[%s1972_s27] sm:$0xff]   ;;  %v1603_v7 = vld [vmem:[%s1972_s27 + $0x8] sm:$0xff]   ;;  %v1604_v14 = vld [vmem:[%s1972_s27 + $0x10] sm:$0xff]   ;;  %s2299_s25 = scalar_lea.hbm %s2359_s10, %s1538_s12 }
  0x1b   : > { %1692 = vmatmul.mubr.msk.bf16.vlgmr.msra.gmra.mrb[0].mxu1 %vm993_vm0, %v1768_v5  ;;  %v1541_v8 = vunpack.c.l.bf16 %v1540_v6  ;;  %v1542_v9 = vunpack.c.h.bf16 %v1540_v6  ;;  %v1545_v10 = vunpack.c.l.bf16 %v1603_v7  ;;  %v1546_v11 = vunpack.c.h.bf16 %v1603_v7  ;;  %v1605_v19 = vld [vmem:[%s1972_s27 + $0x18] sm:$0xff]   ;;  %v1771_v29 = vld [vmem:[%s1967_s21 + $0x20] sm:$0xff]   ;;  %v1607_v43 = vld [vmem:[%s1972_s27 + $0x28] sm:$0xff]  }
  0x1c   : > { %1695 = vmatprep.mubr.msk.bf16.mxu1 %vm993_vm0, %v1769_v12  ;;  %v1549_v20 = vunpack.c.l.bf16 %v1604_v14  ;;  %v1550_v21 = vunpack.c.h.bf16 %v1604_v14  ;;  %v1553_v22 = vunpack.c.l.bf16 %v1605_v19  ;;  %v1554_v23 = vunpack.c.h.bf16 %v1605_v19  ;;  %v1770_v28 = vld [vmem:[%s1967_s21 + $0x18] sm:$0xff]   ;;  %v1606_v34 = vld [vmem:[%s1972_s27 + $0x20] sm:$0xff]   ;;  %v1608_v48 = vld [vmem:[%s1972_s27 + $0x30] sm:$0xff]  }
  0x1d   : > { %v450_v15 = vmul.f32 %v1541_v8, %v1978_v4  ;;  %v451_v16 = vmul.f32 %v1542_v9, %v1978_v4  ;;  %v452_v17 = vmul.f32 %v1545_v10, %v1978_v4  ;;  %v453_v18 = vmul.f32 %v1546_v11, %v1978_v4  ;;  %v1609_v60 = vld [vmem:[%s1972_s27 + $0x38] sm:$0xff]   ;;  %v1772_v61 = vld [vmem:[%s1967_s21 + $0x28] sm:$0xff]   ;;  %v1773_v3 = vld [vmem:[%s1967_s21 + $0x30] sm:$0xff]  }
  0x1e   : > { %v454_v30 = vmul.f32 %v1549_v20, %v1978_v4  ;;  %v455_v31 = vmul.f32 %v1550_v21, %v1978_v4  ;;  %v456_v32 = vmul.f32 %v1553_v22, %v1978_v4  ;;  %v457_v33 = vmul.f32 %v1554_v23, %v1978_v4  ;;  %v1610_v7 = vld [vmem:[%s1972_s27 + $0x40] sm:$0xff]  }
  0x1f   : > { %v489_v24 = vadd.f32 %v1989_v13, %v450_v15  ;;  %v490_v25 = vadd.f32 %v1989_v13, %v451_v16  ;;  %v491_v26 = vadd.f32 %v1989_v13, %v452_v17  ;;  %v492_v27 = vadd.f32 %v1989_v13, %v453_v18 }
  0x20   : > { %v493_v39 = vadd.f32 %v1989_v13, %v454_v30  ;;  %v494_v40 = vadd.f32 %v1989_v13, %v455_v31  ;;  %v495_v41 = vadd.f32 %v1989_v13, %v456_v32  ;;  %v496_v42 = vadd.f32 %v1989_v13, %v457_v33  ;;  %v1775_v30 = vld [vmem:[%s1967_s21 + $0x40] sm:$0xff]   ;;  %v1612_v31 = vld [vmem:[%s1972_s27 + $0x50] sm:$0xff]  }
  0x21   : > { %v521_v35 = vmax.f32 %v489_v24, 0.0  ;;  %v522_v36 = vmax.f32 %v490_v25, 0.0  ;;  %v523_v37 = vmax.f32 %v491_v26, 0.0  ;;  %v524_v38 = vmax.f32 %v492_v27, 0.0  ;;  %v1774_v26 = vld [vmem:[%s1967_s21 + $0x38] sm:$0xff]  }
  0x22   : > { %v1557_v46 = vunpack.c.l.bf16 %v1606_v34  ;;  %v1558_v47 = vunpack.c.h.bf16 %v1606_v34  ;;  %v525_v49 = vmax.f32 %v493_v39, 0.0  ;;  %v526_v50 = vmax.f32 %v494_v40, 0.0 }
  0x23   : > { %v557_v44 = vpack.c.bf16 %v522_v36, %v521_v35  ;;  %v558_v45 = vpack.c.bf16 %v524_v38, %v523_v37  ;;  %1696 = vmatmul.mubr.msk.bf16.gmra.mrb[4].mxu1 %vm993_vm0, %v1770_v28  ;;  %v527_v51 = vmax.f32 %v495_v41, 0.0  ;;  %v528_v52 = vmax.f32 %v496_v42, 0.0 }
  0x24   : > { %1699 = vmatprep.mubr.msk.bf16.mxu1 %vm993_vm0, %v1771_v29  ;;  %v458_v53 = vmul.f32 %v1557_v46, %v1978_v4  ;;  %v459_v54 = vmul.f32 %v1558_v47, %v1978_v4  ;;  %v1561_v55 = vunpack.c.l.bf16 %v1607_v43  ;;  %v1562_v56 = vunpack.c.h.bf16 %v1607_v43  ;;  %v1611_v29 = vld [vmem:[%s1972_s27 + $0x48] sm:$0xff]   ;;  %v1613_v46 = vld [vmem:[%s1972_s27 + $0x58] sm:$0xff]  }
  0x25   : > { %1657 = vmatprep.mubr.msk.bf16.mxu0 %vm585_vm1, %v557_v44  ;;  %v559_v57 = vpack.c.bf16 %v526_v50, %v525_v49  ;;  %v1565_v58 = vunpack.c.l.bf16 %v1608_v48  ;;  %v1566_v59 = vunpack.c.h.bf16 %v1608_v48  ;;  %v560_v2 = vpack.c.bf16 %v528_v52, %v527_v51  ;;  %v1776_v47 = vld [vmem:[%s1967_s21 + $0x48] sm:$0xff]   ;;  %v1614_v52 = vld [vmem:[%s1972_s27 + $0x60] sm:$0xff]  }
  0x26   : > { %1658 = vmatmul.mubr.msk.bf16.vlgmr.msra.gmra.mrb[0].mxu0 %vm585_vm1, %v558_v45  ;;  %v497_v62 = vadd.f32 %v1989_v13, %v458_v53  ;;  %v498_v63 = vadd.f32 %v1989_v13, %v459_v54  ;;  %v460_v0 = vmul.f32 %v1561_v55, %v1978_v4  ;;  %v461_v1 = vmul.f32 %v1562_v56, %v1978_v4  ;;  %v1777_v53 = vld [vmem:[%s1967_s21 + $0x50] sm:$0xff]  }
  0x27   : > { %1661 = vmatprep.mubr.msk.bf16.mxu0 %vm585_vm1, %v559_v57  ;;  %v462_v5 = vmul.f32 %v1565_v58, %v1978_v4  ;;  %v463_v6 = vmul.f32 %v1566_v59, %v1978_v4  ;;  %v1569_v10 = vunpack.c.l.bf16 %v1609_v60  ;;  %v1570_v11 = vunpack.c.h.bf16 %v1609_v60 }
  0x28   : > { %v529_v8 = vmax.f32 %v497_v62, 0.0  ;;  %v530_v9 = vmax.f32 %v498_v63, 0.0  ;;  %v499_v12 = vadd.f32 %v1989_v13, %v460_v0  ;;  %v500_v14 = vadd.f32 %v1989_v13, %v461_v1 }
  0x29   : > { %v501_v15 = vadd.f32 %v1989_v13, %v462_v5  ;;  %v502_v16 = vadd.f32 %v1989_v13, %v463_v6  ;;  %v1573_v18 = vunpack.c.l.bf16 %v1610_v7  ;;  %v464_v19 = vmul.f32 %v1569_v10, %v1978_v4  ;;  %v1778_v6 = vld [vmem:[%s1967_s21 + $0x58] sm:$0xff]   ;;  %v1615_v10 = vld [vmem:[%s1972_s27 + $0x68] sm:$0xff]  }
  0x2a   : > { %v561_v17 = vpack.c.bf16 %v530_v9, %v529_v8  ;;  %v465_v20 = vmul.f32 %v1570_v11, %v1978_v4  ;;  %v1574_v21 = vunpack.c.h.bf16 %v1610_v7  ;;  %v531_v22 = vmax.f32 %v499_v12, 0.0  ;;  %v1779_v11 = vld [vmem:[%s1967_s21 + $0x60] sm:$0xff]   ;;  %v1616_v12 = vld [vmem:[%s1972_s27 + $0x70] sm:$0xff]  }
  0x2b   : > { %1700 = vmatmul.mubr.msk.bf16.gmra.mrb[8].mxu1 %vm993_vm0, %v1772_v61  ;;  %v532_v23 = vmax.f32 %v500_v14, 0.0  ;;  %v533_v24 = vmax.f32 %v501_v15, 0.0  ;;  %v534_v25 = vmax.f32 %v502_v16, 0.0  ;;  %v466_v27 = vmul.f32 %v1573_v18, %v1978_v4 }
  0x2c   : > { %1703 = vmatprep.mubr.msk.bf16.mxu1 %vm993_vm0, %v1773_v3  ;;  %v467_v28 = vmul.f32 %v1574_v21, %v1978_v4  ;;  %v503_v32 = vadd.f32 %v1989_v13, %v464_v19  ;;  %v504_v33 = vadd.f32 %v1989_v13, %v465_v20  ;;  %v1577_v36 = vunpack.c.l.bf16 %v1611_v29 }
  0x2d   : > { %v562_v34 = vpack.c.bf16 %v532_v23, %v531_v22  ;;  %v563_v35 = vpack.c.bf16 %v534_v25, %v533_v24  ;;  %v1578_v37 = vunpack.c.h.bf16 %v1611_v29  ;;  %v505_v38 = vadd.f32 %v1989_v13, %v466_v27 }
  0x2e   : > { %1662 = vmatmul.mubr.msk.bf16.gmra.mrb[4].mxu0 %vm585_vm1, %v560_v2  ;;  %v506_v39 = vadd.f32 %v1989_v13, %v467_v28  ;;  %v1581_v40 = vunpack.c.l.bf16 %v1612_v31  ;;  %v1582_v41 = vunpack.c.h.bf16 %v1612_v31  ;;  %v535_v42 = vmax.f32 %v503_v32, 0.0  ;;  %v1780_v28 = vld [vmem:[%s1967_s21 + $0x68] sm:$0xff]  }
  0x2f   : > { %1665 = vmatprep.mubr.msk.bf16.mxu0 %vm585_vm1, %v561_v17  ;;  %v536_v43 = vmax.f32 %v504_v33, 0.0  ;;  %v468_v44 = vmul.f32 %v1577_v36, %v1978_v4  ;;  %v469_v45 = vmul.f32 %v1578_v37, %v1978_v4  ;;  %v537_v48 = vmax.f32 %v505_v38, 0.0  ;;  %v1617_v33 = vld [vmem:[%s1972_s27 + $0x78] sm:$0xff]   ;;  %s365_s27 = sand.u32 1, %s1837_s14  }
  0x30   : > { %v538_v49 = vmax.f32 %v506_v39, 0.0  ;;  %v470_v50 = vmul.f32 %v1581_v40, %v1978_v4  ;;  %v471_v51 = vmul.f32 %v1582_v41, %v1978_v4  ;;  %v1585_v54 = vunpack.c.l.bf16 %v1613_v46  ;;  %s1469_s30 = sshll.u32 %s365_s27, 8  ;;  %s2308_s17 = scalar_lea.sflag [#allocation3], %s365_s27 }
  0x31   : > { %v1586_v55 = vunpack.c.h.bf16 %v1613_v46  ;;  %v564_v56 = vpack.c.bf16 %v536_v43, %v535_v42  ;;  %v507_v57 = vadd.f32 %v1989_v13, %v468_v44  ;;  %v508_v58 = vadd.f32 %v1989_v13, %v469_v45  ;;  %s2153_s11 = scalar_lea.vmem [#allocation2], %s1469_s30  ;;  %s1789_s30 = scalar_lea.vmem %s1788_s29, 8192 }
  0x32   : > { %v1589_v59 = vunpack.c.l.bf16 %v1614_v52  ;;  %v565_v60 = vpack.c.bf16 %v538_v49, %v537_v48  ;;  %v509_v61 = vadd.f32 %v1989_v13, %v470_v50  ;;  %v510_v62 = vadd.f32 %v1989_v13, %v471_v51  ;;  %s1391_s18 = sshll.u32 %s2153_s11, 4  ;;  %s2301_s18 = int_to_ptr.vmem [resolvable:$true] %s1391_s18 }
  0x33   : > { %1704 = vmatmul.mubr.msk.bf16.gmra.mrb[12].mxu1 %vm993_vm0, %v1774_v26  ;;  %v1590_v63 = vunpack.c.h.bf16 %v1614_v52  ;;  %v472_v0 = vmul.f32 %v1585_v54, %v1978_v4  ;;  %v473_v1 = vmul.f32 %v1586_v55, %v1978_v4  ;;  %v539_v2 = vmax.f32 %v507_v57, 0.0  ;;  %s1783_s26 = scalar_lea.vmem %s2301_s18, 4096  ;;  %p1790_p0 = scmp.lt.s32.totalorder %s2301_s18, %s1788_s29 }
  0x34   : > { %1707 = vmatprep.mubr.msk.bf16.mxu1 %vm993_vm0, %v1775_v30  ;;  %v540_v3 = vmax.f32 %v508_v58, 0.0  ;;  %v474_v5 = vmul.f32 %v1589_v59, %v1978_v4  ;;  %v541_v7 = vmax.f32 %v509_v61, 0.0  ;;  %v542_v8 = vmax.f32 %v510_v62, 0.0  ;;  %v2121_v62 = vld [vmem:[%s2358_s9] ss:$0 sm:$0xff]  ;;  %p1784_p11 = scmp.ne.s32.totalorder %s2301_s18, %s1783_s26  ;;  %p1791_p1 = scmp.lt.s32.totalorder %s1789_s30, %s1783_s26 }
  0x35   : > { %v475_v9 = vmul.f32 %v1590_v63, %v1978_v4  ;;  %v511_v14 = vadd.f32 %v1989_v13, %v472_v0  ;;  %v512_v15 = vadd.f32 %v1989_v13, %v473_v1  ;;  %v1593_v18 = vunpack.c.l.bf16 %v1615_v10  ;;  %v2127_v0 = vld [vmem:[%s2354_s5] ss:$0 sm:$0xff] }
  0x36   : > { %1666 = vmatmul.mubr.msk.bf16.gmra.mrb[8].mxu0 %vm585_vm1, %v562_v34  ;;  %v566_v16 = vpack.c.bf16 %v540_v3, %v539_v2  ;;  %v513_v17 = vadd.f32 %v1989_v13, %v474_v5  ;;  %v1594_v19 = vunpack.c.h.bf16 %v1615_v10  ;;  %v567_v20 = vpack.c.bf16 %v542_v8, %v541_v7  ;;  %v1781_v34 = vld [vmem:[%s1967_s21 + $0x70] sm:$0xff]   ;;  %v2133_v5 = vld [vmem:[%s2355_s6] ss:$0 sm:$0xff]  ;;  %p1785_p12 = pnand %p1784_p11, %p1943_p5  ;;  %p1792_p2 = por %p1791_p1, %p1790_p0 }
  0x37   : > { %1669 = vmatprep.mubr.msk.bf16.mxu0 %vm585_vm1, %v563_v35  ;;  %v514_v21 = vadd.f32 %v1989_v13, %v475_v9  ;;  %v1597_v22 = vunpack.c.l.bf16 %v1616_v12  ;;  %v1598_v23 = vunpack.c.h.bf16 %v1616_v12  ;;  %v543_v24 = vmax.f32 %v511_v14, 0.0 }
  0x38   : > { %v544_v25 = vmax.f32 %v512_v15, 0.0  ;;  %v476_v26 = vmul.f32 %v1593_v18, %v1978_v4  ;;  %v477_v27 = vmul.f32 %v1594_v19, %v1978_v4  ;;  %v545_v29 = vmax.f32 %v513_v17, 0.0  ;;  %p1786_p13 = pneg %p1785_p12 }
  0x39   : > { %v546_v30 = vmax.f32 %v514_v21, 0.0  ;;  %v478_v31 = vmul.f32 %v1597_v22, %v1978_v4  ;;  %v479_v32 = vmul.f32 %v1598_v23, %v1978_v4  ;;  %v1601_v38 = vunpack.c.l.bf16 %v1617_v33 }
  0x3a   : > { %v568_v35 = vpack.c.bf16 %v544_v25, %v543_v24  ;;  %v515_v36 = vadd.f32 %v1989_v13, %v476_v26  ;;  %v516_v37 = vadd.f32 %v1989_v13, %v477_v27  ;;  %v1602_v39 = vunpack.c.h.bf16 %v1617_v33  ;;  %p1793_p3 = pnand %p1792_p2, %p1786_p13 }
  0x3b   : > { %1708 = vmatmul.mubr.msk.bf16.gmra.mrb[16].mxu1 %vm993_vm0, %v1776_v47  ;;  %v569_v40 = vpack.c.bf16 %v546_v30, %v545_v29  ;;  %v517_v41 = vadd.f32 %v1989_v13, %v478_v31  ;;  %v518_v42 = vadd.f32 %v1989_v13, %v479_v32  ;;  %v480_v45 = vmul.f32 %v1601_v38, %v1978_v4  ;;  %v1782_v47 = vld [vmem:[%s1967_s21 + $0x78] sm:$0xff]  }
  0x3c   : > { %1711 = vmatprep.mubr.msk.bf16.mxu1 %vm993_vm0, %v1777_v53  ;;  %v547_v43 = vmax.f32 %v515_v36, 0.0  ;;  %v548_v44 = vmax.f32 %v516_v37, 0.0  ;;  %v481_v46 = vmul.f32 %v1602_v39, %v1978_v4 }
  0x3d   : > { %v549_v48 = vmax.f32 %v517_v41, 0.0  ;;  %v550_v49 = vmax.f32 %v518_v42, 0.0  ;;  %v519_v51 = vadd.f32 %v1989_v13, %v480_v45 }
  0x3e   : > { %1670 = vmatmul.mubr.msk.bf16.gmra.mrb[12].mxu0 %vm585_vm1, %v564_v56  ;;  %v570_v50 = vpack.c.bf16 %v548_v44, %v547_v43  ;;  %v520_v52 = vadd.f32 %v1989_v13, %v481_v46  ;;  %v2115_v13 = vld [vmem:[%s2357_s8] ss:$0 sm:$0xff] }
  0x3f   : > { %1673 = vmatprep.mubr.msk.bf16.mxu0 %vm585_vm1, %v565_v60  ;;  %v571_v53 = vpack.c.bf16 %v550_v49, %v549_v48  ;;  %v551_v54 = vmax.f32 %v519_v51, 0.0 }
  0x40   : > { %v552_v55 = vmax.f32 %v520_v52, 0.0 }
  0x42   : > { %v572_v4 = vpack.c.bf16 %v552_v55, %v551_v54 }
  0x43   : > { %1712 = vmatmul.mubr.msk.bf16.gmra.mrb[20].mxu1 %vm993_vm0, %v1778_v6 }
  0x44   : > { %1715 = vmatprep.mubr.msk.bf16.mxu1 %vm993_vm0, %v1779_v11 }
  0x46   : > { %1674 = vmatmul.mubr.msk.bf16.gmra.mrb[16].mxu0 %vm585_vm1, %v566_v16 }
  0x47   : > { %1677 = vmatprep.mubr.msk.bf16.mxu0 %vm585_vm1, %v567_v20 }
  0x4b   : > { %1716 = vmatmul.mubr.msk.bf16.gmra.mrb[24].mxu1 %vm993_vm0, %v1780_v28 }
  0x4c   : > { %1719 = vmatprep.mubr.msk.bf16.mxu1 %vm993_vm0, %v1781_v34 }
  0x4e   : > { %1678 = vmatmul.mubr.msk.bf16.gmra.mrb[20].mxu0 %vm585_vm1, %v568_v35 }
  0x4f   : > { %1681 = vmatprep.mubr.msk.bf16.mxu0 %vm585_vm1, %v569_v40 }
  0x53   : > { %1720 = vmatmul.mubr.msk.bf16.gmra.mrb[28].mxu1 %vm993_vm0, %v1782_v47 }
  0x56   : > { %1682 = vmatmul.mubr.msk.bf16.gmra.mrb[24].mxu0 %vm585_vm1, %v570_v50 }
  0x57   : > { %1685 = vmatprep.mubr.msk.bf16.mxu0 %vm585_vm1, %v571_v53 }
  0x5e   : > { %1686 = vmatmul.mubr.msk.bf16.gmra.mrb[28].mxu0 %vm585_vm1, %v572_v4 }
  0xee   : > { %v1693_v56 = vpop.f32.mrb[0].mxu1 }
  0xef   : > { %v1076_v57 = vpop.f32.mrb[1].mxu1  ;;  %v1212_v60 = vmul.f32 %v1693_v56, %v2115_v13 }
  0xf0   : > { %v1694_v58 = vpop.f32.mrb[2].mxu1  ;;  %v1210_v63 = vmul.f32 %v2115_v13, %v1076_v57 }
  0xf1   : > { %v1079_v59 = vpop.f32.mrb[3].mxu1  ;;  %v1251_v7 = vadd.f32 %v2121_v62, %v1212_v60  ;;  %v1213_v8 = vmul.f32 %v1694_v58, %v2115_v13 }
  0xf2   : > { %v1249_v11 = vadd.f32 %v2121_v62, %v1210_v63  ;;  %v1211_v12 = vmul.f32 %v2115_v13, %v1079_v59 }
  0xf3   : > { %v1252_v21 = vadd.f32 %v2121_v62, %v1213_v8 }
  0xf4   : > { %v1250_v26 = vadd.f32 %v2121_v62, %v1211_v12 }
  0xf6   : > { %v1697_v61 = vpop.f32.mrb[4].mxu1 }
  0xf7   : > { %v1092_v1 = vpop.f32.mrb[5].mxu1  ;;  %v1216_v24 = vmul.f32 %v1697_v61, %v2115_v13 }
  0xf8   : > { %v1698_v2 = vpop.f32.mrb[6].mxu1  ;;  %v1214_v29 = vmul.f32 %v2115_v13, %v1092_v1 }
  0xf9   : > { %v1659_v3 = vpop.f32.mrb[0].mxu0  ;;  %v1095_v6 = vpop.f32.mrb[7].mxu1  ;;  %v1255_v39 = vadd.f32 %v2121_v62, %v1216_v24  ;;  %v1217_v40 = vmul.f32 %v1698_v2, %v2115_v13 }
  0xfa   : > { %v804_v9 = vmul.f32 %v1659_v3, %v2127_v0  ;;  %v668_v10 = vpop.f32.mrb[1].mxu0  ;;  %v1253_v44 = vadd.f32 %v2121_v62, %v1214_v29  ;;  %v1215_v45 = vmul.f32 %v2115_v13, %v1095_v6 }
  0xfb   : > { %v802_v14 = vmul.f32 %v2127_v0, %v668_v10  ;;  %v1660_v15 = vpop.f32.mrb[2].mxu0  ;;  %v1256_v53 = vadd.f32 %v2121_v62, %v1217_v40 }
  0xfc   : > { %v843_v16 = vadd.f32 %v2133_v5, %v804_v9  ;;  %v805_v17 = vmul.f32 %v1660_v15, %v2127_v0  ;;  %v671_v18 = vpop.f32.mrb[3].mxu0  ;;  %v1254_v57 = vadd.f32 %v2121_v62, %v1215_v45 }
  0xfd   : > { %v841_v19 = vadd.f32 %v2133_v5, %v802_v14  ;;  %v803_v20 = vmul.f32 %v2127_v0, %v671_v18 }
  0xfe   : > { %v1283_v22 = vadd.f32 %v1251_v7, %v843_v16  ;;  %v844_v23 = vadd.f32 %v2133_v5, %v805_v17  ;;  %v1701_v25 = vpop.f32.mrb[8].mxu1 }
  0xff   : > { %v1281_v27 = vadd.f32 %v1249_v11, %v841_v19  ;;  %v842_v28 = vadd.f32 %v2133_v5, %v803_v20  ;;  %v1108_v30 = vpop.f32.mrb[9].mxu1  ;;  %v1220_v4 = vmul.f32 %v1701_v25, %v2115_v13 }
 0x100   : > { %v1315_v31 = vmax.f32 %v1283_v22, 0.0  ;;  %v1284_v32 = vadd.f32 %v1252_v21, %v844_v23  ;;  %v1702_v33 = vpop.f32.mrb[10].mxu1  ;;  %v1218_v60 = vmul.f32 %v2115_v13, %v1108_v30 }
 0x101   : > { %v1313_v34 = vmax.f32 %v1281_v27, 0.0  ;;  %v1282_v35 = vadd.f32 %v1250_v26, %v842_v28  ;;  %v1663_v36 = vpop.f32.mrb[4].mxu0  ;;  %v1111_v37 = vpop.f32.mrb[11].mxu1  ;;  %v1259_v10 = vadd.f32 %v2121_v62, %v1220_v4  ;;  %v1221_v11 = vmul.f32 %v1702_v33, %v2115_v13 }
 0x102   : > { %1347 = vst [vmem:[%s2153_s11 + $0x10] sm:$0xff] %v1315_v31  ;;  %v1316_v38 = vmax.f32 %v1284_v32, 0.0  ;;  %v808_v41 = vmul.f32 %v1663_v36, %v2127_v0  ;;  %v684_v42 = vpop.f32.mrb[5].mxu0  ;;  %v1257_v16 = vadd.f32 %v2121_v62, %v1218_v60  ;;  %v1219_v17 = vmul.f32 %v2115_v13, %v1111_v37 }
 0x103   : > { %1345 = vst [vmem:[%s2153_s11] sm:$0xff] %v1313_v34  ;;  %v1314_v43 = vmax.f32 %v1282_v35, 0.0  ;;  %v806_v46 = vmul.f32 %v2127_v0, %v684_v42  ;;  %v1664_v47 = vpop.f32.mrb[6].mxu0  ;;  %v1260_v25 = vadd.f32 %v2121_v62, %v1221_v11 }
 0x104   : > { %1348 = vst [vmem:[%s2153_s11 + $0x18] sm:$0xff] %v1316_v38  ;;  %v847_v48 = vadd.f32 %v2133_v5, %v808_v41  ;;  %v809_v49 = vmul.f32 %v1664_v47, %v2127_v0  ;;  %v687_v50 = vpop.f32.mrb[7].mxu0  ;;  %v1258_v30 = vadd.f32 %v2121_v62, %v1219_v17 }
 0x105   : > { %1346 = vst [vmem:[%s2153_s11 + $0x8] sm:$0xff] %v1314_v43  ;;  %v845_v51 = vadd.f32 %v2133_v5, %v806_v46  ;;  %v807_v52 = vmul.f32 %v2127_v0, %v687_v50 }
 0x106   : > { %v1287_v54 = vadd.f32 %v1255_v39, %v847_v48  ;;  %v848_v55 = vadd.f32 %v2133_v5, %v809_v49  ;;  %v1705_v56 = vpop.f32.mrb[12].mxu1 }
 0x107   : > { %v1285_v58 = vadd.f32 %v1253_v44, %v845_v51  ;;  %v846_v59 = vadd.f32 %v2133_v5, %v807_v52  ;;  %v1124_v61 = vpop.f32.mrb[13].mxu1  ;;  %v1224_v28 = vmul.f32 %v1705_v56, %v2115_v13 }
 0x108   : > { %v1319_v63 = vmax.f32 %v1287_v54, 0.0  ;;  %v1288_v1 = vadd.f32 %v1256_v53, %v848_v55  ;;  %v1706_v2 = vpop.f32.mrb[14].mxu1  ;;  %v1222_v33 = vmul.f32 %v2115_v13, %v1124_v61 }
 0x109   : > { %v1317_v3 = vmax.f32 %v1285_v58, 0.0  ;;  %v1286_v6 = vadd.f32 %v1254_v57, %v846_v59  ;;  %v1667_v7 = vpop.f32.mrb[8].mxu0  ;;  %v1127_v8 = vpop.f32.mrb[15].mxu1  ;;  %v1263_v43 = vadd.f32 %v2121_v62, %v1224_v28  ;;  %v1225_v44 = vmul.f32 %v1706_v2, %v2115_v13 }
 0x10a   : > { %1351 = vst [vmem:[%s2153_s11 + $0x30] sm:$0xff] %v1319_v63  ;;  %v1320_v9 = vmax.f32 %v1288_v1, 0.0  ;;  %v812_v12 = vmul.f32 %v1667_v7, %v2127_v0  ;;  %v700_v14 = vpop.f32.mrb[9].mxu0  ;;  %v1261_v48 = vadd.f32 %v2121_v62, %v1222_v33  ;;  %v1223_v49 = vmul.f32 %v2115_v13, %v1127_v8 }
 0x10b   : > { %1349 = vst [vmem:[%s2153_s11 + $0x20] sm:$0xff] %v1317_v3  ;;  %v1318_v15 = vmax.f32 %v1286_v6, 0.0  ;;  %v810_v18 = vmul.f32 %v2127_v0, %v700_v14  ;;  %v1668_v19 = vpop.f32.mrb[10].mxu0  ;;  %v1264_v56 = vadd.f32 %v2121_v62, %v1225_v44 }
 0x10c   : > { %1352 = vst [vmem:[%s2153_s11 + $0x38] sm:$0xff] %v1320_v9  ;;  %v851_v20 = vadd.f32 %v2133_v5, %v812_v12  ;;  %v813_v21 = vmul.f32 %v1668_v19, %v2127_v0  ;;  %v703_v22 = vpop.f32.mrb[11].mxu0  ;;  %v1262_v61 = vadd.f32 %v2121_v62, %v1223_v49 }
 0x10d   : > { %1350 = vst [vmem:[%s2153_s11 + $0x28] sm:$0xff] %v1318_v15  ;;  %v849_v23 = vadd.f32 %v2133_v5, %v810_v18  ;;  %v811_v24 = vmul.f32 %v2127_v0, %v703_v22 }
 0x10e   : > { %v1291_v26 = vadd.f32 %v1259_v10, %v851_v20  ;;  %v852_v27 = vadd.f32 %v2133_v5, %v813_v21  ;;  %v1709_v29 = vpop.f32.mrb[16].mxu1 }
 0x10f   : > { %v1289_v31 = vadd.f32 %v1257_v16, %v849_v23  ;;  %v850_v32 = vadd.f32 %v2133_v5, %v811_v24  ;;  %v1140_v34 = vpop.f32.mrb[17].mxu1  ;;  %v1228_v59 = vmul.f32 %v1709_v29, %v2115_v13 }
 0x110   : > { %v1323_v35 = vmax.f32 %v1291_v26, 0.0  ;;  %v1292_v36 = vadd.f32 %v1260_v25, %v852_v27  ;;  %v1710_v37 = vpop.f32.mrb[18].mxu1  ;;  %v1226_v2 = vmul.f32 %v2115_v13, %v1140_v34 }
 0x111   : > { %v1321_v38 = vmax.f32 %v1289_v31, 0.0  ;;  %v1290_v39 = vadd.f32 %v1258_v30, %v850_v32  ;;  %v1671_v40 = vpop.f32.mrb[12].mxu0  ;;  %v1143_v41 = vpop.f32.mrb[19].mxu1  ;;  %v1267_v15 = vadd.f32 %v2121_v62, %v1228_v59  ;;  %v1229_v16 = vmul.f32 %v1710_v37, %v2115_v13 }
 0x112   : > { %1355 = vst [vmem:[%s2153_s11 + $0x50] sm:$0xff] %v1323_v35  ;;  %v1324_v42 = vmax.f32 %v1292_v36, 0.0  ;;  %v816_v45 = vmul.f32 %v1671_v40, %v2127_v0  ;;  %v716_v46 = vpop.f32.mrb[13].mxu0  ;;  %v1265_v20 = vadd.f32 %v2121_v62, %v1226_v2  ;;  %v1227_v21 = vmul.f32 %v2115_v13, %v1143_v41 }
 0x113   : > { %1353 = vst [vmem:[%s2153_s11 + $0x40] sm:$0xff] %v1321_v38  ;;  %v1322_v47 = vmax.f32 %v1290_v39, 0.0  ;;  %v814_v50 = vmul.f32 %v2127_v0, %v716_v46  ;;  %v1672_v51 = vpop.f32.mrb[14].mxu0  ;;  %v1268_v29 = vadd.f32 %v2121_v62, %v1229_v16 }
 0x114   : > { %1356 = vst [vmem:[%s2153_s11 + $0x58] sm:$0xff] %v1324_v42  ;;  %v855_v52 = vadd.f32 %v2133_v5, %v816_v45  ;;  %v817_v53 = vmul.f32 %v1672_v51, %v2127_v0  ;;  %v719_v54 = vpop.f32.mrb[15].mxu0  ;;  %v1266_v34 = vadd.f32 %v2121_v62, %v1227_v21 }
 0x115   : > { %1354 = vst [vmem:[%s2153_s11 + $0x48] sm:$0xff] %v1322_v47  ;;  %v853_v55 = vadd.f32 %v2133_v5, %v814_v50  ;;  %v815_v4 = vmul.f32 %v2127_v0, %v719_v54 }
 0x116   : > { %v1295_v57 = vadd.f32 %v1263_v43, %v855_v52  ;;  %v856_v58 = vadd.f32 %v2133_v5, %v817_v53  ;;  %v1713_v60 = vpop.f32.mrb[20].mxu1 }
 0x117   : > { %v1293_v63 = vadd.f32 %v1261_v48, %v853_v55  ;;  %v854_v1 = vadd.f32 %v2133_v5, %v815_v4  ;;  %v1156_v3 = vpop.f32.mrb[21].mxu1  ;;  %v1232_v32 = vmul.f32 %v1713_v60, %v2115_v13 }
 0x118   : > { %v1327_v6 = vmax.f32 %v1295_v57, 0.0  ;;  %v1296_v7 = vadd.f32 %v1264_v56, %v856_v58  ;;  %v1714_v8 = vpop.f32.mrb[22].mxu1  ;;  %v1230_v37 = vmul.f32 %v2115_v13, %v1156_v3 }
 0x119   : > { %v1325_v9 = vmax.f32 %v1293_v63, 0.0  ;;  %v1294_v10 = vadd.f32 %v1262_v61, %v854_v1  ;;  %v1675_v11 = vpop.f32.mrb[16].mxu0  ;;  %v1159_v12 = vpop.f32.mrb[23].mxu1  ;;  %v1271_v47 = vadd.f32 %v2121_v62, %v1232_v32  ;;  %v1233_v48 = vmul.f32 %v1714_v8, %v2115_v13 }
 0x11a   : > { %1359 = vst [vmem:[%s2153_s11 + $0x70] sm:$0xff] %v1327_v6  ;;  %v1328_v14 = vmax.f32 %v1296_v7, 0.0  ;;  %v820_v17 = vmul.f32 %v1675_v11, %v2127_v0  ;;  %v732_v18 = vpop.f32.mrb[17].mxu0  ;;  %v1269_v52 = vadd.f32 %v2121_v62, %v1230_v37  ;;  %v1231_v53 = vmul.f32 %v2115_v13, %v1159_v12 }
 0x11b   : > { %1357 = vst [vmem:[%s2153_s11 + $0x60] sm:$0xff] %v1325_v9  ;;  %v1326_v19 = vmax.f32 %v1294_v10, 0.0  ;;  %v818_v22 = vmul.f32 %v2127_v0, %v732_v18  ;;  %v1676_v23 = vpop.f32.mrb[18].mxu0  ;;  %v1272_v60 = vadd.f32 %v2121_v62, %v1233_v48 }
 0x11c   : > { %1360 = vst [vmem:[%s2153_s11 + $0x78] sm:$0xff] %v1328_v14  ;;  %v859_v24 = vadd.f32 %v2133_v5, %v820_v17  ;;  %v821_v25 = vmul.f32 %v1676_v23, %v2127_v0  ;;  %v735_v26 = vpop.f32.mrb[19].mxu0  ;;  %v1270_v3 = vadd.f32 %v2121_v62, %v1231_v53 }
 0x11d   : > { %1358 = vst [vmem:[%s2153_s11 + $0x68] sm:$0xff] %v1326_v19  ;;  %v857_v27 = vadd.f32 %v2133_v5, %v818_v22  ;;  %v819_v28 = vmul.f32 %v2127_v0, %v735_v26 }
 0x11e   : > { %v1299_v30 = vadd.f32 %v1267_v15, %v859_v24  ;;  %v860_v31 = vadd.f32 %v2133_v5, %v821_v25  ;;  %v1717_v33 = vpop.f32.mrb[24].mxu1 }
 0x11f   : > { %v1297_v35 = vadd.f32 %v1265_v20, %v857_v27  ;;  %v858_v36 = vadd.f32 %v2133_v5, %v819_v28  ;;  %v1172_v38 = vpop.f32.mrb[25].mxu1  ;;  %v1236_v1 = vmul.f32 %v1717_v33, %v2115_v13 }
 0x120   : > { %v1331_v39 = vmax.f32 %v1299_v30, 0.0  ;;  %v1300_v40 = vadd.f32 %v1268_v29, %v860_v31  ;;  %v1718_v41 = vpop.f32.mrb[26].mxu1  ;;  %v1234_v8 = vmul.f32 %v2115_v13, %v1172_v38 }
 0x121   : > { %v1329_v42 = vmax.f32 %v1297_v35, 0.0  ;;  %v1298_v43 = vadd.f32 %v1266_v34, %v858_v36  ;;  %v1679_v44 = vpop.f32.mrb[20].mxu0  ;;  %v1175_v45 = vpop.f32.mrb[27].mxu1  ;;  %v1275_v19 = vadd.f32 %v2121_v62, %v1236_v1  ;;  %v1237_v20 = vmul.f32 %v1718_v41, %v2115_v13 }
 0x122   : > { %1363 = vst [vmem:[%s2153_s11 + $0x90] sm:$0xff] %v1331_v39  ;;  %v1332_v46 = vmax.f32 %v1300_v40, 0.0  ;;  %v824_v49 = vmul.f32 %v1679_v44, %v2127_v0  ;;  %v748_v50 = vpop.f32.mrb[21].mxu0  ;;  %v1273_v24 = vadd.f32 %v2121_v62, %v1234_v8  ;;  %v1235_v25 = vmul.f32 %v2115_v13, %v1175_v45 }
 0x123   : > { %1361 = vst [vmem:[%s2153_s11 + $0x80] sm:$0xff] %v1329_v42  ;;  %v1330_v51 = vmax.f32 %v1298_v43, 0.0  ;;  %v822_v54 = vmul.f32 %v2127_v0, %v748_v50  ;;  %v1680_v55 = vpop.f32.mrb[22].mxu0  ;;  %v1276_v33 = vadd.f32 %v2121_v62, %v1237_v20 }
 0x124   : > { %1364 = vst [vmem:[%s2153_s11 + $0x98] sm:$0xff] %v1332_v46  ;;  %v863_v4 = vadd.f32 %v2133_v5, %v824_v49  ;;  %v825_v56 = vmul.f32 %v1680_v55, %v2127_v0  ;;  %v751_v57 = vpop.f32.mrb[23].mxu0  ;;  %v1274_v37 = vadd.f32 %v2121_v62, %v1235_v25 }
 0x125   : > { %1362 = vst [vmem:[%s2153_s11 + $0x88] sm:$0xff] %v1330_v51  ;;  %v861_v58 = vadd.f32 %v2133_v5, %v822_v54  ;;  %v823_v59 = vmul.f32 %v2127_v0, %v751_v57 }
 0x126   : > { %v1303_v61 = vadd.f32 %v1271_v47, %v863_v4  ;;  %v864_v63 = vadd.f32 %v2133_v5, %v825_v56  ;;  %v1721_v2 = vpop.f32.mrb[28].mxu1 }
 0x127   : > { %v1301_v6 = vadd.f32 %v1269_v52, %v861_v58  ;;  %v862_v7 = vadd.f32 %v2133_v5, %v823_v59  ;;  %v1188_v9 = vpop.f32.mrb[29].mxu1  ;;  %v1240_v36 = vmul.f32 %v1721_v2, %v2115_v13 }
 0x128   : > { %v1335_v10 = vmax.f32 %v1303_v61, 0.0  ;;  %v1304_v11 = vadd.f32 %v1272_v60, %v864_v63  ;;  %v1722_v12 = vpop.f32.mrb[30].mxu1  ;;  %v1238_v40 = vmul.f32 %v2115_v13, %v1188_v9 }
 0x129   : > { %v1333_v14 = vmax.f32 %v1301_v6, 0.0  ;;  %v1302_v15 = vadd.f32 %v1270_v3, %v862_v7  ;;  %v1683_v16 = vpop.f32.mrb[24].mxu0  ;;  %v1191_v17 = vpop.f32.mrb[31].mxu1  ;;  %v1279_v47 = vadd.f32 %v2121_v62, %v1240_v36  ;;  %v1241_v48 = vmul.f32 %v1722_v12, %v2115_v13 }
 0x12a   : > { %1367 = vst [vmem:[%s2153_s11 + $0xb0] sm:$0xff] %v1335_v10  ;;  %v1336_v18 = vmax.f32 %v1304_v11, 0.0  ;;  %v828_v21 = vmul.f32 %v1683_v16, %v2127_v0  ;;  %v764_v22 = vpop.f32.mrb[25].mxu0  ;;  %v1277_v52 = vadd.f32 %v2121_v62, %v1238_v40  ;;  %v1239_v53 = vmul.f32 %v2115_v13, %v1191_v17 }
 0x12b   : > { %1365 = vst [vmem:[%s2153_s11 + $0xa0] sm:$0xff] %v1333_v14  ;;  %v1334_v23 = vmax.f32 %v1302_v15, 0.0  ;;  %v826_v26 = vmul.f32 %v2127_v0, %v764_v22  ;;  %v1684_v27 = vpop.f32.mrb[26].mxu0  ;;  %v1280_v60 = vadd.f32 %v2121_v62, %v1241_v48 }
 0x12c   : > { %1368 = vst [vmem:[%s2153_s11 + $0xb8] sm:$0xff] %v1336_v18  ;;  %v867_v28 = vadd.f32 %v2133_v5, %v828_v21  ;;  %v829_v29 = vmul.f32 %v1684_v27, %v2127_v0  ;;  %v767_v30 = vpop.f32.mrb[27].mxu0  ;;  %v1278_v63 = vadd.f32 %v2121_v62, %v1239_v53 }
 0x12d   : > { %1366 = vst [vmem:[%s2153_s11 + $0xa8] sm:$0xff] %v1334_v23  ;;  %v865_v31 = vadd.f32 %v2133_v5, %v826_v26  ;;  %v827_v32 = vmul.f32 %v2127_v0, %v767_v30 }
 0x12e   : > { %v1307_v34 = vadd.f32 %v1275_v19, %v867_v28  ;;  %v868_v35 = vadd.f32 %v2133_v5, %v829_v29 }
 0x12f   : > { %v1305_v38 = vadd.f32 %v1273_v24, %v865_v31  ;;  %v866_v39 = vadd.f32 %v2133_v5, %v827_v32 }
 0x130   : > { %v1339_v41 = vmax.f32 %v1307_v34, 0.0  ;;  %v1308_v42 = vadd.f32 %v1276_v33, %v868_v35 }
 0x131   : > { %v1337_v43 = vmax.f32 %v1305_v38, 0.0  ;;  %v1306_v44 = vadd.f32 %v1274_v37, %v866_v39  ;;  %v1687_v45 = vpop.f32.mrb[28].mxu0 }
 0x132   : > { %1371 = vst [vmem:[%s2153_s11 + $0xd0] sm:$0xff] %v1339_v41  ;;  %v1340_v46 = vmax.f32 %v1308_v42, 0.0  ;;  %v832_v49 = vmul.f32 %v1687_v45, %v2127_v0  ;;  %v780_v50 = vpop.f32.mrb[29].mxu0 }
 0x133   : > { %1369 = vst [vmem:[%s2153_s11 + $0xc0] sm:$0xff] %v1337_v43  ;;  %v1338_v51 = vmax.f32 %v1306_v44, 0.0  ;;  %v830_v54 = vmul.f32 %v2127_v0, %v780_v50  ;;  %v1688_v55 = vpop.f32.mrb[30].mxu0 }
 0x134   : > { %1372 = vst [vmem:[%s2153_s11 + $0xd8] sm:$0xff] %v1340_v46  ;;  %v871_v4 = vadd.f32 %v2133_v5, %v832_v49  ;;  %v833_v56 = vmul.f32 %v1688_v55, %v2127_v0  ;;  %v783_v57 = vpop.f32.mrb[31].mxu0 }
 0x135   : > { %1370 = vst [vmem:[%s2153_s11 + $0xc8] sm:$0xff] %v1338_v51  ;;  %v869_v58 = vadd.f32 %v2133_v5, %v830_v54  ;;  %v831_v59 = vmul.f32 %v2127_v0, %v783_v57 }
 0x136   : > { %v1311_v13 = vadd.f32 %v1279_v47, %v871_v4  ;;  %v872_v61 = vadd.f32 %v2133_v5, %v833_v56 }
 0x137   : > { %v1309_v1 = vadd.f32 %v1277_v52, %v869_v58  ;;  %v870_v2 = vadd.f32 %v2133_v5, %v831_v59 }
 0x138   : > { %v1343_v3 = vmax.f32 %v1311_v13, 0.0  ;;  %v1312_v6 = vadd.f32 %v1280_v60, %v872_v61 }
 0x139   : > { %v1341_v0 = vmax.f32 %v1309_v1, 0.0  ;;  %v1310_v7 = vadd.f32 %v1278_v63, %v870_v2 }
 0x13a   : > { %1375 = vst [vmem:[%s2153_s11 + $0xf0] sm:$0xff] %v1343_v3  ;;  %v1344_v8 = vmax.f32 %v1312_v6, 0.0 }
 0x13b   : > { %1373 = vst [vmem:[%s2153_s11 + $0xe0] sm:$0xff] %v1341_v0  ;;  %v1342_v62 = vmax.f32 %v1310_v7, 0.0 }
 0x13c   : > { %1376 = vst [vmem:[%s2153_s11 + $0xf8] sm:$0xff] %v1344_v8 }
 0x13d   : > { %1374 = vst [vmem:[%s2153_s11 + $0xe8] sm:$0xff] %v1342_v62 }
 0x13e   : > { %1796 = shalt.err (!%p1793_p3)
}
 0x13f   : > { %s1797_s27 = scalar_lea.hbm %s2299_s25, 4096  ;;  %s1801_s20 = scalar_lea.hbm %s2359_s10, 8192 }
 0x140   : > { %p1798_p4 = scmp.ne.s32.totalorder %s2299_s25, %s1797_s27  ;;  %p1802_p9 = scmp.lt.u32.totalorder %s2299_s25, %s2359_s10 }
 0x141   : > { %p1803_p10 = scmp.lt.u32.totalorder %s1801_s20, %s1797_s27  ;;  %p1805_p12 = scmp.lt.u32.totalorder %s1797_s27, %s2299_s25 }
 0x142   : > { %p1799_p7 = pnand %p1798_p4, %p1943_p5 }
 0x143   : > { %p1804_p11 = por %p1803_p10, %p1802_p9 }
 0x144   : > { %p1800_p8 = pneg %p1799_p7 }
 0x145   : > { %p1806_p13 = por %p1805_p12, %p1804_p11 }
 0x147   : > { %p1807_p0 = pnand %p1806_p13, %p1800_p8 }
 0x149   : > { %1810 = shalt.err (!%p1807_p0)
}
 0x14a   : > { %s1848_s26 = smov 128   ;;  %s1849_s29 = smov 8  }
 0x14b   : > { %1723 = dma.vmem_to_hbm [thread:$0]  (%p1943_p5), %s2301_s18, 4096, %s2299_s25, %s2308_s17, %s1848_s26, %s1848_s26, %s1849_s29  }
 0x14c PF: > { %p1729_p1 = scmp.ge.s32.totalorder %s1845_s16, 2  ;;  %s1406_s30 = sand.u32 1, %s1833_s13  }
 0x14d   : > { %s1407_s27 = scalar_lea.sflag [#allocation3], %s1406_s30 }
 0x14e   : > { %p1726_p2 = pnand %p1729_p1, %p1947_p6 }
 0x150   : > { %1828 = dma.done.wait (!%p1726_p2), %s1407_s27, 4096  }
 0x151   : > { %1830 = vsyncadd (!%p1726_p2), %s1407_s27, 4294963200  ;;  %p20_p3 = scmp.ge.s32.totalorder %s1930_s19, 4   ;;  %s2362_s13 = smov %s1837_s14 }
 0x152   : > { %s2363_s14 = smov %s1841_s15  ;;  %s2364_s15 = smov %s1941_s22 }
 0x153   : > { %s2365_s16 = smov %s1930_s19  ;;  %22 = sbr.rel (!%p20_p3) target bundleno = 3 (0x3), region = 98 }
 0x15a   :  { %1412 = vsyncpa [#allocation3], 1 }
 0x15b   :  { %1414 = vsyncpa [#allocation3 + $0x1], 1 }

// kernel: bottleneck_time_emb_forward.5
= control target key start
LH: loop header
LB: loop body
LE: loop exit
PB: predicated region body
PF: predicated region fallthrough
CT: control target
= control target key end

     0   :  { %s4055_s24 = smov 0   ;;  %s5286_s0 = inlined_call_operand.vmem [shape: bf16[2,256,16], index: 0, kind: input, shape index: {}]   ;;  %s5287_s1 = inlined_call_operand.vmem [shape: bf16[16,32], index: 1, kind: input, shape index: {}]   ;;  %s5288_s2 = inlined_call_operand.vmem [shape: f32[1,32], index: 2, kind: input, shape index: {}]   ;;  %s5289_s3 = inlined_call_operand.vmem [shape: f32[1,32], index: 3, kind: input, shape index: {}]   ;;  %s5290_s4 = inlined_call_operand.vmem [shape: bf16[288,32], index: 4, kind: input, shape index: {}]   ;;  %s5291_s5 = inlined_call_operand.vmem [shape: bf16[2,256,32], index: 5, kind: output, shape index: {0}]   ;;  %s5292_s6 = inlined_call_operand.vmem [shape: f32[2,1,32], index: 6, kind: output, shape index: {1}]   ;;  %s5293_s7 = inlined_call_operand.vmem [shape: f32[2,1,32], index: 7, kind: output, shape index: {2}]  }
   0x1 LB: > { %s3095_s25 = sadd.s32 4294967295, %s4009_s24   ;;  %p3099_p0 = scmp.ge.s32.totalorder %s4009_s24, 1  ;;  %s4009_s24 = sphi %s4055_s24, %s18_s24  }
   0x2   : > { %p242_p1 = scmp.lt.s32.totalorder %s4009_s24, 3 }
   0x4   : > { %p243_p2 = pnand %p3099_p0, %p242_p1 }
   0x5   : > { %v3966_v0 = vld [vmem:[%s5287_s1] sm:$0xff] (!%p243_p2)   ;;  %p280_p3 = scmp.lt.s32.totalorder (!%p243_p2), %s3095_s25, 1  ;;  %vm417_vm0 = vcmask (!%p243_p2), 130048   ;;  %vm737_vm1 = vcmask (!%p243_p2), 261120   ;;  %v4011_v17 = vmov (!%p243_p2), 0.0   ;;  %s4012_s9 = smov (!%p243_p2), 32  }
   0x6   : > { %246 = sbr.rel (%p243_p2) target bundleno = 794 (0x31a), region = 40  ;;  %3388 = vmatprep.subr.bf16.mxu0 (!%p243_p2), %v3966_v0  ;;  %747 = vst.msk [vmem:[#allocation2 + $0x48] sm:$0xff] (!%p243_p2), %vm737_vm1, %v4011_v17  ;;  %738 = vst.msk [vmem:[#allocation2] sm:$0xff] (!%p243_p2), %vm737_vm1, %v4011_v17  ;;  %s4013_s10 = smov (!%p243_p2), 64   ;;  %v3983_v24 = vld [vmem:[%s5290_s4 + $0x40] sm:$0xff] (!%p243_p2)   ;;  %v3985_v27 = vld [vmem:[%s5290_s4 + $0x48] sm:$0xff] (!%p243_p2)  }
   0x7   : > { %3389 = vmatpush3.bf16.msra.mxu0 (!%p243_p2), %v3966_v0  ;;  %739 = vst.msk [vmem:[#allocation2 + $0x8] sm:$0xff] (!%p243_p2), %vm737_vm1, %v4011_v17  ;;  %740 = vst.msk [vmem:[#allocation2 + $0x10] sm:$0xff] (!%p243_p2), %vm737_vm1, %v4011_v17  ;;  %3458 = vmatprep.subr.bf16.mxu1 (!%p243_p2), %v3983_v24  ;;  %v4260_v25 = vld [vmem:[%s5288_s2] ss:$0 sm:$0xff] (!%p243_p2)  ;;  %v3986_v37 = vld [vmem:[%s5290_s4 + $0x8] sm:$0xff] (!%p243_p2)   ;;  %s4014_s17 = smov (!%p243_p2), 96  }
   0x8   : > { %741 = vst.msk [vmem:[#allocation2 + $0x18] sm:$0xff] (!%p243_p2), %vm737_vm1, %v4011_v17  ;;  %742 = vst.msk [vmem:[#allocation2 + $0x20] sm:$0xff] (!%p243_p2), %vm737_vm1, %v4011_v17  ;;  %3258 = vmatprep.subr.bf16.mxu0 (!%p243_p2), %v3983_v24  ;;  %v3984_v26 = vld [vmem:[%s5290_s4] sm:$0xff] (!%p243_p2)   ;;  %v3987_v44 = vld [vmem:[%s5290_s4 + $0x50] sm:$0xff] (!%p243_p2)   ;;  %vm1932_vm2 = vcmask (!%p243_p2), 523264   ;;  %vm1965_vm3 = vcmask (!%p243_p2), 785408  }
   0x9   : > { %743 = vst.msk [vmem:[#allocation2 + $0x28] sm:$0xff] (!%p243_p2), %vm737_vm1, %v4011_v17  ;;  %744 = vst.msk [vmem:[#allocation2 + $0x30] sm:$0xff] (!%p243_p2), %vm737_vm1, %v4011_v17  ;;  %v4271_v29 = vld [vmem:[%s5289_s3] ss:$0 sm:$0xff] (!%p243_p2)  ;;  %3466 = vmatpush3.bf16.msra.mxu1 (!%p243_p2), %v3984_v26  ;;  %v3988_v46 = vld [vmem:[%s5290_s4 + $0x10] sm:$0xff] (!%p243_p2)   ;;  %vm2784_vm4 = vcmask (!%p243_p2), 257024  }
   0xa   : > { %745 = vst.msk [vmem:[#allocation2 + $0x38] sm:$0xff] (!%p243_p2), %vm737_vm1, %v4011_v17  ;;  %746 = vst.msk [vmem:[#allocation2 + $0x40] sm:$0xff] (!%p243_p2), %vm737_vm1, %v4011_v17  ;;  %3459 = vmatprep.subr.bf16.mxu1 (!%p243_p2), %v3985_v27  ;;  %v3989_v56 = vld [vmem:[%s5290_s4 + $0x58] sm:$0xff] (!%p243_p2)   ;;  %vm2886_vm5 = vcmask (!%p243_p2), 253952  }
   0xb   : > { %748 = vst.msk [vmem:[#allocation2 + $0x50] sm:$0xff] (!%p243_p2), %vm737_vm1, %v4011_v17  ;;  %749 = vst.msk [vmem:[#allocation2 + $0x58] sm:$0xff] (!%p243_p2), %vm737_vm1, %v4011_v17  ;;  %v3990_v59 = vld [vmem:[%s5290_s4 + $0x18] sm:$0xff] (!%p243_p2)  }
   0xc   : > { %750 = vst.msk [vmem:[#allocation2 + $0x60] sm:$0xff] (!%p243_p2), %vm737_vm1, %v4011_v17  ;;  %751 = vst.msk [vmem:[#allocation2 + $0x68] sm:$0xff] (!%p243_p2), %vm737_vm1, %v4011_v17 }
   0xd   : > { %s5295_s25 = smov (!%p280_p3, %s3095_s25), 1  ;;  %752 = vst.msk [vmem:[#allocation2 + $0x70] sm:$0xff] %vm737_vm1, %v4011_v17  ;;  %753 = vst.msk [vmem:[#allocation2 + $0x78] sm:$0xff] %vm737_vm1, %v4011_v17  ;;  %3467 = vmatpush3.bf16.msra.mxu1 %v3986_v37 }
   0xe   : > { %s3207_s28 = sshll.u32 %s5295_s25, 7  ;;  %754 = vst.msk [vmem:[#allocation2 + $0x80] sm:$0xff] %vm737_vm1, %v4011_v17  ;;  %755 = vst.msk [vmem:[#allocation2 + $0x88] sm:$0xff] %vm737_vm1, %v4011_v17  ;;  %v875_v18 = vld [vmem:[#allocation2 + $0x8] sm:$0xff]  ;;  %v876_v19 = vld [vmem:[#allocation2 + $0x10] sm:$0xff]  ;;  %3460 = vmatprep.subr.bf16.mxu1 %v3987_v44  ;;  %s292_s18 = scalar_lea.vmem %s5292_s6, %s5295_s25 }
   0xf   : > { %s4074_s8 = scalar_lea.vmem %s5286_s0, %s3207_s28  ;;  %756 = vst.msk [vmem:[#allocation2 + $0x90] sm:$0xff] %vm737_vm1, %v4011_v17  ;;  %757 = vst.msk [vmem:[#allocation2 + $0x98] sm:$0xff] %vm737_vm1, %v4011_v17  ;;  %v3486_v20 = vpack.i.bf16 %v876_v19, %v875_v18  ;;  %v907_v21 = vld [vmem:[#allocation2 + $0x9] sm:$0xff]  ;;  %v908_v22 = vld [vmem:[#allocation2 + $0x11] sm:$0xff]  ;;  %s5070_s16 = scalar_lea.vmem %s5291_s5, %s3207_s28 }
  0x10   : > { %v3967_v1 = vld [vmem:[%s4074_s8] sm:$0xff]   ;;  %v3968_v2 = vld [vmem:[%s4074_s8 + $0x8] sm:$0xff]   ;;  %v3969_v3 = vld [vmem:[%s4074_s8 + $0x10] sm:$0xff]   ;;  %758 = vst.msk [vmem:[#allocation2 + $0xa0] sm:$0xff] %vm737_vm1, %v4011_v17  ;;  %v3491_v23 = vpack.i.bf16 %v908_v22, %v907_v21  ;;  %s295_s21 = scalar_lea.vmem %s5293_s7, %s5295_s25 }
  0x11   : > { %3390 = vmatprep.mubr.msk.bf16.mxu0 %vm417_vm0, %v3967_v1  ;;  %v3970_v4 = vld [vmem:[%s4074_s8 + $0x18] sm:$0xff]   ;;  %v3971_v5 = vld [vmem:[%s4074_s8 + $0x20] sm:$0xff]   ;;  %v3972_v6 = vld [vmem:[%s4074_s8 + $0x28] sm:$0xff]   ;;  %759 = vst.msk [vmem:[#allocation2 + $0xa8] sm:$0xff] %vm737_vm1, %v4011_v17  ;;  %3487 = vrot.lane.b32.xlu1 %v3486_v20, %s4012_s9 }
  0x12   : > { %3391 = vmatmul.mubr.msk.bf16.vlgmr.msra.gmra.mrb[0].mxu0 %vm417_vm0, %v3968_v2  ;;  %v3973_v7 = vld [vmem:[%s4074_s8 + $0x30] sm:$0xff]   ;;  %v3974_v8 = vld [vmem:[%s4074_s8 + $0x38] sm:$0xff]   ;;  %v3975_v9 = vld [vmem:[%s4074_s8 + $0x40] sm:$0xff]   ;;  %760 = vst.msk [vmem:[#allocation2 + $0xb0] sm:$0xff] %vm737_vm1, %v4011_v17  ;;  %3468 = vmatpush3.bf16.msra.mxu1 %v3988_v46 }
  0x13   : > { %3394 = vmatprep.mubr.msk.bf16.mxu0 %vm417_vm0, %v3969_v3  ;;  %v3976_v10 = vld [vmem:[%s4074_s8 + $0x48] sm:$0xff]   ;;  %v3977_v11 = vld [vmem:[%s4074_s8 + $0x50] sm:$0xff]   ;;  %v3978_v12 = vld [vmem:[%s4074_s8 + $0x58] sm:$0xff]   ;;  %761 = vst.msk [vmem:[#allocation2 + $0xb8] sm:$0xff] %vm737_vm1, %v4011_v17  ;;  %3259 = vmatpush3.bf16.msra.mxu0 %v3984_v26 }
  0x14   : > { %v3979_v13 = vld [vmem:[%s4074_s8 + $0x60] sm:$0xff]   ;;  %v3980_v14 = vld [vmem:[%s4074_s8 + $0x68] sm:$0xff]   ;;  %v3981_v15 = vld [vmem:[%s4074_s8 + $0x70] sm:$0xff]   ;;  %762 = vst.msk [vmem:[#allocation2 + $0xc0] sm:$0xff] %vm737_vm1, %v4011_v17  ;;  %3260 = vmatprep.subr.bf16.mxu0 %v3985_v27  ;;  %3461 = vmatprep.subr.bf16.mxu1 %v3989_v56 }
  0x15   : > { %v3982_v16 = vld [vmem:[%s4074_s8 + $0x78] sm:$0xff]   ;;  %763 = vst.msk [vmem:[#allocation2 + $0xc8] sm:$0xff] %vm737_vm1, %v4011_v17  ;;  %764 = vst.msk [vmem:[#allocation2 + $0xd0] sm:$0xff] %vm737_vm1, %v4011_v17  ;;  %3492 = vrot.lane.b32.xlu1 %v3491_v23, %s4013_s10  ;;  %v3991_v2 = vld [vmem:[%s5290_s4 + $0x60] sm:$0xff]  }
  0x16   : > { %765 = vst.msk [vmem:[#allocation2 + $0xd8] sm:$0xff] %vm737_vm1, %v4011_v17  ;;  %766 = vst.msk [vmem:[#allocation2 + $0xe0] sm:$0xff] %vm737_vm1, %v4011_v17  ;;  %3469 = vmatpush3.bf16.msra.mxu1 %v3990_v59  ;;  %v3993_v19 = vld [vmem:[%s5290_s4 + $0x68] sm:$0xff]  }
  0x17   : > { %767 = vst.msk [vmem:[#allocation2 + $0xe8] sm:$0xff] %vm737_vm1, %v4011_v17  ;;  %768 = vst.msk [vmem:[#allocation2 + $0xf0] sm:$0xff] %vm737_vm1, %v4011_v17  ;;  %3261 = vmatpush3.bf16.msra.mxu0 %v3986_v37  ;;  %3462 = vmatprep.subr.bf16.mxu1 %v3991_v2  ;;  %v3994_v23 = vld [vmem:[%s5290_s4 + $0x28] sm:$0xff]  }
  0x18   : > { %769 = vst.msk [vmem:[#allocation2 + $0xf8] sm:$0xff] %vm737_vm1, %v4011_v17  ;;  %770 = vst.msk [vmem:[#allocation2 + $0x100] sm:$0xff] %vm737_vm1, %v4011_v17  ;;  %3262 = vmatprep.subr.bf16.mxu0 %v3987_v44  ;;  %v3996_v44 = vld [vmem:[%s5290_s4 + $0x30] sm:$0xff]  }
  0x19   : > { %771 = vst.msk [vmem:[#allocation2 + $0x108] sm:$0xff] %vm737_vm1, %v4011_v17  ;;  %772 = vst.msk [vmem:[#allocation2 + $0x110] sm:$0xff] %vm737_vm1, %v4011_v17 }
  0x1a   : > { %3395 = vmatmul.mubr.msk.bf16.gmra.mrb[4].mxu0 %vm417_vm0, %v3970_v4  ;;  %773 = vst.msk [vmem:[#allocation2 + $0x118] sm:$0xff] %vm737_vm1, %v4011_v17  ;;  %774 = vst.msk [vmem:[#allocation2 + $0x120] sm:$0xff] %vm737_vm1, %v4011_v17 }
  0x1b   : > { %3398 = vmatprep.mubr.msk.bf16.mxu0 %vm417_vm0, %v3971_v5  ;;  %775 = vst.msk [vmem:[#allocation2 + $0x128] sm:$0xff] %vm737_vm1, %v4011_v17  ;;  %776 = vst.msk [vmem:[#allocation2 + $0x130] sm:$0xff] %vm737_vm1, %v4011_v17  ;;  %3263 = vmatpush3.bf16.msra.mxu0 %v3988_v46 }
  0x1c   : > { %777 = vst.msk [vmem:[#allocation2 + $0x138] sm:$0xff] %vm737_vm1, %v4011_v17  ;;  %778 = vst.msk [vmem:[#allocation2 + $0x140] sm:$0xff] %vm737_vm1, %v4011_v17  ;;  %3264 = vmatprep.subr.bf16.mxu0 %v3989_v56 }
  0x1d   : > { %779 = vst.msk [vmem:[#allocation2 + $0x148] sm:$0xff] %vm737_vm1, %v4011_v17  ;;  %780 = vst.msk [vmem:[#allocation2 + $0x150] sm:$0xff] %vm737_vm1, %v4011_v17 }
  0x1e   : > { %781 = vst.msk [vmem:[#allocation2 + $0x158] sm:$0xff] %vm737_vm1, %v4011_v17  ;;  %782 = vst.msk [vmem:[#allocation2 + $0x160] sm:$0xff] %vm737_vm1, %v4011_v17 }
  0x1f   : > { %783 = vst.msk [vmem:[#allocation2 + $0x168] sm:$0xff] %vm737_vm1, %v4011_v17  ;;  %784 = vst.msk [vmem:[#allocation2 + $0x170] sm:$0xff] %vm737_vm1, %v4011_v17  ;;  %3265 = vmatpush3.bf16.msra.mxu0 %v3990_v59  ;;  %v4380_v59 = vld [vmem:[%s5290_s4 + $0x80] sm:$0xff]  }
  0x20   : > { %785 = vst.msk [vmem:[#allocation2 + $0x178] sm:$0xff] %vm737_vm1, %v4011_v17  ;;  %786 = vst.msk [vmem:[#allocation2 + $0x180] sm:$0xff] %vm737_vm1, %v4011_v17  ;;  %3266 = vmatprep.subr.bf16.mxu0 %v3991_v2 }
  0x21   : > { %787 = vst.msk [vmem:[#allocation2 + $0x188] sm:$0xff] %vm737_vm1, %v4011_v17  ;;  %788 = vst.msk [vmem:[#allocation2 + $0x190] sm:$0xff] %vm737_vm1, %v4011_v17 }
  0x22   : > { %3399 = vmatmul.mubr.msk.bf16.gmra.mrb[8].mxu0 %vm417_vm0, %v3972_v6  ;;  %789 = vst.msk [vmem:[#allocation2 + $0x198] sm:$0xff] %vm737_vm1, %v4011_v17  ;;  %790 = vst.msk [vmem:[#allocation2 + $0x1a0] sm:$0xff] %vm737_vm1, %v4011_v17 }
  0x23   : > { %3402 = vmatprep.mubr.msk.bf16.mxu0 %vm417_vm0, %v3973_v7  ;;  %791 = vst.msk [vmem:[#allocation2 + $0x1a8] sm:$0xff] %vm737_vm1, %v4011_v17  ;;  %792 = vst.msk [vmem:[#allocation2 + $0x1b0] sm:$0xff] %vm737_vm1, %v4011_v17 }
  0x24   : > { %793 = vst.msk [vmem:[#allocation2 + $0x1b8] sm:$0xff] %vm737_vm1, %v4011_v17  ;;  %794 = vst.msk [vmem:[#allocation2 + $0x1c0] sm:$0xff] %vm737_vm1, %v4011_v17 }
  0x25   : > { %795 = vst.msk [vmem:[#allocation2 + $0x1c8] sm:$0xff] %vm737_vm1, %v4011_v17  ;;  %796 = vst.msk [vmem:[#allocation2 + $0x1d0] sm:$0xff] %vm737_vm1, %v4011_v17 }
  0x26   : > { %797 = vst.msk [vmem:[#allocation2 + $0x1d8] sm:$0xff] %vm737_vm1, %v4011_v17  ;;  %798 = vst.msk [vmem:[#allocation2 + $0x1e0] sm:$0xff] %vm737_vm1, %v4011_v17 }
  0x27   : > { %799 = vst.msk [vmem:[#allocation2 + $0x1e8] sm:$0xff] %vm737_vm1, %v4011_v17  ;;  %800 = vst.msk [vmem:[#allocation2 + $0x1f0] sm:$0xff] %vm737_vm1, %v4011_v17 }
  0x28   : > { %801 = vst.msk [vmem:[#allocation2 + $0x1f8] sm:$0xff] %vm737_vm1, %v4011_v17  ;;  %802 = vst.msk [vmem:[#allocation2 + $0x200] sm:$0xff] %vm737_vm1, %v4011_v17 }
  0x29   : > { %803 = vst.msk [vmem:[#allocation2 + $0x208] sm:$0xff] %vm737_vm1, %v4011_v17  ;;  %804 = vst.msk [vmem:[#allocation2 + $0x210] sm:$0xff] %vm737_vm1, %v4011_v17 }
  0x2a   : > { %3403 = vmatmul.mubr.msk.bf16.gmra.mrb[12].mxu0 %vm417_vm0, %v3974_v8  ;;  %805 = vst.msk [vmem:[#allocation2 + $0x218] sm:$0xff] %vm737_vm1, %v4011_v17  ;;  %806 = vst.msk [vmem:[#allocation2 + $0x220] sm:$0xff] %vm737_vm1, %v4011_v17 }
  0x2b   : > { %3406 = vmatprep.mubr.msk.bf16.mxu0 %vm417_vm0, %v3975_v9  ;;  %807 = vst.msk [vmem:[#allocation2 + $0x228] sm:$0xff] %vm737_vm1, %v4011_v17  ;;  %808 = vst.msk [vmem:[#allocation2 + $0x230] sm:$0xff] %vm737_vm1, %v4011_v17 }
  0x2c   : > { %809 = vst.msk [vmem:[#allocation2 + $0x238] sm:$0xff] %vm737_vm1, %v4011_v17 }
  0x32   : > { %3407 = vmatmul.mubr.msk.bf16.gmra.mrb[16].mxu0 %vm417_vm0, %v3976_v10 }
  0x33   : > { %3410 = vmatprep.mubr.msk.bf16.mxu0 %vm417_vm0, %v3977_v11 }
  0x3a   : > { %3411 = vmatmul.mubr.msk.bf16.gmra.mrb[20].mxu0 %vm417_vm0, %v3978_v12 }
  0x3b   : > { %3414 = vmatprep.mubr.msk.bf16.mxu0 %vm417_vm0, %v3979_v13 }
  0x42   : > { %3415 = vmatmul.mubr.msk.bf16.gmra.mrb[24].mxu0 %vm417_vm0, %v3980_v14 }
  0x43   : > { %3418 = vmatprep.mubr.msk.bf16.mxu0 %vm417_vm0, %v3981_v15  ;;  %v3992_v15 = vld [vmem:[%s5290_s4 + $0x20] sm:$0xff]  }
  0x44   : > { %3267 = vmatpush3.bf16.msra.mxu0 %v3992_v15  ;;  %3470 = vmatpush3.bf16.msra.mxu1 %v3992_v15 }
  0x45   : > { %3268 = vmatprep.subr.bf16.mxu0 %v3993_v19  ;;  %3463 = vmatprep.subr.bf16.mxu1 %v3993_v19 }
  0x48   : > { %3269 = vmatpush3.bf16.msra.mxu0 %v3994_v23  ;;  %3471 = vmatpush3.bf16.msra.mxu1 %v3994_v23 }
  0x4a   : > { %3419 = vmatmul.mubr.msk.bf16.gmra.mrb[28].mxu0 %vm417_vm0, %v3982_v16 }
  0xe5   : > { %v3392_v28 = vpop.f32.mrb[0].mxu0 }
  0xe6   : > { %v636_v30 = vmul.f32 %v3392_v28, %v4260_v25  ;;  %v500_v31 = vpop.f32.mrb[1].mxu0 }
  0xe7   : > { %v634_v32 = vmul.f32 %v4260_v25, %v500_v31  ;;  %v3393_v33 = vpop.f32.mrb[2].mxu0 }
  0xe8   : > { %v675_v34 = vadd.f32 %v4271_v29, %v636_v30  ;;  %v637_v35 = vmul.f32 %v3393_v33, %v4260_v25  ;;  %v503_v36 = vpop.f32.mrb[3].mxu0  ;;  %v3995_v33 = vld [vmem:[%s5290_s4 + $0x70] sm:$0xff]  }
  0xe9   : > { %v673_v38 = vadd.f32 %v4271_v29, %v634_v32  ;;  %v635_v39 = vmul.f32 %v4260_v25, %v503_v36  ;;  %3270 = vmatprep.subr.bf16.mxu0 %v3995_v33  ;;  %3464 = vmatprep.subr.bf16.mxu1 %v3995_v33 }
  0xea   : > { %v707_v40 = vmax.f32 %v675_v34, 0.0  ;;  %v676_v41 = vadd.f32 %v4271_v29, %v637_v35  ;;  %3271 = vmatpush3.bf16.msra.mxu0 %v3996_v44  ;;  %3472 = vmatpush3.bf16.msra.mxu1 %v3996_v44 }
  0xeb   : > { %v705_v42 = vmax.f32 %v673_v38, 0.0  ;;  %v674_v43 = vadd.f32 %v4271_v29, %v635_v39 }
  0xec   : > { %813 = vst.msk [vmem:[#allocation2 + $0x48] sm:$0xff] %vm737_vm1, %v707_v40  ;;  %v708_v45 = vmax.f32 %v676_v41, 0.0 }
  0xed   : > { %811 = vst.msk [vmem:[#allocation2 + $0x28] sm:$0xff] %vm737_vm1, %v705_v42  ;;  %v706_v47 = vmax.f32 %v674_v43, 0.0  ;;  %v3396_v48 = vpop.f32.mrb[4].mxu0 }
  0xee   : > { %814 = vst.msk [vmem:[#allocation2 + $0x50] sm:$0xff] %vm737_vm1, %v708_v45  ;;  %v640_v49 = vmul.f32 %v3396_v48, %v4260_v25  ;;  %v516_v50 = vpop.f32.mrb[5].mxu0 }
  0xef   : > { %812 = vst.msk [vmem:[#allocation2 + $0x30] sm:$0xff] %vm737_vm1, %v706_v47  ;;  %v638_v51 = vmul.f32 %v4260_v25, %v516_v50  ;;  %v3397_v52 = vpop.f32.mrb[6].mxu0  ;;  %v3997_v47 = vld [vmem:[%s5290_s4 + $0x78] sm:$0xff]  }
  0xf0   : > { %v679_v53 = vadd.f32 %v4271_v29, %v640_v49  ;;  %v641_v54 = vmul.f32 %v3397_v52, %v4260_v25  ;;  %v519_v55 = vpop.f32.mrb[7].mxu0  ;;  %3272 = vmatprep.subr.bf16.mxu0 %v3997_v47  ;;  %3465 = vmatprep.subr.bf16.mxu1 %v3997_v47 }
  0xf1   : > { %v677_v57 = vadd.f32 %v4271_v29, %v638_v51  ;;  %v639_v58 = vmul.f32 %v4260_v25, %v519_v55  ;;  %v3998_v51 = vld [vmem:[%s5290_s4 + $0x38] sm:$0xff]  }
  0xf2   : > { %v711_v60 = vmax.f32 %v679_v53, 0.0  ;;  %v680_v61 = vadd.f32 %v4271_v29, %v641_v54  ;;  %3273 = vmatpush3.bf16.msra.mxu0 %v3998_v51  ;;  %3473 = vmatpush3.bf16.msra.mxu1 %v3998_v51 }
  0xf3   : > { %v709_v62 = vmax.f32 %v677_v57, 0.0  ;;  %v678_v63 = vadd.f32 %v4271_v29, %v639_v58  ;;  %v4309_v1 = vld [vmem:[#allocation2 + $0x47] sm:$0xff]  ;;  %3422 = vmatprep.subr.bf16.mxu0 %v4380_v59 }
  0xf4   : > { %817 = vst.msk [vmem:[#allocation2 + $0x88] sm:$0xff] %vm737_vm1, %v711_v60  ;;  %v712_v0 = vmax.f32 %v680_v61, 0.0  ;;  %v879_v20 = vld [vmem:[#allocation2 + $0x48] sm:$0xff] }
  0xf5   : > { %815 = vst.msk [vmem:[#allocation2 + $0x68] sm:$0xff] %vm737_vm1, %v709_v62  ;;  %v710_v3 = vmax.f32 %v678_v63, 0.0  ;;  %v1005_v4 = vld [vmem:[#allocation2 + $0x49] sm:$0xff]  ;;  %v1006_v5 = vld [vmem:[#allocation2 + $0x51] sm:$0xff]  ;;  %v3400_v7 = vpop.f32.mrb[8].mxu0 }
  0xf6   : > { %v4315_v6 = vld [vmem:[#allocation2 + $0x4f] sm:$0xff]  ;;  %818 = vst.msk [vmem:[#allocation2 + $0x90] sm:$0xff] %vm737_vm1, %v712_v0  ;;  %v3496_v8 = vpack.i.bf16 %v1006_v5, %v1005_v4  ;;  %v644_v10 = vmul.f32 %v3400_v7, %v4260_v25  ;;  %v532_v11 = vpop.f32.mrb[9].mxu0 }
  0xf7   : > { %v3501_v9 = vpack.i.bf16 %v4315_v6, %v4309_v1  ;;  %816 = vst.msk [vmem:[#allocation2 + $0x70] sm:$0xff] %vm737_vm1, %v710_v3  ;;  %v880_v12 = vld [vmem:[#allocation2 + $0x50] sm:$0xff]  ;;  %v642_v13 = vmul.f32 %v4260_v25, %v532_v11  ;;  %v3401_v14 = vpop.f32.mrb[10].mxu0  ;;  %v4348_v34 = vld [vmem:[#allocation2 + $0x28] sm:$0xff] }
  0xf8   : > { %3497 = vrot.lane.b32.xlu0 %v3496_v8, %s4012_s9  ;;  %v683_v16 = vadd.f32 %v4271_v29, %v644_v10  ;;  %v645_v17 = vmul.f32 %v3401_v14, %v4260_v25  ;;  %v535_v18 = vpop.f32.mrb[11].mxu0  ;;  %v3506_v24 = vpack.i.bf16 %v880_v12, %v879_v20  ;;  %v4339_v28 = vld [vmem:[#allocation2 + $0x30] sm:$0xff]  ;;  %v4402_v14 = vld [vmem:[#allocation2 + $0x27] sm:$0xff] }
  0xf9   : > { %3502 = vrot.lane.b32.xlu1 %v3501_v9, %s4014_s17  ;;  %v681_v21 = vadd.f32 %v4271_v29, %v642_v13  ;;  %v643_v22 = vmul.f32 %v4260_v25, %v535_v18  ;;  %v3526_v37 = vpack.i.bf16 %v4339_v28, %v4348_v34  ;;  %v1003_v40 = vld [vmem:[#allocation2 + $0x29] sm:$0xff]  ;;  %v1004_v41 = vld [vmem:[#allocation2 + $0x31] sm:$0xff] }
  0xfa   : > { %v715_v26 = vmax.f32 %v683_v16, 0.0  ;;  %v684_v27 = vadd.f32 %v4271_v29, %v645_v17  ;;  %v3536_v52 = vpack.i.bf16 %v1004_v41, %v1003_v40  ;;  %v4383_v0 = vld [vmem:[#allocation2 + $0x2f] sm:$0xff] }
  0xfb   : > { %v713_v30 = vmax.f32 %v681_v21, 0.0  ;;  %v682_v31 = vadd.f32 %v4271_v29, %v643_v22  ;;  %v1040_v54 = vld [vmem:[#allocation2 + $0x87] sm:$0xff]  ;;  %v3541_v18 = vpack.i.bf16 %v4383_v0, %v4402_v14 }
  0xfc   : > { %3517 = vrot.lane.b32.xlu0 %v3501_v9, %s4013_s10  ;;  %821 = vst.msk [vmem:[#allocation2 + $0xc8] sm:$0xff] %vm737_vm1, %v715_v26  ;;  %v716_v32 = vmax.f32 %v684_v27, 0.0  ;;  %v4385_v2 = vld [vmem:[#allocation2 + $0x88] sm:$0xff] }
  0xfd   : > { %3507 = vrot.lane.b32.xlu1 %v3506_v24, %s4012_s9  ;;  %819 = vst.msk [vmem:[#allocation2 + $0xa8] sm:$0xff] %vm737_vm1, %v713_v30  ;;  %v714_v35 = vmax.f32 %v682_v31, 0.0  ;;  %v3404_v36 = vpop.f32.mrb[12].mxu0  ;;  %v1041_v55 = vld [vmem:[#allocation2 + $0x8f] sm:$0xff] }
  0xfe   : > { %822 = vst.msk [vmem:[#allocation2 + $0xd0] sm:$0xff] %vm737_vm1, %v716_v32  ;;  %v648_v38 = vmul.f32 %v3404_v36, %v4260_v25  ;;  %v548_v39 = vpop.f32.mrb[13].mxu0  ;;  %v3546_v63 = vpack.i.bf16 %v1041_v55, %v1040_v54  ;;  %v4389_v5 = vld [vmem:[#allocation2 + $0x90] sm:$0xff]  ;;  %v1070_v36 = vld [vmem:[#allocation2 + $0x68] sm:$0xff] }
  0xff   : > { %820 = vst.msk [vmem:[#allocation2 + $0xb0] sm:$0xff] %vm737_vm1, %v714_v35  ;;  %v646_v42 = vmul.f32 %v4260_v25, %v548_v39  ;;  %v3405_v43 = vpop.f32.mrb[14].mxu0  ;;  %v3551_v19 = vpack.i.bf16 %v4389_v5, %v4385_v2  ;;  %v1009_v22 = vld [vmem:[#allocation2 + $0x89] sm:$0xff]  ;;  %v1010_v23 = vld [vmem:[#allocation2 + $0x91] sm:$0xff] }
 0x100   : > { %3527 = vrot.lane.b32.xlu0 %v3526_v37, %s4012_s9  ;;  %v687_v45 = vadd.f32 %v4271_v29, %v648_v38  ;;  %v551_v46 = vpop.f32.mrb[15].mxu0  ;;  %v649_v49 = vmul.f32 %v3405_v43, %v4260_v25  ;;  %v3556_v32 = vpack.i.bf16 %v1010_v23, %v1009_v22  ;;  %v1071_v37 = vld [vmem:[#allocation2 + $0x70] sm:$0xff] }
 0x101   : > { %3512 = vrot.lane.b32.xlu1 %v3496_v8, %s4013_s10  ;;  %v685_v48 = vadd.f32 %v4271_v29, %v646_v42  ;;  %v647_v50 = vmul.f32 %v4260_v25, %v551_v46  ;;  %v4431_v46 = vpack.i.bf16 %v1071_v37, %v1070_v36 }
 0x102   : > { %v719_v53 = vmax.f32 %v687_v45, 0.0  ;;  %v688_v57 = vadd.f32 %v4271_v29, %v649_v49  ;;  %v1007_v49 = vld [vmem:[#allocation2 + $0x69] sm:$0xff] }
 0x103   : > { %v717_v56 = vmax.f32 %v685_v48, 0.0  ;;  %v686_v58 = vadd.f32 %v4271_v29, %v647_v50  ;;  %v1008_v50 = vld [vmem:[#allocation2 + $0x71] sm:$0xff] }
 0x104   : > { %3537 = vrot.lane.b32.xlu0 %v3536_v52, %s4012_s9  ;;  %825 = vst.msk [vmem:[#allocation2 + $0x108] sm:$0xff] %vm737_vm1, %v719_v53  ;;  %v720_v60 = vmax.f32 %v688_v57, 0.0  ;;  %v4443_v57 = vpack.i.bf16 %v1008_v50, %v1007_v49 }
 0x105   : > { %3522 = vrot.lane.b32.xlu1 %v3506_v24, %s4014_s17  ;;  %823 = vst.msk [vmem:[#allocation2 + $0xe8] sm:$0xff] %vm737_vm1, %v717_v56  ;;  %v718_v61 = vmax.f32 %v686_v58, 0.0  ;;  %v3408_v62 = vpop.f32.mrb[16].mxu0  ;;  %v1038_v58 = vld [vmem:[#allocation2 + $0x67] sm:$0xff] }
 0x106   : > { %v652_v3 = vmul.f32 %v3408_v62, %v4260_v25  ;;  %v564_v4 = vpop.f32.mrb[17].mxu0  ;;  %826 = vst.msk [vmem:[#allocation2 + $0x110] sm:$0xff] %vm737_vm1, %v720_v60  ;;  %v4393_v7 = vld [vmem:[#allocation2 + $0xa9] sm:$0xff]  ;;  %v4395_v8 = vld [vmem:[#allocation2 + $0xb1] sm:$0xff] }
 0x107   : > { %824 = vst.msk [vmem:[#allocation2 + $0xf0] sm:$0xff] %vm737_vm1, %v718_v61  ;;  %v650_v9 = vmul.f32 %v4260_v25, %v564_v4  ;;  %v3409_v10 = vpop.f32.mrb[18].mxu0  ;;  %v2141_v17 = vpack.c.bf16 %v4395_v8, %v4393_v7  ;;  %v1039_v60 = vld [vmem:[#allocation2 + $0x6f] sm:$0xff]  ;;  %v1044_v61 = vld [vmem:[#allocation2 + $0xc7] sm:$0xff] }
 0x108   : > { %3547 = vrot.lane.b32.xlu0 %v3546_v63, %s4013_s10  ;;  %v691_v11 = vadd.f32 %v4271_v29, %v652_v3  ;;  %v653_v12 = vmul.f32 %v3409_v10, %v4260_v25  ;;  %v567_v13 = vpop.f32.mrb[19].mxu0  ;;  %v1045_v4 = vld [vmem:[#allocation2 + $0xcf] sm:$0xff] }
 0x109   : > { %3532 = vrot.lane.b32.xlu1 %v3536_v52, %s4013_s10  ;;  %v689_v15 = vadd.f32 %v4271_v29, %v650_v9  ;;  %v651_v16 = vmul.f32 %v4260_v25, %v567_v13  ;;  %v3606_v22 = vpack.i.bf16 %v1045_v4, %v1044_v61 }
 0x10a   : > { %v723_v20 = vmax.f32 %v691_v11, 0.0  ;;  %v692_v21 = vadd.f32 %v4271_v29, %v653_v12 }
 0x10b   : > { %v721_v24 = vmax.f32 %v689_v15, 0.0  ;;  %v690_v26 = vadd.f32 %v4271_v29, %v651_v16  ;;  %v1048_v4 = vld [vmem:[#allocation2 + $0x107] sm:$0xff] }
 0x10c   : > { %3552 = vrot.lane.b32.xlu0 %v3551_v19, %s4014_s17  ;;  %829 = vst.msk [vmem:[#allocation2 + $0x148] sm:$0xff] %vm737_vm1, %v723_v20  ;;  %v724_v27 = vmax.f32 %v692_v21, 0.0  ;;  %v3576_v21 = vpack.i.bf16 %v1039_v60, %v1038_v58 }
 0x10d   : > { %3542 = vrot.lane.b32.xlu1 %v3541_v18, %s4014_s17  ;;  %827 = vst.msk [vmem:[#allocation2 + $0x128] sm:$0xff] %vm737_vm1, %v721_v24  ;;  %v722_v30 = vmax.f32 %v690_v26, 0.0  ;;  %v3412_v31 = vpop.f32.mrb[20].mxu0  ;;  %v1076_v26 = vld [vmem:[#allocation2 + $0xc8] sm:$0xff] }
 0x10e   : > { %830 = vst.msk [vmem:[#allocation2 + $0x150] sm:$0xff] %vm737_vm1, %v724_v27  ;;  %v656_v33 = vmul.f32 %v3412_v31, %v4260_v25  ;;  %v580_v35 = vpop.f32.mrb[21].mxu0  ;;  %v4424_v40 = vld [vmem:[#allocation2 + $0xe9] sm:$0xff]  ;;  %v4426_v41 = vld [vmem:[#allocation2 + $0xf1] sm:$0xff] }
 0x10f   : > { %828 = vst.msk [vmem:[#allocation2 + $0x130] sm:$0xff] %vm737_vm1, %v722_v30  ;;  %v654_v38 = vmul.f32 %v4260_v25, %v580_v35  ;;  %v3413_v39 = vpop.f32.mrb[22].mxu0  ;;  %v2147_v48 = vpack.c.bf16 %v4426_v41, %v4424_v40  ;;  %v1077_v27 = vld [vmem:[#allocation2 + $0xd0] sm:$0xff] }
 0x110   : > { %3557 = vrot.lane.b32.xlu0 %v3556_v32, %s4012_s9  ;;  %v583_v42 = vpop.f32.mrb[23].mxu0  ;;  %v695_v43 = vadd.f32 %v4271_v29, %v656_v33  ;;  %v657_v45 = vmul.f32 %v3413_v39, %v4260_v25  ;;  %v3611_v36 = vpack.i.bf16 %v1077_v27, %v1076_v26  ;;  %v1013_v39 = vld [vmem:[#allocation2 + $0xc9] sm:$0xff] }
 0x111   : > { %3562 = vrot.lane.b32.xlu1 %v3546_v63, %s4014_s17  ;;  %v693_v44 = vadd.f32 %v4271_v29, %v654_v38  ;;  %v655_v47 = vmul.f32 %v4260_v25, %v583_v42  ;;  %v1014_v42 = vld [vmem:[#allocation2 + $0xd1] sm:$0xff] }
 0x112   : > { %v727_v51 = vmax.f32 %v695_v43, 0.0  ;;  %v696_v53 = vadd.f32 %v4271_v29, %v657_v45  ;;  %v1079_v26 = vld [vmem:[#allocation2 + $0xf0] sm:$0xff] }
 0x113   : > { %v725_v52 = vmax.f32 %v693_v44, 0.0  ;;  %v694_v54 = vadd.f32 %v4271_v29, %v655_v47 }
 0x114   : > { %3582 = vrot.lane.b32.xlu0 %v4431_v46, %s4014_s17  ;;  %833 = vst.msk [vmem:[#allocation2 + $0x188] sm:$0xff] %vm737_vm1, %v727_v51  ;;  %v728_v55 = vmax.f32 %v696_v53, 0.0  ;;  %v3616_v51 = vpack.i.bf16 %v1014_v42, %v1013_v39  ;;  %v1042_v53 = vld [vmem:[#allocation2 + $0xa7] sm:$0xff] }
 0x115   : > { %3567 = vrot.lane.b32.xlu1 %v3551_v19, %s4012_s9  ;;  %831 = vst.msk [vmem:[#allocation2 + $0x168] sm:$0xff] %vm737_vm1, %v725_v52  ;;  %v3416_v56 = vpop.f32.mrb[24].mxu0  ;;  %v726_v62 = vmax.f32 %v694_v54, 0.0  ;;  %v1043_v54 = vld [vmem:[#allocation2 + $0xaf] sm:$0xff] }
 0x116   : > { %v660_v63 = vmul.f32 %v3416_v56, %v4260_v25  ;;  %v596_v3 = vpop.f32.mrb[25].mxu0  ;;  %834 = vst.msk [vmem:[#allocation2 + $0x190] sm:$0xff] %vm737_vm1, %v728_v55  ;;  %v4447_v9 = vld [vmem:[#allocation2 + $0x129] sm:$0xff]  ;;  %v4449_v10 = vld [vmem:[#allocation2 + $0x131] sm:$0xff] }
 0x117   : > { %v658_v11 = vmul.f32 %v4260_v25, %v596_v3  ;;  %v3417_v12 = vpop.f32.mrb[26].mxu0  ;;  %832 = vst.msk [vmem:[#allocation2 + $0x170] sm:$0xff] %vm737_vm1, %v726_v62  ;;  %v2153_v20 = vpack.c.bf16 %v4449_v10, %v4447_v9  ;;  %v3636_v62 = vpack.i.bf16 %v1043_v54, %v1042_v53  ;;  %v1075_v3 = vld [vmem:[#allocation2 + $0xb0] sm:$0xff] }
 0x118   : > { %3587 = vrot.lane.b32.xlu0 %v4443_v57, %s4012_s9  ;;  %v699_v13 = vadd.f32 %v4271_v29, %v660_v63  ;;  %v661_v15 = vmul.f32 %v3417_v12, %v4260_v25  ;;  %v599_v16 = vpop.f32.mrb[27].mxu0  ;;  %v1074_v63 = vld [vmem:[#allocation2 + $0xa8] sm:$0xff]  ;;  %v1022_v39 = vld [vmem:[#allocation2 + $0x151] sm:$0xff] }
 0x119   : > { %3572 = vrot.lane.b32.xlu1 %v3556_v32, %s4013_s10  ;;  %v697_v18 = vadd.f32 %v4271_v29, %v658_v11  ;;  %v659_v19 = vmul.f32 %v4260_v25, %v599_v16  ;;  %v1049_v11 = vld [vmem:[#allocation2 + $0x10f] sm:$0xff] }
 0x11a   : > { %v731_v23 = vmax.f32 %v699_v13, 0.0  ;;  %v700_v24 = vadd.f32 %v4271_v29, %v661_v15  ;;  %v3666_v12 = vpack.i.bf16 %v1049_v11, %v1048_v4  ;;  %v1081_v13 = vld [vmem:[#allocation2 + $0x110] sm:$0xff] }
 0x11b   : > { %v729_v30 = vmax.f32 %v697_v18, 0.0  ;;  %v698_v31 = vadd.f32 %v4271_v29, %v659_v19  ;;  %v1017_v16 = vld [vmem:[#allocation2 + $0x109] sm:$0xff]  ;;  %v1018_v18 = vld [vmem:[#allocation2 + $0x111] sm:$0xff] }
 0x11c   : > { %3607 = vrot.lane.b32.xlu0 %v3606_v22, %s4013_s10  ;;  %837 = vst.msk [vmem:[#allocation2 + $0x1c8] sm:$0xff] %vm737_vm1, %v731_v23  ;;  %v732_v32 = vmax.f32 %v700_v24, 0.0  ;;  %v3676_v19 = vpack.i.bf16 %v1018_v18, %v1017_v16  ;;  %v1078_v24 = vld [vmem:[#allocation2 + $0xe8] sm:$0xff] }
 0x11d   : > { %3577 = vrot.lane.b32.xlu1 %v3576_v21, %s4013_s10  ;;  %835 = vst.msk [vmem:[#allocation2 + $0x1a8] sm:$0xff] %vm737_vm1, %v729_v30  ;;  %v730_v33 = vmax.f32 %v698_v31, 0.0  ;;  %v3420_v35 = vpop.f32.mrb[28].mxu0  ;;  %v3701_v27 = vpack.i.bf16 %v1079_v26, %v1078_v24  ;;  %v3706_v30 = vpack.i.bf16 %v4426_v41, %v4424_v40  ;;  %v1052_v31 = vld [vmem:[#allocation2 + $0x147] sm:$0xff]  ;;  %v1057_v54 = vld [vmem:[#allocation2 + $0x18f] sm:$0xff] }
 0x11e   : > { %838 = vst.msk [vmem:[#allocation2 + $0x1d0] sm:$0xff] %vm737_vm1, %v732_v32  ;;  %v664_v37 = vmul.f32 %v3420_v35, %v4260_v25  ;;  %v612_v38 = vpop.f32.mrb[29].mxu0  ;;  %v1053_v32 = vld [vmem:[#allocation2 + $0x14f] sm:$0xff]  ;;  %v1056_v53 = vld [vmem:[#allocation2 + $0x187] sm:$0xff] }
 0x11f   : > { %836 = vst.msk [vmem:[#allocation2 + $0x1b0] sm:$0xff] %vm737_vm1, %v730_v33  ;;  %v662_v43 = vmul.f32 %v4260_v25, %v612_v38  ;;  %v3421_v44 = vpop.f32.mrb[30].mxu0  ;;  %v3726_v33 = vpack.i.bf16 %v1053_v32, %v1052_v31  ;;  %v1084_v35 = vld [vmem:[#allocation2 + $0x148] sm:$0xff]  ;;  %v1087_v18 = vld [vmem:[#allocation2 + $0x170] sm:$0xff] }
 0x120   : > { %3612 = vrot.lane.b32.xlu0 %v3611_v36, %s4014_s17  ;;  %v615_v45 = vpop.f32.mrb[31].mxu0  ;;  %v703_v47 = vadd.f32 %v4271_v29, %v664_v37  ;;  %v665_v50 = vmul.f32 %v3421_v44, %v4260_v25  ;;  %v1021_v38 = vld [vmem:[#allocation2 + $0x149] sm:$0xff]  ;;  %v4556_v24 = vld [vmem:[#allocation2 + $0x171] sm:$0xff] }
 0x121   : > { %3592 = vrot.lane.b32.xlu1 %v3576_v21, %s4014_s17  ;;  %v701_v49 = vadd.f32 %v4271_v29, %v662_v43  ;;  %v663_v52 = vmul.f32 %v4260_v25, %v615_v45  ;;  %v1046_v21 = vld [vmem:[#allocation2 + $0xe7] sm:$0xff]  ;;  %v3736_v42 = vpack.i.bf16 %v1022_v39, %v1021_v38  ;;  %v1051_v44 = vld [vmem:[#allocation2 + $0x12f] sm:$0xff] }
 0x122   : > { %v735_v55 = vmax.f32 %v703_v47, 0.0  ;;  %v704_v58 = vadd.f32 %v4271_v29, %v665_v50  ;;  %v1050_v43 = vld [vmem:[#allocation2 + $0x127] sm:$0xff]  ;;  %v844_v39 = vld [vmem:[#allocation2 + $0xf] sm:$0xff] }
 0x123   : > { %v733_v56 = vmax.f32 %v701_v49, 0.0  ;;  %v702_v60 = vadd.f32 %v4271_v29, %v663_v52  ;;  %v3646_v29 = vpack.i.bf16 %v4395_v8, %v4393_v7  ;;  %v3756_v45 = vpack.i.bf16 %v1051_v44, %v1050_v43  ;;  %v1082_v47 = vld [vmem:[#allocation2 + $0x128] sm:$0xff]  ;;  %v1083_v49 = vld [vmem:[#allocation2 + $0x130] sm:$0xff] }
 0x124   : > { %3617 = vrot.lane.b32.xlu0 %v3616_v51, %s4012_s9  ;;  %841 = vst.msk [vmem:[#allocation2 + $0x208] sm:$0xff] %vm737_vm1, %v735_v55  ;;  %v736_v61 = vmax.f32 %v704_v58, 0.0  ;;  %v3761_v50 = vpack.i.bf16 %v1083_v49, %v1082_v47  ;;  %v3766_v52 = vpack.i.bf16 %v4449_v10, %v4447_v9  ;;  %v1088_v58 = vld [vmem:[#allocation2 + $0x188] sm:$0xff] }
 0x125   : > { %3597 = vrot.lane.b32.xlu1 %v4431_v46, %s4012_s9  ;;  %839 = vst.msk [vmem:[#allocation2 + $0x1e8] sm:$0xff] %vm737_vm1, %v733_v56  ;;  %v734_v25 = vmax.f32 %v702_v60, 0.0  ;;  %v3641_v46 = vpack.i.bf16 %v1075_v3, %v1074_v63  ;;  %v3786_v56 = vpack.i.bf16 %v1057_v54, %v1056_v53  ;;  %v1089_v60 = vld [vmem:[#allocation2 + $0x190] sm:$0xff]  ;;  %v1054_v11 = vld [vmem:[#allocation2 + $0x167] sm:$0xff] }
 0x126   : > { %842 = vst.msk [vmem:[#allocation2 + $0x210] sm:$0xff] %vm737_vm1, %v736_v61  ;;  %v4536_v63 = vld [vmem:[#allocation2 + $0x189] sm:$0xff]  ;;  %v4538_v3 = vld [vmem:[#allocation2 + $0x191] sm:$0xff] }
 0x127   : > { %840 = vst.msk [vmem:[#allocation2 + $0x1f0] sm:$0xff] %vm737_vm1, %v734_v25  ;;  %v3791_v25 = vpack.i.bf16 %v1089_v60, %v1088_v58  ;;  %v3796_v4 = vpack.i.bf16 %v4538_v3, %v4536_v63  ;;  %v1086_v16 = vld [vmem:[#allocation2 + $0x168] sm:$0xff] }
 0x128   : > { %3637 = vrot.lane.b32.xlu0 %v3636_v62, %s4013_s10  ;;  %v843_v38 = vld [vmem:[#allocation2 + $0x7] sm:$0xff] }
 0x129   : > { %3602 = vrot.lane.b32.xlu1 %v4443_v57, %s4013_s10  ;;  %v1080_v57 = vld [vmem:[#allocation2 + $0x108] sm:$0xff] }
 0x12a   : > { %v3671_v15 = vpack.i.bf16 %v1081_v13, %v1080_v57 }
 0x12c   : > { %3642 = vrot.lane.b32.xlu0 %v3641_v46, %s4014_s17 }
 0x12d   : > { %3622 = vrot.lane.b32.xlu1 %v3606_v22, %s4014_s17  ;;  %v1047_v22 = vld [vmem:[#allocation2 + $0xef] sm:$0xff] }
 0x12e   : > { %v3696_v23 = vpack.i.bf16 %v1047_v22, %v1046_v21  ;;  %v3821_v22 = vpack.i.bf16 %v1087_v18, %v1086_v16  ;;  %v1093_v16 = vld [vmem:[#allocation2 + $0x1d0] sm:$0xff] }
 0x130   : > { %3647 = vrot.lane.b32.xlu0 %v3646_v29, %s4012_s9 }
 0x131   : > { %3627 = vrot.lane.b32.xlu1 %v3611_v36, %s4012_s9  ;;  %v1085_v36 = vld [vmem:[#allocation2 + $0x150] sm:$0xff] }
 0x132   : > { %v3731_v37 = vpack.i.bf16 %v1085_v36, %v1084_v35 }
 0x134   : > { %3667 = vrot.lane.b32.xlu0 %v3666_v12, %s4013_s10 }
 0x135   : > { %3632 = vrot.lane.b32.xlu1 %v3616_v51, %s4013_s10  ;;  %v4520_v51 = vpop.permute.xlu1 %3487 }
 0x136   : > { %v3490_v26 = vunpack.i.h.bf16 %v4520_v51  ;;  %v3489_v31 = vunpack.i.l.bf16 %v4520_v51 }
 0x138   : > { %3672 = vrot.lane.b32.xlu0 %v3671_v15, %s4014_s17  ;;  %v1900_v54 = vsel %vm737_vm1, %v843_v38, %v3489_v31 }
 0x139   : > { %3652 = vrot.lane.b32.xlu1 %v3636_v62, %s4014_s17  ;;  %v4528_v55 = vpop.permute.xlu1 %3492 }
 0x13a   : > { %v3494_v51 = vunpack.i.l.bf16 %v4528_v55 }
 0x13c   : > { %3677 = vrot.lane.b32.xlu0 %v3676_v19, %s4012_s9 }
 0x13d   : > { %3657 = vrot.lane.b32.xlu1 %v3641_v46, %s4012_s9 }
 0x140   : > { %3697 = vrot.lane.b32.xlu0 %v3696_v23, %s4013_s10 }
 0x141   : > { %3662 = vrot.lane.b32.xlu1 %v3646_v29, %s4013_s10 }
 0x144   : > { %3702 = vrot.lane.b32.xlu0 %v3701_v27, %s4014_s17 }
 0x145   : > { %3682 = vrot.lane.b32.xlu1 %v3666_v12, %s4014_s17  ;;  %v1055_v12 = vld [vmem:[#allocation2 + $0x16f] sm:$0xff] }
 0x148   : > { %3707 = vrot.lane.b32.xlu0 %v3706_v30, %s4012_s9 }
 0x149   : > { %3687 = vrot.lane.b32.xlu1 %v3671_v15, %s4012_s9  ;;  %v3816_v15 = vpack.i.bf16 %v1055_v12, %v1054_v11 }
 0x14c   : > { %3717 = vrot.lane.b32.xlu0 %v3701_v27, %s4012_s9 }
 0x14d   : > { %3692 = vrot.lane.b32.xlu1 %v3676_v19, %s4013_s10 }
 0x150   : > { %3727 = vrot.lane.b32.xlu0 %v3726_v33, %s4013_s10 }
 0x151   : > { %3712 = vrot.lane.b32.xlu1 %v3696_v23, %s4014_s17  ;;  %v4554_v23 = vld [vmem:[#allocation2 + $0x169] sm:$0xff] }
 0x154   : > { %3732 = vrot.lane.b32.xlu0 %v3731_v37, %s4014_s17 }
 0x155   : > { %3722 = vrot.lane.b32.xlu1 %v3706_v30, %s4013_s10 }
 0x158   : > { %3737 = vrot.lane.b32.xlu0 %v3736_v42, %s4012_s9 }
 0x159   : > { %3742 = vrot.lane.b32.xlu1 %v3726_v33, %s4014_s17 }
 0x15c   : > { %3757 = vrot.lane.b32.xlu0 %v3756_v45, %s4013_s10 }
 0x15d   : > { %3747 = vrot.lane.b32.xlu1 %v3731_v37, %s4012_s9  ;;  %v3826_v37 = vpack.i.bf16 %v4556_v24, %v4554_v23 }
 0x160   : > { %3762 = vrot.lane.b32.xlu0 %v3761_v50, %s4014_s17 }
 0x161   : > { %3752 = vrot.lane.b32.xlu1 %v3736_v42, %s4013_s10 }
 0x164   : > { %3767 = vrot.lane.b32.xlu0 %v3766_v52, %s4012_s9 }
 0x165   : > { %3772 = vrot.lane.b32.xlu1 %v3756_v45, %s4014_s17 }
 0x168   : > { %3787 = vrot.lane.b32.xlu0 %v3786_v56, %s4013_s10 }
 0x169   : > { %3777 = vrot.lane.b32.xlu1 %v3761_v50, %s4012_s9  ;;  %v1061_v50 = vld [vmem:[#allocation2 + $0x1cf] sm:$0xff] }
 0x16a   : > { %v4532_v61 = vpop.permute.xlu0 %3497 }
 0x16b   : > { %v4534_v62 = vpop.permute.xlu1 %3502 }
 0x16c   : > { %3792 = vrot.lane.b32.xlu0 %v3791_v25, %s4014_s17 }
 0x16d   : > { %3782 = vrot.lane.b32.xlu1 %v3766_v52, %s4013_s10 }
 0x16e   : > { %v3518_v46 = vpop.permute.xlu0 %3517 }
 0x16f   : > { %v4542_v29 = vpop.permute.xlu1 %3507  ;;  %v3520_v32 = vunpack.i.h.bf16 %v3518_v46  ;;  %v3519_v33 = vunpack.i.l.bf16 %v3518_v46 }
 0x170   : > { %3797 = vrot.lane.b32.xlu0 %v3796_v4, %s4012_s9 }
 0x171   : > { %3802 = vrot.lane.b32.xlu1 %v3786_v56, %s4014_s17  ;;  %v1901_v56 = vsel %vm737_vm1, %v844_v39, %v3490_v26  ;;  %v1101_v26 = vld [vmem:[#allocation2 + $0x51] sm:$0xff] }
 0x172   : > { %v4550_v13 = vpop.permute.xlu0 %3527 }
 0x173   : > { %v4548_v57 = vpop.permute.xlu1 %3512 }
 0x174   : > { %3817 = vrot.lane.b32.xlu0 %v3816_v15, %s4013_s10 }
 0x175   : > { %3807 = vrot.lane.b32.xlu1 %v3791_v25, %s4012_s9 }
 0x176   : > { %v3538_v21 = vpop.permute.xlu0 %3537 }
 0x177   : > { %v3523_v19 = vpop.permute.xlu1 %3522  ;;  %v3540_v27 = vunpack.i.h.bf16 %v3538_v21  ;;  %v3539_v30 = vunpack.i.l.bf16 %v3538_v21  ;;  %v1100_v21 = vld [vmem:[#allocation2 + $0x49] sm:$0xff] }
 0x178   : > { %3822 = vrot.lane.b32.xlu0 %v3821_v22, %s4014_s17  ;;  %v3525_v42 = vunpack.i.h.bf16 %v3523_v19  ;;  %v3524_v43 = vunpack.i.l.bf16 %v3523_v19 }
 0x179   : > { %3812 = vrot.lane.b32.xlu1 %v3796_v4, %s4013_s10  ;;  %v1999_v35 = vsel %vm737_vm1, %v4339_v28, %v3540_v27  ;;  %v1998_v36 = vsel %vm737_vm1, %v4348_v34, %v3539_v30  ;;  %v1060_v28 = vld [vmem:[#allocation2 + $0x1c7] sm:$0xff]  ;;  %v3495_v34 = vunpack.i.h.bf16 %v4528_v55  ;;  %v1933_v55 = vsel %vm1932_vm2, %v1900_v54, %v3494_v51 }
 0x17a   : > { %v4570_v45 = vpop.permute.xlu0 %3547  ;;  %v2030_v47 = vsel %vm1932_vm2, %v1998_v36, %v3519_v33  ;;  %v2031_v49 = vsel %vm1932_vm2, %v1999_v35, %v3520_v32  ;;  %v3846_v46 = vpack.i.bf16 %v1061_v50, %v1060_v28  ;;  %v4000_v32 = vld [vmem:[%s5290_s4 + $0x88] sm:$0xff]   ;;  %v2132_v33 = vpack.c.bf16 %v1101_v26, %v1100_v21  ;;  %v4600_v36 = vld [vmem:[#allocation2 + $0x1d1] sm:$0xff] }
 0x17b   : > { %v4568_v44 = vpop.permute.xlu1 %3532  ;;  %v2062_v52 = vsel %vm1965_vm3, %v2030_v47, %v3524_v43  ;;  %v2063_v53 = vsel %vm1965_vm3, %v2031_v49, %v3525_v42  ;;  %v1934_v12 = vsel %vm1932_vm2, %v1901_v56, %v3495_v34  ;;  %v4598_v35 = vld [vmem:[#allocation2 + $0x1c9] sm:$0xff]  ;;  %v1103_v43 = vld [vmem:[#allocation2 + $0x71] sm:$0xff]  ;;  %v3499_v50 = vunpack.i.l.bf16 %v4532_v61 }
 0x17c   : > { %3827 = vrot.lane.b32.xlu0 %v3826_v37, %s4012_s9  ;;  %v2131_v58 = vpack.c.bf16 %v2063_v53, %v2062_v52  ;;  %v1102_v42 = vld [vmem:[#allocation2 + $0x69] sm:$0xff]  ;;  %v1105_v34 = vld [vmem:[#allocation2 + $0x91] sm:$0xff]  ;;  %v3530_v53 = vunpack.i.h.bf16 %v4550_v13  ;;  %v3529_v54 = vunpack.i.l.bf16 %v4550_v13 }
 0x17d   : > { %3832 = vrot.lane.b32.xlu1 %v3816_v15, %s4014_s17  ;;  %v1092_v15 = vld [vmem:[#allocation2 + $0x1c8] sm:$0xff]  ;;  %v4620_v52 = vld [vmem:[#allocation2 + $0x1b0] sm:$0xff] }
 0x17e   : > { %v4582_v25 = vpop.permute.xlu0 %3552  ;;  %2366 = vmatprep.mubr.bf16.mxu0 %v2131_v58  ;;  %v1058_v47 = vld [vmem:[#allocation2 + $0x1a7] sm:$0xff]  ;;  %v1059_v49 = vld [vmem:[#allocation2 + $0x1af] sm:$0xff] }
 0x17f   : > { %v3543_v60 = vpop.permute.xlu1 %3542  ;;  %v1104_v28 = vld [vmem:[#allocation2 + $0x89] sm:$0xff] }
 0x180   : > { %v3545_v4 = vunpack.i.h.bf16 %v3543_v60  ;;  %v3544_v11 = vunpack.i.l.bf16 %v3543_v60  ;;  %3847 = vrot.lane.b32.xlu0 %v3846_v46, %s4013_s10  ;;  %v4618_v51 = vld [vmem:[#allocation2 + $0x1a8] sm:$0xff]  ;;  %v2135_v60 = vpack.c.bf16 %v1103_v43, %v1102_v42  ;;  %v2138_v13 = vpack.c.bf16 %v1105_v34, %v1104_v28  ;;  %v974_v26 = vld [vmem:[#allocation2 + $0x50] sm:$0xff] }
 0x181   : > { %3837 = vrot.lane.b32.xlu1 %v3821_v22, %s4012_s9  ;;  %v3851_v22 = vpack.i.bf16 %v1093_v16, %v1092_v15  ;;  %v3505_v15 = vunpack.i.h.bf16 %v4534_v62  ;;  %v3504_v16 = vunpack.i.l.bf16 %v4534_v62  ;;  %v3876_v21 = vpack.i.bf16 %v4620_v52, %v4618_v51 }
 0x182   : > { %v1967_v18 = vsel %vm1965_vm3, %v1934_v12, %v3545_v4  ;;  %v1966_v19 = vsel %vm1965_vm3, %v1933_v55, %v3544_v11  ;;  %v4590_v30 = vpop.permute.xlu0 %3557  ;;  %v3534_v4 = vunpack.i.l.bf16 %v4568_v44  ;;  %v973_v12 = vld [vmem:[#allocation2 + $0x48] sm:$0xff]  ;;  %v3550_v42 = vunpack.i.h.bf16 %v4570_v45 }
 0x183   : > { %v2130_v27 = vpack.c.bf16 %v1967_v18, %v1966_v19  ;;  %v4592_v31 = vpop.permute.xlu1 %3562  ;;  %v975_v18 = vld [vmem:[#allocation2 + $0x68] sm:$0xff]  ;;  %v976_v19 = vld [vmem:[#allocation2 + $0x70] sm:$0xff]  ;;  %v3549_v43 = vunpack.i.l.bf16 %v4570_v45 }
 0x184   : > { %3852 = vrot.lane.b32.xlu0 %v3851_v22, %s4014_s17  ;;  %v4655_v45 = vld [vmem:[#allocation2 + $0x1b1] sm:$0xff] }
 0x185   : > { %2367 = vmatmul.mubr.bf16.vlgmr.msra.gmra.mrb[32].mxu0 %v2130_v27  ;;  %3842 = vrot.lane.b32.xlu1 %v3826_v37, %s4013_s10  ;;  %v4611_v37 = vpack.i.bf16 %v4600_v36, %v4598_v35 }
 0x186   : > { %3423 = vmatpush3.bf16.msra.mxu0 %v4380_v59  ;;  %3426 = vmatprep.mubr.msk.bf16.mxu0 %vm737_vm1, %v2132_v33  ;;  %v4607_v39 = vpop.permute.xlu0 %3582  ;;  %v3500_v59 = vunpack.i.h.bf16 %v4532_v61  ;;  %v3535_v61 = vunpack.i.h.bf16 %v4568_v44  ;;  %v1902_v33 = vsel %vm737_vm1, %v4402_v14, %v3529_v54  ;;  %v1109_v54 = vld [vmem:[#allocation2 + $0xd1] sm:$0xff] }
 0x187   : > { %v4605_v38 = vpop.permute.xlu1 %3567  ;;  %3424 = vmatprep.subr.bf16.mxu0 %v4000_v32  ;;  %v1935_v28 = vsel %vm1932_vm2, %v1902_v33, %v3534_v4  ;;  %v3585_v14 = vunpack.i.h.bf16 %v4607_v39  ;;  %v3509_v33 = vunpack.i.l.bf16 %v4542_v29 }
 0x188   : > { %3857 = vrot.lane.b32.xlu0 %v4611_v37, %s4012_s9  ;;  %v2001_v62 = vsel %vm737_vm1, %v974_v26, %v3500_v59 }
 0x189   : > { %3862 = vrot.lane.b32.xlu1 %v3846_v46, %s4014_s17  ;;  %v3871_v46 = vpack.i.bf16 %v1059_v49, %v1058_v47 }
 0x18a   : > { %3425 = vmatpush3.bf16.msra.mxu0 %v4000_v32  ;;  %v3588_v58 = vpop.permute.xlu0 %3587  ;;  %v2000_v32 = vsel %vm737_vm1, %v973_v12, %v3499_v50 }
 0x18b   : > { %v4624_v56 = vpop.permute.xlu1 %3572  ;;  %v3590_v11 = vunpack.i.h.bf16 %v3588_v58  ;;  %v3589_v55 = vunpack.i.l.bf16 %v3588_v58  ;;  %v1108_v58 = vld [vmem:[#allocation2 + $0xc9] sm:$0xff] }
 0x18c   : > { %3872 = vrot.lane.b32.xlu0 %v3871_v46, %s4013_s10 }
 0x18d   : > { %3427 = vmatmul.mubr.msk.bf16.vlgmr.msra.gmra.mrb[36].mxu0 %vm737_vm1, %v2135_v60  ;;  %3867 = vrot.lane.b32.xlu1 %v3851_v22, %s4012_s9  ;;  %v2002_v44 = vsel %vm737_vm1, %v975_v18, %v3589_v55  ;;  %v2003_v27 = vsel %vm737_vm1, %v976_v19, %v3590_v11  ;;  %v1903_v22 = vsel %vm737_vm1, %v4383_v0, %v3530_v53  ;;  %v3584_v0 = vunpack.i.l.bf16 %v4607_v39  ;;  %v4653_v53 = vld [vmem:[#allocation2 + $0x1a9] sm:$0xff] }
 0x18e   : > { %3430 = vmatprep.mubr.msk.bf16.mxu0 %vm737_vm1, %v2138_v13  ;;  %v4646_v49 = vpop.permute.xlu0 %3607  ;;  %v1936_v50 = vsel %vm1932_vm2, %v1903_v22, %v3535_v61  ;;  %v2034_v60 = vsel %vm1932_vm2, %v2002_v44, %v3549_v43  ;;  %v2035_v4 = vsel %vm1932_vm2, %v2003_v27, %v3550_v42  ;;  %v3555_v61 = vunpack.i.h.bf16 %v4582_v25  ;;  %v1065_v22 = vld [vmem:[#allocation2 + $0x20f] sm:$0xff] }
 0x18f   : > { %v3578_v47 = vpop.permute.xlu1 %3577  ;;  %v3554_v11 = vunpack.i.l.bf16 %v4582_v25  ;;  %v1968_v13 = vsel %vm1965_vm3, %v1935_v28, %v3504_v16  ;;  %v1969_v26 = vsel %vm1965_vm3, %v1936_v50, %v3505_v15  ;;  %v3881_v25 = vpack.i.bf16 %v4655_v45, %v4653_v53  ;;  %v1064_v16 = vld [vmem:[#allocation2 + $0x207] sm:$0xff] }
 0x190   : > { %v3580_v59 = vunpack.i.h.bf16 %v3578_v47  ;;  %v3579_v34 = vunpack.i.l.bf16 %v3578_v47  ;;  %3877 = vrot.lane.b32.xlu0 %v3876_v21, %s4014_s17  ;;  %v2144_v44 = vpack.c.bf16 %v1109_v54, %v1108_v58  ;;  %v3515_v42 = vunpack.i.h.bf16 %v4548_v57 }
 0x191   : > { %3887 = vrot.lane.b32.xlu1 %v3871_v46, %s4014_s17  ;;  %v2066_v27 = vsel %vm1965_vm3, %v2034_v60, %v3554_v11  ;;  %v3514_v43 = vunpack.i.l.bf16 %v4548_v57  ;;  %v2133_v47 = vpack.c.bf16 %v1969_v26, %v1968_v13  ;;  %v1904_v50 = vsel %vm737_vm1, %v4309_v1, %v3509_v33  ;;  %v1112_v1 = vld [vmem:[#allocation2 + $0x109] sm:$0xff]  ;;  %v1113_v60 = vld [vmem:[#allocation2 + $0x111] sm:$0xff] }
 0x192   : > { %v2032_v55 = vsel %vm1932_vm2, %v2000_v32, %v3579_v34  ;;  %v2033_v39 = vsel %vm1932_vm2, %v2001_v62, %v3580_v59  ;;  %v4664_v12 = vpop.permute.xlu0 %3612  ;;  %v2067_v32 = vsel %vm1965_vm3, %v2035_v4, %v3555_v61  ;;  %v3510_v62 = vunpack.i.h.bf16 %v4542_v29  ;;  %v1096_v59 = vld [vmem:[#allocation2 + $0x208] sm:$0xff]  ;;  %v1097_v34 = vld [vmem:[#allocation2 + $0x210] sm:$0xff] }
 0x193   : > { %v3593_v46 = vpop.permute.xlu1 %3592  ;;  %v2064_v18 = vsel %vm1965_vm3, %v2032_v55, %v3584_v0  ;;  %v2065_v19 = vsel %vm1965_vm3, %v2033_v39, %v3585_v14  ;;  %v1937_v58 = vsel %vm1932_vm2, %v1904_v50, %v3514_v43  ;;  %v3560_v0 = vunpack.i.h.bf16 %v4590_v30 }
 0x194   : > { %v2134_v15 = vpack.c.bf16 %v2065_v19, %v2064_v18  ;;  %3882 = vrot.lane.b32.xlu0 %v3881_v25, %s4012_s9  ;;  %v3595_v29 = vunpack.i.h.bf16 %v3593_v46  ;;  %v3594_v28 = vunpack.i.l.bf16 %v3593_v46  ;;  %v1905_v57 = vsel %vm737_vm1, %v4315_v6, %v3510_v62  ;;  %v4702_v46 = vld [vmem:[#allocation2 + $0x1e7] sm:$0xff]  ;;  %v4704_v18 = vld [vmem:[#allocation2 + $0x1ef] sm:$0xff] }
 0x195   : > { %3431 = vmatmul.mubr.msk.bf16.gmra.mrb[40].mxu0 %vm737_vm1, %v2141_v17  ;;  %3892 = vrot.lane.b32.xlu1 %v3876_v21, %s4012_s9  ;;  %v2137_v17 = vpack.c.bf16 %v2067_v32, %v2066_v27  ;;  %v4687_v21 = vpack.i.bf16 %v1065_v22, %v1064_v16  ;;  %v1938_v14 = vsel %vm1932_vm2, %v1905_v57, %v3515_v42  ;;  %v3559_v54 = vunpack.i.l.bf16 %v4590_v30  ;;  %v849_v27 = vld [vmem:[#allocation2 + $0x67] sm:$0xff]  ;;  %v850_v32 = vld [vmem:[#allocation2 + $0x6f] sm:$0xff] }
 0x196   : > { %3434 = vmatprep.mubr.msk.bf16.mxu0 %vm737_vm1, %v2144_v44  ;;  %2374 = vmatprep.mubr.bf16.mxu1 %v2134_v15  ;;  %v4685_v8 = vpop.permute.xlu0 %3617  ;;  %v1970_v55 = vsel %vm1965_vm3, %v1937_v58, %v3594_v28  ;;  %v1971_v39 = vsel %vm1965_vm3, %v1938_v14, %v3595_v29  ;;  %v3911_v30 = vpack.i.bf16 %v1097_v34, %v1096_v59  ;;  %v1116_v59 = vld [vmem:[#allocation2 + $0x149] sm:$0xff]  ;;  %v1117_v34 = vld [vmem:[#allocation2 + $0x151] sm:$0xff] }
 0x197   : > { %v3598_v7 = vpop.permute.xlu1 %3597  ;;  %2375 = vmatmul.mubr.bf16.vlgmr.msra.gmra.mrb[0].mxu1 %v2133_v47  ;;  %v2150_v44 = vpack.c.bf16 %v1113_v60, %v1112_v1  ;;  %v2136_v62 = vpack.c.bf16 %v1971_v39, %v1970_v55  ;;  %v3916_v33 = vpack.i.bf16 %v4704_v18, %v4702_v46  ;;  %v2004_v15 = vsel %vm737_vm1, %v4385_v2, %v3559_v54  ;;  %v979_v1 = vld [vmem:[#allocation2 + $0xa8] sm:$0xff]  ;;  %v980_v55 = vld [vmem:[#allocation2 + $0xb0] sm:$0xff] }
 0x198   : > { %2382 = vmatprep.mubr.bf16.mxu1 %v2137_v17  ;;  %3907 = vrot.lane.b32.xlu0 %v4687_v21, %s4013_s10  ;;  %v3600_v4 = vunpack.i.h.bf16 %v3598_v7  ;;  %v3599_v6 = vunpack.i.l.bf16 %v3598_v7  ;;  %v2005_v40 = vsel %vm737_vm1, %v4389_v5, %v3560_v0  ;;  %v3565_v2 = vunpack.i.h.bf16 %v4592_v31  ;;  %v4731_v7 = vld [vmem:[#allocation2 + $0x1e8] sm:$0xff]  ;;  %v4733_v17 = vld [vmem:[#allocation2 + $0x1f0] sm:$0xff] }
 0x199   : > { %3897 = vrot.lane.b32.xlu1 %v3881_v25, %s4013_s10  ;;  %v3564_v5 = vunpack.i.l.bf16 %v4592_v31  ;;  %v2156_v39 = vpack.c.bf16 %v1117_v34, %v1116_v59 }
 0x19a   : > { %v3638_v11 = vpop.permute.xlu0 %3637  ;;  %v1906_v41 = vsel %vm737_vm1, %v849_v27, %v3599_v6  ;;  %v3921_v6 = vpack.i.bf16 %v4733_v17, %v4731_v7 }
 0x19b   : > { %v3603_v61 = vpop.permute.xlu1 %3602  ;;  %v3640_v26 = vunpack.i.h.bf16 %v3638_v11  ;;  %v3639_v25 = vunpack.i.l.bf16 %v3638_v11  ;;  %v3609_v11 = vunpack.i.l.bf16 %v4646_v49 }
 0x19c   : > { %v3605_v19 = vunpack.i.h.bf16 %v3603_v61  ;;  %v3604_v13 = vunpack.i.l.bf16 %v3603_v61  ;;  %3912 = vrot.lane.b32.xlu0 %v3911_v30, %s4014_s17  ;;  %v3610_v61 = vunpack.i.h.bf16 %v4646_v49  ;;  %v3615_v49 = vunpack.i.h.bf16 %v4664_v12 }
 0x19d   : > { %3435 = vmatmul.mubr.msk.bf16.gmra.mrb[44].mxu0 %vm737_vm1, %v2147_v48  ;;  %3902 = vrot.lane.b32.xlu1 %v4611_v37, %s4013_s10  ;;  %v1907_v48 = vsel %vm737_vm1, %v850_v32, %v3600_v4  ;;  %v2037_v29 = vsel %vm1932_vm2, %v2005_v40, %v3640_v26  ;;  %v2036_v28 = vsel %vm1932_vm2, %v2004_v15, %v3639_v25  ;;  %v3570_v32 = vunpack.i.h.bf16 %v4605_v38  ;;  %v4773_v15 = vld [vmem:[#allocation2 + $0x211] sm:$0xff] }
 0x19e   : > { %3438 = vmatprep.mubr.msk.bf16.mxu0 %vm737_vm1, %v2150_v44  ;;  %v3643_v16 = vpop.permute.xlu0 %3642  ;;  %v1939_v22 = vsel %vm1932_vm2, %v1906_v41, %v3604_v13  ;;  %v1940_v42 = vsel %vm1932_vm2, %v1907_v48, %v3605_v19  ;;  %v4750_v19 = vld [vmem:[#allocation2 + $0x1e9] sm:$0xff]  ;;  %v4752_v13 = vld [vmem:[#allocation2 + $0x1f1] sm:$0xff]  ;;  %v3614_v44 = vunpack.i.l.bf16 %v4664_v12  ;;  %v3575_v40 = vunpack.i.h.bf16 %v4624_v56 }
 0x19f   : > { %v4722_v37 = vpop.permute.xlu1 %3622  ;;  %2383 = vmatmul.mubr.bf16.gmra.mrb[4].mxu1 %v2136_v62  ;;  %v3645_v43 = vunpack.i.h.bf16 %v3643_v16  ;;  %v3644_v47 = vunpack.i.l.bf16 %v3643_v16  ;;  %v1972_v0 = vsel %vm1965_vm3, %v1939_v22, %v3564_v5  ;;  %v1973_v54 = vsel %vm1965_vm3, %v1940_v42, %v3565_v2  ;;  %v851_v22 = vld [vmem:[#allocation2 + $0x87] sm:$0xff]  ;;  %v852_v42 = vld [vmem:[#allocation2 + $0x8f] sm:$0xff] }
 0x1a0   : > { %3917 = vrot.lane.b32.xlu0 %v3916_v33, %s4013_s10  ;;  %v2139_v25 = vpack.c.bf16 %v1973_v54, %v1972_v0  ;;  %v3569_v62 = vunpack.i.l.bf16 %v4605_v38  ;;  %v3926_v12 = vpack.i.bf16 %v4752_v13, %v4750_v19  ;;  %v3574_v41 = vunpack.i.l.bf16 %v4624_v56 }
 0x1a1   : > { %3942 = vrot.lane.b32.xlu1 %v3916_v33, %s4014_s17  ;;  %v2068_v50 = vsel %vm1965_vm3, %v2036_v28, %v3644_v47  ;;  %v2069_v57 = vsel %vm1965_vm3, %v2037_v29, %v3645_v43  ;;  %v4771_v33 = vld [vmem:[#allocation2 + $0x209] sm:$0xff]  ;;  %v2159_v2 = vpack.c.bf16 %v4556_v24, %v4554_v23  ;;  %v2162_v5 = vpack.c.bf16 %v4538_v3, %v4536_v63 }
 0x1a2   : > { %v3648_v31 = vpop.permute.xlu0 %3647  ;;  %v2140_v14 = vpack.c.bf16 %v2069_v57, %v2068_v50  ;;  %v3931_v56 = vpack.i.bf16 %v4773_v15, %v4771_v33  ;;  %v1066_v29 = vld [vmem:[#allocation2 + $0x227] sm:$0xff]  ;;  %v1067_v28 = vld [vmem:[#allocation2 + $0x22f] sm:$0xff]  ;;  %v1908_v50 = vsel %vm737_vm1, %v851_v22, %v3569_v62  ;;  %v1909_v57 = vsel %vm737_vm1, %v852_v42, %v3570_v32 }
 0x1a3   : > { %v4738_v58 = vpop.permute.xlu1 %3627  ;;  %v3650_v60 = vunpack.i.h.bf16 %v3648_v31  ;;  %v3649_v4 = vunpack.i.l.bf16 %v3648_v31  ;;  %v1941_v31 = vsel %vm1932_vm2, %v1908_v50, %v3574_v41  ;;  %v3936_v23 = vpack.i.bf16 %v1067_v28, %v1066_v29 }
 0x1a4   : > { %2390 = vmatprep.mubr.bf16.mxu1 %v2140_v14  ;;  %3922 = vrot.lane.b32.xlu0 %v3921_v6, %s4014_s17  ;;  %v1942_v14 = vsel %vm1932_vm2, %v1909_v57, %v3575_v40  ;;  %v3624_v40 = vunpack.i.l.bf16 %v4722_v37 }
 0x1a5   : > { %3439 = vmatmul.mubr.msk.bf16.gmra.mrb[48].mxu0 %vm737_vm1, %v2153_v20  ;;  %v2006_v30 = vsel %vm737_vm1, %v979_v1, %v3649_v4  ;;  %v2007_v26 = vsel %vm737_vm1, %v980_v55, %v3650_v60  ;;  %3947 = vrot.lane.b32.xlu1 %v3921_v6, %s4012_s9  ;;  %v1098_v1 = vld [vmem:[#allocation2 + $0x228] sm:$0xff]  ;;  %v1099_v60 = vld [vmem:[#allocation2 + $0x230] sm:$0xff] }
 0x1a6   : > { %3442 = vmatprep.mubr.msk.bf16.mxu0 %vm737_vm1, %v2156_v39  ;;  %v4763_v10 = vpop.permute.xlu0 %3667  ;;  %v2038_v20 = vsel %vm1932_vm2, %v2006_v30, %v3609_v11  ;;  %v2039_v27 = vsel %vm1932_vm2, %v2007_v26, %v3610_v61  ;;  %v3956_v61 = vpack.i.bf16 %v1099_v60, %v1098_v1  ;;  %v2165_v39 = vpack.c.bf16 %v4655_v45, %v4653_v53  ;;  %v982_v45 = vld [vmem:[#allocation2 + $0xd0] sm:$0xff] }
 0x1a7   : > { %v4761_v9 = vpop.permute.xlu1 %3632  ;;  %2391 = vmatmul.mubr.bf16.gmra.mrb[8].mxu1 %v2139_v25  ;;  %v2070_v48 = vsel %vm1965_vm3, %v2038_v20, %v3614_v44  ;;  %v2071_v16 = vsel %vm1965_vm3, %v2039_v27, %v3615_v49  ;;  %v3620_v30 = vunpack.i.h.bf16 %v4685_v8  ;;  %v3619_v26 = vunpack.i.l.bf16 %v4685_v8  ;;  %v853_v25 = vld [vmem:[#allocation2 + $0xa7] sm:$0xff]  ;;  %v854_v49 = vld [vmem:[#allocation2 + $0xaf] sm:$0xff] }
 0x1a8   : > { %3927 = vrot.lane.b32.xlu0 %v3926_v12, %s4012_s9  ;;  %v2143_v38 = vpack.c.bf16 %v2071_v16, %v2070_v48  ;;  %v3625_v8 = vunpack.i.h.bf16 %v4722_v37 }
 0x1a9   : > { %3952 = vrot.lane.b32.xlu1 %v3926_v12, %s4013_s10  ;;  %v2009_v22 = vsel %vm737_vm1, %v982_v45, %v3620_v30 }
 0x1aa   : > { %v4781_v47 = vpop.permute.xlu0 %3672  ;;  %2398 = vmatprep.mubr.bf16.mxu1 %v2143_v38 }
 0x1ab   : > { %v3653_v43 = vpop.permute.xlu1 %3652 }
 0x1ac   : > { %v3655_v59 = vunpack.i.h.bf16 %v3653_v43  ;;  %v3654_v34 = vunpack.i.l.bf16 %v3653_v43  ;;  %3932 = vrot.lane.b32.xlu0 %v3931_v56, %s4012_s9 }
 0x1ad   : > { %3443 = vmatmul.mubr.msk.bf16.gmra.mrb[52].mxu0 %vm737_vm1, %v2159_v2  ;;  %3962 = vrot.lane.b32.xlu1 %v4687_v21, %s4014_s17  ;;  %v2168_v21 = vpack.c.bf16 %v4600_v36, %v4598_v35  ;;  %v981_v36 = vld [vmem:[#allocation2 + $0xc8] sm:$0xff] }
 0x1ae   : > { %3446 = vmatprep.mubr.msk.bf16.mxu0 %vm737_vm1, %v2162_v5  ;;  %v1974_v63 = vsel %vm1965_vm3, %v1941_v31, %v3654_v34  ;;  %v1975_v3 = vsel %vm1965_vm3, %v1942_v14, %v3655_v59  ;;  %v4800_v0 = vpop.permute.xlu0 %3677  ;;  %v2008_v16 = vsel %vm737_vm1, %v981_v36, %v3619_v26  ;;  %v2171_v59 = vpack.c.bf16 %v4752_v13, %v4750_v19  ;;  %v1130_v19 = vld [vmem:[#allocation2 + $0x229] sm:$0xff]  ;;  %v1131_v13 = vld [vmem:[#allocation2 + $0x231] sm:$0xff] }
 0x1af   : > { %v3658_v24 = vpop.permute.xlu1 %3657  ;;  %v2142_v54 = vpack.c.bf16 %v1975_v3, %v1974_v63  ;;  %v3670_v63 = vunpack.i.h.bf16 %v4763_v10  ;;  %v3669_v3 = vunpack.i.l.bf16 %v4763_v10  ;;  %v2177_v26 = vpack.c.bf16 %v1131_v13, %v1130_v19 }
 0x1b0   : > { %v3660_v4 = vunpack.i.h.bf16 %v3658_v24  ;;  %v3659_v6 = vunpack.i.l.bf16 %v3658_v24  ;;  %3937 = vrot.lane.b32.xlu0 %v3936_v23, %s4013_s10  ;;  %v983_v23 = vld [vmem:[#allocation2 + $0xe8] sm:$0xff]  ;;  %v984_v24 = vld [vmem:[#allocation2 + $0xf0] sm:$0xff] }
 0x1b1   : > { %2399 = vmatmul.mubr.bf16.gmra.mrb[12].mxu1 %v2142_v54  ;;  %v2174_v54 = vpack.c.bf16 %v4773_v15, %v4771_v33  ;;  %v3630_v15 = vunpack.i.h.bf16 %v4738_v58 }
 0x1b2   : > { %v3698_v55 = vpop.permute.xlu0 %3697  ;;  %v1910_v27 = vsel %vm737_vm1, %v853_v25, %v3659_v6  ;;  %v1911_v32 = vsel %vm737_vm1, %v854_v49, %v3660_v4  ;;  %v3675_v4 = vunpack.i.h.bf16 %v4781_v47  ;;  %v3674_v6 = vunpack.i.l.bf16 %v4781_v47  ;;  %v855_v25 = vld [vmem:[#allocation2 + $0xc7] sm:$0xff]  ;;  %v856_v49 = vld [vmem:[#allocation2 + $0xcf] sm:$0xff] }
 0x1b3   : > { %v3663_v11 = vpop.permute.xlu1 %3662  ;;  %v3700_v62 = vunpack.i.h.bf16 %v3698_v55  ;;  %v3699_v12 = vunpack.i.l.bf16 %v3698_v55  ;;  %v3629_v55 = vunpack.i.l.bf16 %v4738_v58 }
 0x1b4   : > { %v3665_v44 = vunpack.i.h.bf16 %v3663_v11  ;;  %v3664_v20 = vunpack.i.l.bf16 %v3663_v11  ;;  %3957 = vrot.lane.b32.xlu0 %v3956_v61, %s4014_s17 }
 0x1b5   : > { %3447 = vmatmul.mubr.msk.bf16.gmra.mrb[56].mxu0 %vm737_vm1, %v2165_v39  ;;  %v2041_v43 = vsel %vm1932_vm2, %v2009_v22, %v3700_v62  ;;  %v2040_v2 = vsel %vm1932_vm2, %v2008_v16, %v3699_v12  ;;  %v3635_v39 = vunpack.i.h.bf16 %v4761_v9  ;;  %v1913_v62 = vsel %vm737_vm1, %v856_v49, %v3630_v15 }
 0x1b6   : > { %v1943_v53 = vsel %vm1932_vm2, %v1910_v27, %v3664_v20  ;;  %v1944_v35 = vsel %vm1932_vm2, %v1911_v32, %v3665_v44  ;;  %3450 = vmatprep.mubr.msk.bf16.mxu0 %vm737_vm1, %v2168_v21  ;;  %v3703_v48 = vpop.permute.xlu0 %3702  ;;  %v3634_v21 = vunpack.i.l.bf16 %v4761_v9  ;;  %v1912_v32 = vsel %vm737_vm1, %v855_v25, %v3629_v55  ;;  %v859_v25 = vld [vmem:[#allocation2 + $0x107] sm:$0xff] }
 0x1b7   : > { %v4818_v41 = vpop.permute.xlu1 %3682  ;;  %v3705_v38 = vunpack.i.h.bf16 %v3703_v48  ;;  %v3704_v42 = vunpack.i.l.bf16 %v3703_v48  ;;  %v1976_v56 = vsel %vm1965_vm3, %v1943_v53, %v3624_v40  ;;  %v1977_v5 = vsel %vm1965_vm3, %v1944_v35, %v3625_v8 }
 0x1b8   : > { %v2145_v14 = vpack.c.bf16 %v1977_v5, %v1976_v56  ;;  %v1945_v53 = vsel %vm1932_vm2, %v1912_v32, %v3634_v21  ;;  %v1946_v9 = vsel %vm1932_vm2, %v1913_v62, %v3635_v39  ;;  %v3680_v5 = vunpack.i.h.bf16 %v4800_v0  ;;  %v860_v62 = vld [vmem:[#allocation2 + $0x10f] sm:$0xff] }
 0x1b9   : > { %v2072_v37 = vsel %vm1965_vm3, %v2040_v2, %v3704_v42  ;;  %v2073_v29 = vsel %vm1965_vm3, %v2041_v43, %v3705_v38 }
 0x1ba   : > { %v3708_v50 = vpop.permute.xlu0 %3707  ;;  %v2146_v57 = vpack.c.bf16 %v2073_v29, %v2072_v37  ;;  %v3679_v37 = vunpack.i.l.bf16 %v4800_v0  ;;  %v857_v29 = vld [vmem:[#allocation2 + $0xe7] sm:$0xff] }
 0x1bb   : > { %v4828_v28 = vpop.permute.xlu1 %3687  ;;  %v3710_v34 = vunpack.i.h.bf16 %v3708_v50  ;;  %v3709_v31 = vunpack.i.l.bf16 %v3708_v50  ;;  %v858_v50 = vld [vmem:[#allocation2 + $0xef] sm:$0xff] }
 0x1bc   : > { %2406 = vmatprep.mubr.bf16.mxu1 %v2146_v57  ;;  %v3690_v15 = vunpack.i.h.bf16 %v4828_v28 }
 0x1bd   : > { %3451 = vmatmul.mubr.msk.bf16.gmra.mrb[60].mxu0 %vm737_vm1, %v2171_v59  ;;  %v2010_v1 = vsel %vm737_vm1, %v983_v23, %v3709_v31  ;;  %v2011_v60 = vsel %vm737_vm1, %v984_v24, %v3710_v34  ;;  %2407 = vmatmul.mubr.bf16.gmra.mrb[16].mxu1 %v2145_v14  ;;  %v986_v23 = vld [vmem:[#allocation2 + $0x110] sm:$0xff]  ;;  %v3685_v24 = vunpack.i.h.bf16 %v4818_v41 }
 0x1be   : > { %3454 = vmatprep.mubr.msk.bf16.mxu0 %vm737_vm1, %v2174_v54  ;;  %v3718_v61 = vpop.permute.xlu0 %3717  ;;  %v2042_v11 = vsel %vm1932_vm2, %v2010_v1, %v3669_v3  ;;  %v2043_v33 = vsel %vm1932_vm2, %v2011_v60, %v3670_v63  ;;  %v985_v3 = vld [vmem:[#allocation2 + $0x108] sm:$0xff]  ;;  %v3684_v54 = vunpack.i.l.bf16 %v4818_v41  ;;  %v2013_v19 = vsel %vm737_vm1, %v986_v23, %v3680_v5 }
 0x1bf   : > { %v4842_v10 = vpop.permute.xlu1 %3692  ;;  %v2074_v30 = vsel %vm1965_vm3, %v2042_v11, %v3674_v6  ;;  %v2075_v47 = vsel %vm1965_vm3, %v2043_v33, %v3675_v4  ;;  %v3720_v22 = vunpack.i.h.bf16 %v3718_v61  ;;  %v3719_v38 = vunpack.i.l.bf16 %v3718_v61 }
 0x1c0   : > { %v2149_v44 = vpack.c.bf16 %v2075_v47, %v2074_v30  ;;  %v2012_v60 = vsel %vm737_vm1, %v985_v3, %v3679_v37  ;;  %v3689_v41 = vunpack.i.l.bf16 %v4828_v28  ;;  %v3695_v21 = vunpack.i.h.bf16 %v4842_v10 }
 0x1c1   : > { %v1914_v57 = vsel %vm737_vm1, %v857_v29, %v3719_v38  ;;  %v1915_v59 = vsel %vm737_vm1, %v858_v50, %v3720_v22  ;;  %v3694_v49 = vunpack.i.l.bf16 %v4842_v10 }
 0x1c2   : > { %v4852_v27 = vpop.permute.xlu0 %3727  ;;  %2414 = vmatprep.mubr.bf16.mxu1 %v2149_v44 }
 0x1c3   : > { %v3713_v20 = vpop.permute.xlu1 %3712  ;;  %v3729_v28 = vunpack.i.l.bf16 %v4852_v27 }
 0x1c4   : > { %v3715_v58 = vunpack.i.h.bf16 %v3713_v20  ;;  %v3714_v12 = vunpack.i.l.bf16 %v3713_v20 }
 0x1c5   : > { %3455 = vmatmul.mubr.msk.bf16.gmra.mrb[64].mxu0 %vm737_vm1, %v2177_v26 }
 0x1c6   : > { %v1978_v35 = vsel %vm1965_vm3, %v1945_v53, %v3714_v12  ;;  %v1979_v36 = vsel %vm1965_vm3, %v1946_v9, %v3715_v58  ;;  %v4861_v8 = vpop.permute.xlu0 %3732  ;;  %v3730_v58 = vunpack.i.h.bf16 %v4852_v27  ;;  %v987_v12 = vld [vmem:[#allocation2 + $0x128] sm:$0xff]  ;;  %v988_v53 = vld [vmem:[#allocation2 + $0x130] sm:$0xff] }
 0x1c7   : > { %v3723_v45 = vpop.permute.xlu1 %3722  ;;  %v2148_v40 = vpack.c.bf16 %v1979_v36, %v1978_v35  ;;  %v1916_v36 = vsel %vm737_vm1, %v859_v25, %v3689_v41  ;;  %v3735_v22 = vunpack.i.h.bf16 %v4861_v8  ;;  %v3734_v38 = vunpack.i.l.bf16 %v4861_v8 }
 0x1c8   : > { %v3725_v42 = vunpack.i.h.bf16 %v3723_v45  ;;  %v3724_v43 = vunpack.i.l.bf16 %v3723_v45  ;;  %v1917_v45 = vsel %vm737_vm1, %v860_v62, %v3690_v15  ;;  %v1949_v5 = vsel %vm1932_vm2, %v1916_v36, %v3694_v49 }
 0x1c9   : > { %2415 = vmatmul.mubr.bf16.gmra.mrb[20].mxu1 %v2148_v40  ;;  %v1950_v37 = vsel %vm1932_vm2, %v1917_v45, %v3695_v21  ;;  %v989_v21 = vld [vmem:[#allocation2 + $0x148] sm:$0xff] }
 0x1ca   : > { %v4863_v48 = vpop.permute.xlu0 %3737  ;;  %v1947_v14 = vsel %vm1932_vm2, %v1914_v57, %v3724_v43  ;;  %v1948_v63 = vsel %vm1932_vm2, %v1915_v59, %v3725_v42 }
 0x1cb   : > { %v4865_v16 = vpop.permute.xlu1 %3742  ;;  %v1980_v11 = vsel %vm1965_vm3, %v1947_v14, %v3684_v54  ;;  %v1981_v33 = vsel %vm1965_vm3, %v1948_v63, %v3685_v24 }
 0x1cc   : > { %v2151_v32 = vpack.c.bf16 %v1981_v33, %v1980_v11 }
 0x1ce   : > { %v3758_v56 = vpop.permute.xlu0 %3757 }
 0x1cf   : > { %v4867_v2 = vpop.permute.xlu1 %3747  ;;  %v3760_v34 = vunpack.i.h.bf16 %v3758_v56  ;;  %v3759_v31 = vunpack.i.l.bf16 %v3758_v56 }
 0x1d1   : > { %v2045_v6 = vsel %vm1932_vm2, %v2013_v19, %v3760_v34  ;;  %v2044_v61 = vsel %vm1932_vm2, %v2012_v60, %v3759_v31 }
 0x1d2   : > { %v3763_v0 = vpop.permute.xlu0 %3762 }
 0x1d3   : > { %v4877_v1 = vpop.permute.xlu1 %3752  ;;  %v3765_v13 = vunpack.i.h.bf16 %v3763_v0  ;;  %v3764_v4 = vunpack.i.l.bf16 %v3763_v0 }
 0x1d4   : > { %v3755_v36 = vunpack.i.h.bf16 %v4877_v1 }
 0x1d5   : > { %v2076_v55 = vsel %vm1965_vm3, %v2044_v61, %v3764_v4  ;;  %v2077_v39 = vsel %vm1965_vm3, %v2045_v6, %v3765_v13  ;;  %v3740_v13 = vunpack.i.h.bf16 %v4863_v48  ;;  %v3739_v4 = vunpack.i.l.bf16 %v4863_v48  ;;  %v861_v6 = vld [vmem:[#allocation2 + $0x127] sm:$0xff]  ;;  %v862_v61 = vld [vmem:[#allocation2 + $0x12f] sm:$0xff] }
 0x1d6   : > { %v3768_v30 = vpop.permute.xlu0 %3767  ;;  %v2152_v26 = vpack.c.bf16 %v2077_v39, %v2076_v55 }
 0x1d7   : > { %v3773_v47 = vpop.permute.xlu1 %3772  ;;  %v3770_v44 = vunpack.i.h.bf16 %v3768_v30  ;;  %v3769_v20 = vunpack.i.l.bf16 %v3768_v30  ;;  %v990_v30 = vld [vmem:[#allocation2 + $0x150] sm:$0xff]  ;;  %v2016_v49 = vsel %vm737_vm1, %v989_v21, %v3739_v4 }
 0x1d8   : > { %v3775_v9 = vunpack.i.h.bf16 %v3773_v47  ;;  %v3774_v35 = vunpack.i.l.bf16 %v3773_v47  ;;  %2422 = vmatprep.mubr.bf16.mxu1 %v2152_v26  ;;  %v3745_v47 = vunpack.i.h.bf16 %v4865_v16  ;;  %v3744_v26 = vunpack.i.l.bf16 %v4865_v16 }
 0x1d9   : > { %v2014_v40 = vsel %vm737_vm1, %v987_v12, %v3769_v20  ;;  %v2015_v10 = vsel %vm737_vm1, %v988_v53, %v3770_v44  ;;  %2423 = vmatmul.mubr.bf16.gmra.mrb[24].mxu1 %v2151_v32  ;;  %v2017_v44 = vsel %vm737_vm1, %v990_v30, %v3740_v13  ;;  %v3750_v53 = vunpack.i.h.bf16 %v4867_v2 }
 0x1da   : > { %v4899_v27 = vpop.permute.xlu0 %3787  ;;  %v2046_v43 = vsel %vm1932_vm2, %v2014_v40, %v3729_v28  ;;  %v2047_v56 = vsel %vm1932_vm2, %v2015_v10, %v3730_v58  ;;  %v1982_v57 = vsel %vm1965_vm3, %v1949_v5, %v3774_v35  ;;  %v1983_v59 = vsel %vm1965_vm3, %v1950_v37, %v3775_v9  ;;  %v864_v5 = vld [vmem:[#allocation2 + $0x14f] sm:$0xff] }
 0x1db   : > { %v3778_v42 = vpop.permute.xlu1 %3777  ;;  %v2078_v29 = vsel %vm1965_vm3, %v2046_v43, %v3734_v38  ;;  %v2079_v50 = vsel %vm1965_vm3, %v2047_v56, %v3735_v22  ;;  %v2154_v14 = vpack.c.bf16 %v1983_v59, %v1982_v57  ;;  %v3749_v16 = vunpack.i.l.bf16 %v4867_v2  ;;  %v863_v22 = vld [vmem:[#allocation2 + $0x147] sm:$0xff] }
 0x1dc   : > { %v2155_v8 = vpack.c.bf16 %v2079_v50, %v2078_v29  ;;  %v3780_v23 = vunpack.i.h.bf16 %v3778_v42  ;;  %v3779_v24 = vunpack.i.l.bf16 %v3778_v42  ;;  %v3754_v38 = vunpack.i.l.bf16 %v4877_v1  ;;  %v991_v29 = vld [vmem:[#allocation2 + $0x168] sm:$0xff]  ;;  %v992_v50 = vld [vmem:[#allocation2 + $0x170] sm:$0xff] }
 0x1dd   : > { %v3790_v37 = vunpack.i.h.bf16 %v4899_v27  ;;  %v3789_v2 = vunpack.i.l.bf16 %v4899_v27 }
 0x1de   : > { %v4909_v31 = vpop.permute.xlu0 %3792  ;;  %2430 = vmatprep.mubr.bf16.mxu1 %v2155_v8  ;;  %v1918_v11 = vsel %vm737_vm1, %v861_v6, %v3779_v24  ;;  %v1919_v33 = vsel %vm737_vm1, %v862_v61, %v3780_v23  ;;  %v1920_v8 = vsel %vm737_vm1, %v863_v22, %v3749_v16 }
 0x1df   : > { %v3783_v34 = vpop.permute.xlu1 %3782  ;;  %v3795_v23 = vunpack.i.h.bf16 %v4909_v31  ;;  %v3794_v24 = vunpack.i.l.bf16 %v4909_v31  ;;  %v1953_v13 = vsel %vm1932_vm2, %v1920_v8, %v3754_v38 }
 0x1e0   : > { %v3785_v54 = vunpack.i.h.bf16 %v3783_v34  ;;  %v3784_v0 = vunpack.i.l.bf16 %v3783_v34  ;;  %v1921_v34 = vsel %vm737_vm1, %v864_v5, %v3750_v53 }
 0x1e1   : > { %2431 = vmatmul.mubr.bf16.gmra.mrb[28].mxu1 %v2154_v14  ;;  %v1954_v4 = vsel %vm1932_vm2, %v1921_v34, %v3755_v36 }
 0x1e2   : > { %v4911_v63 = vpop.permute.xlu0 %3797  ;;  %v1951_v55 = vsel %vm1932_vm2, %v1918_v11, %v3784_v0  ;;  %v1952_v39 = vsel %vm1932_vm2, %v1919_v33, %v3785_v54 }
 0x1e3   : > { %v4913_v3 = vpop.permute.xlu1 %3802  ;;  %v1984_v28 = vsel %vm1965_vm3, %v1951_v55, %v3744_v26  ;;  %v1985_v12 = vsel %vm1965_vm3, %v1952_v39, %v3745_v47 }
 0x1e4   : > { %v2157_v56 = vpack.c.bf16 %v1985_v12, %v1984_v28  ;;  %v3804_v22 = vunpack.i.l.bf16 %v4913_v3 }
 0x1e6   : > { %v3818_v19 = vpop.permute.xlu0 %3817 }
 0x1e7   : > { %v4915_v60 = vpop.permute.xlu1 %3807  ;;  %v3820_v15 = vunpack.i.h.bf16 %v3818_v19  ;;  %v3819_v41 = vunpack.i.l.bf16 %v3818_v19 }
 0x1e8   : > { %v3809_v8 = vunpack.i.l.bf16 %v4915_v60 }
 0x1e9   : > { %v2049_v62 = vsel %vm1932_vm2, %v2017_v44, %v3820_v15  ;;  %v2048_v58 = vsel %vm1932_vm2, %v2016_v49, %v3819_v41 }
 0x1ea   : > { %v3823_v48 = vpop.permute.xlu0 %3822 }
 0x1eb   : > { %v4925_v25 = vpop.permute.xlu1 %3812  ;;  %v3825_v20 = vunpack.i.h.bf16 %v3823_v48  ;;  %v3824_v32 = vunpack.i.l.bf16 %v3823_v48 }
 0x1ec   : > { %v3815_v34 = vunpack.i.h.bf16 %v4925_v25 }
 0x1ed   : > { %v2080_v9 = vsel %vm1965_vm3, %v2048_v58, %v3824_v32  ;;  %v2081_v35 = vsel %vm1965_vm3, %v2049_v62, %v3825_v20  ;;  %v3800_v20 = vunpack.i.h.bf16 %v4911_v63  ;;  %v3799_v32 = vunpack.i.l.bf16 %v4911_v63  ;;  %v865_v62 = vld [vmem:[#allocation2 + $0x167] sm:$0xff]  ;;  %v866_v58 = vld [vmem:[#allocation2 + $0x16f] sm:$0xff] }
 0x1ee   : > { %v3828_v45 = vpop.permute.xlu0 %3827  ;;  %v2158_v10 = vpack.c.bf16 %v2081_v35, %v2080_v9 }
 0x1ef   : > { %v3833_v40 = vpop.permute.xlu1 %3832  ;;  %v3830_v42 = vunpack.i.h.bf16 %v3828_v45  ;;  %v3829_v43 = vunpack.i.l.bf16 %v3828_v45  ;;  %v993_v45 = vld [vmem:[#allocation2 + $0x188] sm:$0xff] }
 0x1f0   : > { %v3835_v57 = vunpack.i.h.bf16 %v3833_v40  ;;  %v3834_v59 = vunpack.i.l.bf16 %v3833_v40  ;;  %2438 = vmatprep.mubr.bf16.mxu1 %v2158_v10  ;;  %v994_v40 = vld [vmem:[#allocation2 + $0x190] sm:$0xff]  ;;  %v3805_v10 = vunpack.i.h.bf16 %v4913_v3  ;;  %v2020_v38 = vsel %vm737_vm1, %v993_v45, %v3799_v32 }
 0x1f1   : > { %v2018_v14 = vsel %vm737_vm1, %v991_v29, %v3829_v43  ;;  %v2019_v1 = vsel %vm737_vm1, %v992_v50, %v3830_v42  ;;  %2439 = vmatmul.mubr.bf16.gmra.mrb[32].mxu1 %v2157_v56  ;;  %v2021_v42 = vsel %vm737_vm1, %v994_v40, %v3800_v20 }
 0x1f2   : > { %v4947_v27 = vpop.permute.xlu0 %3847  ;;  %v2050_v0 = vsel %vm1932_vm2, %v2018_v14, %v3789_v2  ;;  %v2051_v19 = vsel %vm1932_vm2, %v2019_v1, %v3790_v37  ;;  %v1986_v11 = vsel %vm1965_vm3, %v1953_v13, %v3834_v59  ;;  %v1987_v33 = vsel %vm1965_vm3, %v1954_v4, %v3835_v57 }
 0x1f3   : > { %v3838_v54 = vpop.permute.xlu1 %3837  ;;  %v2082_v6 = vsel %vm1965_vm3, %v2050_v0, %v3794_v24  ;;  %v2083_v61 = vsel %vm1965_vm3, %v2051_v19, %v3795_v23  ;;  %v2160_v55 = vpack.c.bf16 %v1987_v33, %v1986_v11  ;;  %v3810_v59 = vunpack.i.h.bf16 %v4915_v60  ;;  %v868_v11 = vld [vmem:[#allocation2 + $0x18f] sm:$0xff] }
 0x1f4   : > { %v2161_v31 = vpack.c.bf16 %v2083_v61, %v2082_v6  ;;  %v3840_v30 = vunpack.i.h.bf16 %v3838_v54  ;;  %v3839_v47 = vunpack.i.l.bf16 %v3838_v54  ;;  %v3814_v23 = vunpack.i.l.bf16 %v4925_v25  ;;  %v867_v61 = vld [vmem:[#allocation2 + $0x187] sm:$0xff] }
 0x1f5   : > { %v3850_v19 = vunpack.i.h.bf16 %v4947_v27  ;;  %v3849_v13 = vunpack.i.l.bf16 %v4947_v27  ;;  %v1925_v27 = vsel %vm737_vm1, %v868_v11, %v3810_v59 }
 0x1f6   : > { %2446 = vmatprep.mubr.bf16.mxu1 %v2161_v31  ;;  %v4957_v41 = vpop.permute.xlu0 %3852  ;;  %v1922_v28 = vsel %vm737_vm1, %v865_v62, %v3839_v47  ;;  %v1923_v12 = vsel %vm737_vm1, %v866_v58, %v3840_v30 }
 0x1f7   : > { %v3843_v15 = vpop.permute.xlu1 %3842  ;;  %v3855_v60 = vunpack.i.h.bf16 %v4957_v41  ;;  %v3854_v33 = vunpack.i.l.bf16 %v4957_v41 }
 0x1f8   : > { %v3845_v26 = vunpack.i.h.bf16 %v3843_v15  ;;  %v3844_v48 = vunpack.i.l.bf16 %v3843_v15 }
 0x1f9   : > { %2447 = vmatmul.mubr.bf16.gmra.mrb[36].mxu1 %v2160_v55  ;;  %v1924_v55 = vsel %vm737_vm1, %v867_v61, %v3809_v8 }
 0x1fa   : > { %v4961_v21 = vpop.permute.xlu0 %3857  ;;  %v1955_v9 = vsel %vm1932_vm2, %v1922_v28, %v3844_v48  ;;  %v1956_v35 = vsel %vm1932_vm2, %v1923_v12, %v3845_v26  ;;  %v1957_v41 = vsel %vm1932_vm2, %v1924_v55, %v3814_v23  ;;  %v1958_v48 = vsel %vm1932_vm2, %v1925_v27, %v3815_v34 }
 0x1fb   : > { %v4959_v39 = vpop.permute.xlu1 %3862  ;;  %v1988_v2 = vsel %vm1965_vm3, %v1955_v9, %v3804_v22  ;;  %v1989_v29 = vsel %vm1965_vm3, %v1956_v35, %v3805_v10  ;;  %v3860_v45 = vunpack.i.h.bf16 %v4961_v21  ;;  %v3859_v40 = vunpack.i.l.bf16 %v4961_v21  ;;  %v869_v10 = vld [vmem:[#allocation2 + $0x1a7] sm:$0xff]  ;;  %v870_v22 = vld [vmem:[#allocation2 + $0x1af] sm:$0xff] }
 0x1fc   : > { %v2163_v0 = vpack.c.bf16 %v1989_v29, %v1988_v2  ;;  %v998_v2 = vld [vmem:[#allocation2 + $0x1d0] sm:$0xff]  ;;  %v3865_v29 = vunpack.i.h.bf16 %v4959_v39 }
 0x1fe   : > { %v3873_v44 = vpop.permute.xlu0 %3872 }
 0x1ff   : > { %v4963_v49 = vpop.permute.xlu1 %3867  ;;  %v3875_v53 = vunpack.i.h.bf16 %v3873_v44  ;;  %v3874_v16 = vunpack.i.l.bf16 %v3873_v44 }
 0x201   : > { %v2053_v5 = vsel %vm1932_vm2, %v2021_v42, %v3875_v53  ;;  %v2052_v37 = vsel %vm1932_vm2, %v2020_v38, %v3874_v16 }
 0x202   : > { %v3878_v63 = vpop.permute.xlu0 %3877 }
 0x203   : > { %v3888_v36 = vpop.permute.xlu1 %3887  ;;  %v3880_v43 = vunpack.i.h.bf16 %v3878_v63  ;;  %v3879_v56 = vunpack.i.l.bf16 %v3878_v63 }
 0x204   : > { %v3890_v4 = vunpack.i.h.bf16 %v3888_v36  ;;  %v3889_v6 = vunpack.i.l.bf16 %v3888_v36 }
 0x205   : > { %v2084_v57 = vsel %vm1965_vm3, %v2052_v37, %v3879_v56  ;;  %v2085_v3 = vsel %vm1965_vm3, %v2053_v5, %v3880_v43  ;;  %v997_v37 = vld [vmem:[#allocation2 + $0x1c8] sm:$0xff] }
 0x206   : > { %v3883_v14 = vpop.permute.xlu0 %3882  ;;  %v2164_v1 = vpack.c.bf16 %v2085_v3, %v2084_v57  ;;  %v1990_v20 = vsel %vm1965_vm3, %v1957_v41, %v3889_v6  ;;  %v1991_v32 = vsel %vm1965_vm3, %v1958_v48, %v3890_v4  ;;  %v2024_v21 = vsel %vm737_vm1, %v997_v37, %v3859_v40 }
 0x207   : > { %v3893_v50 = vpop.permute.xlu1 %3892  ;;  %v3885_v24 = vunpack.i.h.bf16 %v3883_v14  ;;  %v3884_v54 = vunpack.i.l.bf16 %v3883_v14  ;;  %v2166_v28 = vpack.c.bf16 %v1991_v32, %v1990_v20  ;;  %v2025_v3 = vsel %vm737_vm1, %v998_v2, %v3860_v45 }
 0x208   : > { %2454 = vmatprep.mubr.bf16.mxu1 %v2164_v1  ;;  %v3895_v12 = vunpack.i.h.bf16 %v3893_v50  ;;  %v3894_v53 = vunpack.i.l.bf16 %v3893_v50  ;;  %v3864_v50 = vunpack.i.l.bf16 %v4959_v39 }
 0x209   : > { %v2022_v31 = vsel %vm737_vm1, %v4618_v51, %v3884_v54  ;;  %v2023_v25 = vsel %vm737_vm1, %v4620_v52, %v3885_v24  ;;  %2455 = vmatmul.mubr.bf16.gmra.mrb[40].mxu1 %v2163_v0  ;;  %v3870_v0 = vunpack.i.h.bf16 %v4963_v49 }
 0x20a   : > { %v4995_v30 = vpop.permute.xlu0 %3907  ;;  %v2054_v47 = vsel %vm1932_vm2, %v2022_v31, %v3849_v13  ;;  %v2055_v26 = vsel %vm1932_vm2, %v2023_v25, %v3850_v19  ;;  %v1926_v63 = vsel %vm737_vm1, %v869_v10, %v3894_v53  ;;  %v1927_v38 = vsel %vm737_vm1, %v870_v22, %v3895_v12 }
 0x20b   : > { %v3898_v15 = vpop.permute.xlu1 %3897  ;;  %v2086_v51 = vsel %vm1965_vm3, %v2054_v47, %v3854_v33  ;;  %v2087_v52 = vsel %vm1965_vm3, %v2055_v26, %v3855_v60  ;;  %v3869_v19 = vunpack.i.l.bf16 %v4963_v49  ;;  %v3910_v25 = vunpack.i.h.bf16 %v4995_v30  ;;  %v871_v49 = vld [vmem:[#allocation2 + $0x1c7] sm:$0xff]  ;;  %v872_v47 = vld [vmem:[#allocation2 + $0x1cf] sm:$0xff] }
 0x20c   : > { %v2167_v44 = vpack.c.bf16 %v2087_v52, %v2086_v51  ;;  %v3900_v16 = vunpack.i.h.bf16 %v3898_v15  ;;  %v3899_v9 = vunpack.i.l.bf16 %v3898_v15  ;;  %v3909_v15 = vunpack.i.l.bf16 %v4995_v30 }
 0x20d   : > { %v1928_v30 = vsel %vm737_vm1, %v871_v49, %v3869_v19  ;;  %v1929_v52 = vsel %vm737_vm1, %v872_v47, %v3870_v0 }
 0x20e   : > { %2462 = vmatprep.mubr.bf16.mxu1 %v2167_v44  ;;  %v5007_v58 = vpop.permute.xlu0 %3912  ;;  %v1959_v56 = vsel %vm1932_vm2, %v1926_v63, %v3899_v9  ;;  %v1960_v5 = vsel %vm1932_vm2, %v1927_v38, %v3900_v16 }
 0x20f   : > { %v5005_v62 = vpop.permute.xlu1 %3902  ;;  %v1992_v23 = vsel %vm1965_vm3, %v1959_v56, %v3864_v50  ;;  %v1993_v24 = vsel %vm1965_vm3, %v1960_v5, %v3865_v29  ;;  %v3915_v26 = vunpack.i.h.bf16 %v5007_v58  ;;  %v3914_v41 = vunpack.i.l.bf16 %v5007_v58 }
 0x210   : > { %v3905_v13 = vunpack.i.h.bf16 %v5005_v62  ;;  %v3904_v61 = vunpack.i.l.bf16 %v5005_v62  ;;  %v2169_v31 = vpack.c.bf16 %v1993_v24, %v1992_v23 }
 0x211   : > { %2463 = vmatmul.mubr.bf16.gmra.mrb[44].mxu1 %v2166_v28 }
 0x212   : > { %v3918_v36 = vpop.permute.xlu0 %3917  ;;  %v1962_v62 = vsel %vm1932_vm2, %v1929_v52, %v3905_v13  ;;  %v1961_v58 = vsel %vm1932_vm2, %v1928_v30, %v3904_v61 }
 0x213   : > { %v5009_v35 = vpop.permute.xlu1 %3942  ;;  %v3920_v42 = vunpack.i.h.bf16 %v3918_v36  ;;  %v3919_v43 = vunpack.i.l.bf16 %v3918_v36 }
 0x214   : > { %v3945_v55 = vunpack.i.h.bf16 %v5009_v35  ;;  %v3944_v27 = vunpack.i.l.bf16 %v5009_v35 }
 0x215   : > { %v2057_v14 = vsel %vm1932_vm2, %v2025_v3, %v3920_v42  ;;  %v2056_v1 = vsel %vm1932_vm2, %v2024_v21, %v3919_v43  ;;  %v4002_v3 = vld [vmem:[#allocation2 + $0x208] sm:$0xff] }
 0x216   : > { %v3923_v57 = vpop.permute.xlu0 %3922  ;;  %v1995_v53 = vsel %vm1965_vm3, %v1962_v62, %v3945_v55 }
 0x217   : > { %v3925_v59 = vunpack.i.h.bf16 %v3923_v57  ;;  %v3924_v8 = vunpack.i.l.bf16 %v3923_v57  ;;  %v3948_v34 = vpop.permute.xlu1 %3947  ;;  %v4001_v57 = vld [vmem:[#allocation2 + $0x210] sm:$0xff] }
 0x218   : > { %v3950_v16 = vunpack.i.h.bf16 %v3948_v34  ;;  %v3949_v9 = vunpack.i.l.bf16 %v3948_v34 }
 0x219   : > { %v2088_v54 = vsel %vm1965_vm3, %v2056_v1, %v3924_v8  ;;  %v2089_v39 = vsel %vm1965_vm3, %v2057_v14, %v3925_v59 }
 0x21a   : > { %v3928_v4 = vpop.permute.xlu0 %3927  ;;  %v2170_v6 = vpack.c.bf16 %v2089_v39, %v2088_v54  ;;  %v1930_v5 = vsel %vm737_vm1, %v4702_v46, %v3949_v9  ;;  %v1931_v37 = vsel %vm737_vm1, %v4704_v18, %v3950_v16 }
 0x21b   : > { %v3930_v11 = vunpack.i.h.bf16 %v3928_v4  ;;  %v3929_v60 = vunpack.i.l.bf16 %v3928_v4  ;;  %v3953_v33 = vpop.permute.xlu1 %3952 }
 0x21c   : > { %2470 = vmatprep.mubr.bf16.mxu1 %v2170_v6  ;;  %v3955_v36 = vunpack.i.h.bf16 %v3953_v33  ;;  %v3954_v45 = vunpack.i.l.bf16 %v3953_v33 }
 0x21d   : > { %v2026_v48 = vsel %vm737_vm1, %v4731_v7, %v3929_v60  ;;  %v2027_v51 = vsel %vm737_vm1, %v4733_v17, %v3930_v11  ;;  %2471 = vmatmul.mubr.bf16.gmra.mrb[48].mxu1 %v2169_v31  ;;  %v1994_v17 = vsel %vm1965_vm3, %v1961_v58, %v3944_v27 }
 0x21e   : > { %v3933_v44 = vpop.permute.xlu0 %3932  ;;  %v2058_v20 = vsel %vm1932_vm2, %v2026_v48, %v3909_v15  ;;  %v2059_v32 = vsel %vm1932_vm2, %v2027_v51, %v3910_v25  ;;  %v2172_v63 = vpack.c.bf16 %v1995_v53, %v1994_v17  ;;  %v1963_v2 = vsel %vm1932_vm2, %v1930_v5, %v3954_v45 }
 0x21f   : > { %v2090_v28 = vsel %vm1965_vm3, %v2058_v20, %v3914_v41  ;;  %v2091_v7 = vsel %vm1965_vm3, %v2059_v32, %v3915_v26  ;;  %v3963_v35 = vpop.permute.xlu1 %3962  ;;  %v3935_v10 = vunpack.i.h.bf16 %v3933_v44  ;;  %v3934_v22 = vunpack.i.l.bf16 %v3933_v44 }
 0x220   : > { %v2173_v12 = vpack.c.bf16 %v2091_v7, %v2090_v28  ;;  %v3965_v38 = vunpack.i.h.bf16 %v3963_v35  ;;  %v3964_v42 = vunpack.i.l.bf16 %v3963_v35  ;;  %v1964_v29 = vsel %vm1932_vm2, %v1931_v37, %v3955_v36 }
 0x221   : > { %v2029_v21 = vsel %vm737_vm1, %v4001_v57, %v3935_v10  ;;  %v2028_v59 = vsel %vm737_vm1, %v4002_v3, %v3934_v22 }
 0x222   : > { %v3938_v40 = vpop.permute.xlu0 %3937  ;;  %2478 = vmatprep.mubr.bf16.mxu1 %v2173_v12  ;;  %v1996_v18 = vsel %vm1965_vm3, %v1963_v2, %v3964_v42  ;;  %v1997_v1 = vsel %vm1965_vm3, %v1964_v29, %v3965_v38 }
 0x223   : > { %v3940_v43 = vunpack.i.h.bf16 %v3938_v40  ;;  %v3939_v56 = vunpack.i.l.bf16 %v3938_v40  ;;  %v2175_v39 = vpack.c.bf16 %v1997_v1, %v1996_v18 }
 0x225   : > { %2479 = vmatmul.mubr.bf16.gmra.mrb[52].mxu1 %v2172_v63  ;;  %v2060_v14 = vsel %vm1932_vm2, %v2028_v59, %v3939_v56  ;;  %v2061_v46 = vsel %vm1932_vm2, %v2029_v21, %v3940_v43 }
 0x226   : > { %v3958_v50 = vpop.permute.xlu0 %3957 }
 0x227   : > { %v3960_v8 = vunpack.i.h.bf16 %v3958_v50  ;;  %v3959_v34 = vunpack.i.l.bf16 %v3958_v50 }
 0x229   : > { %v2092_v23 = vsel %vm1965_vm3, %v2060_v14, %v3959_v34  ;;  %v2093_v24 = vsel %vm1965_vm3, %v2061_v46, %v3960_v8 }
 0x22a   : > { %v2176_v54 = vpack.c.bf16 %v2093_v24, %v2092_v23 }
 0x22c   : > { %2486 = vmatprep.mubr.bf16.mxu1 %v2176_v54 }
 0x22d   : > { %2487 = vmatmul.mubr.bf16.gmra.mrb[56].mxu1 %v2175_v39 }
 0x258   : > { %v3274_v0 = vpop.f32.mrb[32].mxu0 }
 0x259   : > { %v3275_v19 = vpop.f32.mrb[33].mxu0 }
 0x25a   : > { %v3276_v13 = vadd.f32 %v3275_v19, %v3274_v0  ;;  %v3277_v4 = vpop.f32.mrb[34].mxu0 }
 0x25b   : > { %v3278_v6 = vpop.f32.mrb[35].mxu0 }
 0x25c   : > { %v3279_v61 = vadd.f32 %v3278_v6, %v3277_v4 }
 0x260   : > { %v3428_v11 = vpop.f32.mrb[36].mxu0 }
 0x261   : > { %v2529_v60 = vpop.f32.mrb[37].mxu0 }
 0x262   : > { %v2530_v33 = vadd.f32 %v3276_v13, %v2529_v60  ;;  %v3429_v31 = vpop.f32.mrb[38].mxu0 }
 0x263   : > { %v2532_v25 = vpop.f32.mrb[39].mxu0 }
 0x264   : > { %v3209_v15 = vpack.c.bf16 %v2530_v33, %v2530_v33  ;;  %v2888_v55 = vmul.f32 %v2530_v33, %v2530_v33  ;;  %v2533_v27 = vadd.f32 %v3279_v61, %v2532_v25  ;;  %v2817_v49 = vsel %vm737_vm1, %v2530_v33, 0.0 }
 0x266   : > { %2785 = vst.msk [vmem:[%s5070_s16] sm:$0xf] %vm2784_vm4, %v3209_v15  ;;  %v3210_v47 = vpack.c.bf16 %v2533_v27, %v2533_v27  ;;  %v2818_v26 = vsel %vm737_vm1, %v2533_v27, 0.0  ;;  %v2889_v41 = vmul.f32 %v2533_v27, %v2533_v27  ;;  %v2920_v51 = vsel %vm737_vm1, %v2888_v55, 0.0 }
 0x267   : > { %v2819_v48 = vadd.f32 %v2818_v26, %v2817_v49 }
 0x268   : > { %2786 = vst.msk [vmem:[%s5070_s16 + $0x4] sm:$0xf] %vm2784_vm4, %v3210_v47  ;;  %v2921_v30 = vsel %vm737_vm1, %v2889_v41, 0.0  ;;  %v3432_v52 = vpop.f32.mrb[40].mxu0 }
 0x269   : > { %v2922_v44 = vadd.f32 %v2921_v30, %v2920_v51  ;;  %v2545_v20 = vpop.f32.mrb[41].mxu0 }
 0x26a   : > { %v5080_v32 = vpop.f32.mrb[42].mxu0  ;;  %v3280_v62 = vpop.f32.mrb[0].mxu1 }
 0x26b   : > { %v2548_v58 = vpop.f32.mrb[43].mxu0  ;;  %v3281_v28 = vpop.f32.mrb[1].mxu1 }
 0x26c   : > { %v3282_v7 = vadd.f32 %v3281_v28, %v3280_v62  ;;  %v3283_v12 = vpop.f32.mrb[2].mxu1 }
 0x26d   : > { %v3284_v17 = vpop.f32.mrb[3].mxu1 }
 0x26e   : > { %v2538_v53 = vadd.f32 %v3428_v11, %v3282_v7  ;;  %v3285_v16 = vadd.f32 %v3284_v17, %v3283_v12 }
 0x270   : > { %v5082_v9 = vpop.f32.mrb[44].mxu0  ;;  %v3211_v35 = vpack.c.bf16 %v2538_v53, %v2538_v53  ;;  %v2820_v36 = vsel %vm737_vm1, %v2538_v53, 0.0  ;;  %v2890_v45 = vmul.f32 %v2538_v53, %v2538_v53  ;;  %v2541_v40 = vadd.f32 %v3429_v31, %v3285_v16 }
 0x271   : > { %v5085_v10 = vpop.f32.mrb[45].mxu0  ;;  %v2821_v22 = vadd.f32 %v2820_v36, %v2819_v48 }
 0x272   : > { %v5087_v63 = vpop.f32.mrb[46].mxu0  ;;  %2787 = vst.msk [vmem:[%s5070_s16 + $0x8] sm:$0xf] %vm2784_vm4, %v3211_v35  ;;  %v2923_v38 = vsel %vm737_vm1, %v2890_v45, 0.0  ;;  %v3212_v42 = vpack.c.bf16 %v2541_v40, %v2541_v40  ;;  %v2822_v43 = vsel %vm737_vm1, %v2541_v40, 0.0  ;;  %v2891_v56 = vmul.f32 %v2541_v40, %v2541_v40  ;;  %v3286_v5 = vpop.f32.mrb[4].mxu1 }
 0x273   : > { %v5093_v37 = vpop.f32.mrb[47].mxu0  ;;  %v2924_v2 = vadd.f32 %v2923_v38, %v2922_v44  ;;  %v2823_v29 = vadd.f32 %v2822_v43, %v2821_v22  ;;  %v3287_v50 = vpop.f32.mrb[5].mxu1 }
 0x274   : > { %2788 = vst.msk [vmem:[%s5070_s16 + $0xc] sm:$0xf] %vm2784_vm4, %v3212_v42  ;;  %v2925_v57 = vsel %vm737_vm1, %v2891_v56, 0.0  ;;  %v3288_v21 = vadd.f32 %v3287_v50, %v3286_v5  ;;  %v3289_v3 = vpop.f32.mrb[6].mxu1 }
 0x275   : > { %v2926_v59 = vadd.f32 %v2925_v57, %v2924_v2  ;;  %v3290_v8 = vpop.f32.mrb[7].mxu1 }
 0x276   : > { %v2546_v34 = vadd.f32 %v3288_v21, %v2545_v20  ;;  %v3291_v14 = vadd.f32 %v3290_v8, %v3289_v3 }
 0x278   : > { %v5098_v46 = vpop.f32.mrb[48].mxu0  ;;  %v3213_v18 = vpack.c.bf16 %v2546_v34, %v2546_v34  ;;  %v2824_v1 = vsel %vm737_vm1, %v2546_v34, 0.0  ;;  %v2892_v23 = vmul.f32 %v2546_v34, %v2546_v34  ;;  %v2549_v24 = vadd.f32 %v3291_v14, %v2548_v58 }
 0x279   : > { %v5101_v54 = vpop.f32.mrb[49].mxu0  ;;  %v2825_v39 = vadd.f32 %v2824_v1, %v2823_v29 }
 0x27a   : > { %v5103_v0 = vpop.f32.mrb[50].mxu0  ;;  %2789 = vst.msk [vmem:[%s5070_s16 + $0x10] sm:$0xf] %vm2784_vm4, %v3213_v18  ;;  %v2927_v19 = vsel %vm737_vm1, %v2892_v23, 0.0  ;;  %v3214_v13 = vpack.c.bf16 %v2549_v24, %v2549_v24  ;;  %v2826_v4 = vsel %vm737_vm1, %v2549_v24, 0.0  ;;  %v2893_v6 = vmul.f32 %v2549_v24, %v2549_v24  ;;  %v3292_v61 = vpop.f32.mrb[8].mxu1 }
 0x27b   : > { %v5109_v11 = vpop.f32.mrb[51].mxu0  ;;  %v2928_v60 = vadd.f32 %v2927_v19, %v2926_v59  ;;  %v2827_v33 = vadd.f32 %v2826_v4, %v2825_v39  ;;  %v3293_v31 = vpop.f32.mrb[9].mxu1 }
 0x27c   : > { %2790 = vst.msk [vmem:[%s5070_s16 + $0x14] sm:$0xf] %vm2784_vm4, %v3214_v13  ;;  %v2929_v25 = vsel %vm737_vm1, %v2893_v6, 0.0  ;;  %v3294_v15 = vadd.f32 %v3293_v31, %v3292_v61  ;;  %v3295_v55 = vpop.f32.mrb[10].mxu1 }
 0x27d   : > { %v2930_v27 = vadd.f32 %v2929_v25, %v2928_v60  ;;  %v3296_v49 = vpop.f32.mrb[11].mxu1 }
 0x27e   : > { %v2554_v47 = vadd.f32 %v3432_v52, %v3294_v15  ;;  %v3297_v26 = vadd.f32 %v3296_v49, %v3295_v55 }
 0x280   : > { %v5114_v41 = vpop.f32.mrb[52].mxu0  ;;  %v3215_v48 = vpack.c.bf16 %v2554_v47, %v2554_v47  ;;  %v2828_v51 = vsel %vm737_vm1, %v2554_v47, 0.0  ;;  %v2894_v30 = vmul.f32 %v2554_v47, %v2554_v47  ;;  %v2557_v44 = vadd.f32 %v5080_v32, %v3297_v26 }
 0x281   : > { %v5118_v20 = vpop.f32.mrb[53].mxu0  ;;  %v2829_v62 = vadd.f32 %v2828_v51, %v2827_v33 }
 0x282   : > { %v5120_v58 = vpop.f32.mrb[54].mxu0  ;;  %2791 = vst.msk [vmem:[%s5070_s16 + $0x18] sm:$0xf] %vm2784_vm4, %v3215_v48  ;;  %v2931_v28 = vsel %vm737_vm1, %v2894_v30, 0.0  ;;  %v3216_v52 = vpack.c.bf16 %v2557_v44, %v2557_v44  ;;  %v2830_v7 = vsel %vm737_vm1, %v2557_v44, 0.0  ;;  %v2895_v12 = vmul.f32 %v2557_v44, %v2557_v44 }
 0x283   : > { %v5126_v17 = vpop.f32.mrb[55].mxu0  ;;  %v2932_v53 = vadd.f32 %v2931_v28, %v2930_v27  ;;  %v2831_v16 = vadd.f32 %v2830_v7, %v2829_v62 }
 0x284   : > { %v3298_v35 = vpop.f32.mrb[12].mxu1  ;;  %2792 = vst.msk [vmem:[%s5070_s16 + $0x1c] sm:$0xf] %vm2784_vm4, %v3216_v52  ;;  %v2933_v32 = vsel %vm737_vm1, %v2895_v12, 0.0 }
 0x285   : > { %v3299_v36 = vpop.f32.mrb[13].mxu1  ;;  %v2934_v45 = vadd.f32 %v2933_v32, %v2932_v53 }
 0x286   : > { %v3300_v40 = vadd.f32 %v3299_v36, %v3298_v35  ;;  %v3301_v22 = vpop.f32.mrb[14].mxu1 }
 0x287   : > { %v3302_v38 = vpop.f32.mrb[15].mxu1 }
 0x288   : > { %v2562_v42 = vadd.f32 %v3300_v40, %v5085_v10  ;;  %v3303_v43 = vadd.f32 %v3302_v38, %v3301_v22  ;;  %v5132_v56 = vpop.f32.mrb[56].mxu0 }
 0x289   : > { %v5134_v5 = vpop.f32.mrb[57].mxu0 }
 0x28a   : > { %v3217_v2 = vpack.c.bf16 %v2562_v42, %v2562_v42  ;;  %v2832_v29 = vsel %vm737_vm1, %v2562_v42, 0.0  ;;  %v2896_v50 = vmul.f32 %v2562_v42, %v2562_v42  ;;  %v2565_v57 = vadd.f32 %v3303_v43, %v5093_v37  ;;  %v5138_v21 = vpop.f32.mrb[58].mxu0 }
 0x28b   : > { %v2833_v3 = vadd.f32 %v2832_v29, %v2831_v16  ;;  %v5140_v59 = vpop.f32.mrb[59].mxu0 }
 0x28c   : > { %2793 = vst.msk [vmem:[%s5070_s16 + $0x20] sm:$0xf] %vm2784_vm4, %v3217_v2  ;;  %v2935_v10 = vsel %vm737_vm1, %v2896_v50, 0.0  ;;  %v3218_v8 = vpack.c.bf16 %v2565_v57, %v2565_v57  ;;  %v2834_v34 = vsel %vm737_vm1, %v2565_v57, 0.0  ;;  %v2897_v14 = vmul.f32 %v2565_v57, %v2565_v57 }
 0x28d   : > { %v2936_v18 = vadd.f32 %v2935_v10, %v2934_v45  ;;  %v2835_v1 = vadd.f32 %v2834_v34, %v2833_v3 }
 0x28e   : > { %2794 = vst.msk [vmem:[%s5070_s16 + $0x24] sm:$0xf] %vm2784_vm4, %v3218_v8  ;;  %v2937_v23 = vsel %vm737_vm1, %v2897_v14, 0.0 }
 0x28f   : > { %v2938_v37 = vadd.f32 %v2937_v23, %v2936_v18 }
 0x290   : > { %v5149_v24 = vpop.f32.mrb[60].mxu0  ;;  %v3304_v39 = vpop.f32.mrb[16].mxu1 }
 0x291   : > { %v5151_v19 = vpop.f32.mrb[61].mxu0  ;;  %v3305_v13 = vpop.f32.mrb[17].mxu1 }
 0x292   : > { %v5153_v4 = vpop.f32.mrb[62].mxu0  ;;  %v3306_v6 = vadd.f32 %v3305_v13, %v3304_v39  ;;  %v3307_v61 = vpop.f32.mrb[18].mxu1 }
 0x293   : > { %v5155_v60 = vpop.f32.mrb[63].mxu0  ;;  %v3308_v33 = vpop.f32.mrb[19].mxu1 }
 0x294   : > { %v2570_v31 = vadd.f32 %v5082_v9, %v3306_v6  ;;  %v3309_v25 = vadd.f32 %v3308_v33, %v3307_v61 }
 0x296   : > { %v3219_v15 = vpack.c.bf16 %v2570_v31, %v2570_v31  ;;  %v2836_v55 = vsel %vm737_vm1, %v2570_v31, 0.0  ;;  %v2898_v27 = vmul.f32 %v2570_v31, %v2570_v31  ;;  %v2573_v49 = vadd.f32 %v5087_v63, %v3309_v25 }
 0x297   : > { %v2837_v47 = vadd.f32 %v2836_v55, %v2835_v1 }
 0x298   : > { %v5160_v26 = vpop.f32.mrb[64].mxu0  ;;  %2795 = vst.msk [vmem:[%s5070_s16 + $0x28] sm:$0xf] %vm2784_vm4, %v3219_v15  ;;  %v2939_v48 = vsel %vm737_vm1, %v2898_v27, 0.0  ;;  %v3220_v51 = vpack.c.bf16 %v2573_v49, %v2573_v49  ;;  %v2838_v30 = vsel %vm737_vm1, %v2573_v49, 0.0  ;;  %v2899_v44 = vmul.f32 %v2573_v49, %v2573_v49 }
 0x299   : > { %v5166_v9 = vpop.f32.mrb[65].mxu0  ;;  %v2940_v62 = vadd.f32 %v2939_v48, %v2938_v37  ;;  %v2839_v28 = vadd.f32 %v2838_v30, %v2837_v47 }
 0x29a   : > { %v5168_v52 = vpop.f32.mrb[66].mxu0  ;;  %2796 = vst.msk [vmem:[%s5070_s16 + $0x2c] sm:$0xf] %vm2784_vm4, %v3220_v51  ;;  %v2941_v63 = vsel %vm737_vm1, %v2899_v44, 0.0 }
 0x29b   : > { %v5173_v7 = vpop.f32.mrb[67].mxu0  ;;  %v2942_v12 = vadd.f32 %v2941_v63, %v2940_v62 }
 0x29c   : > { %v3310_v53 = vpop.f32.mrb[20].mxu1 }
 0x29d   : > { %v3311_v16 = vpop.f32.mrb[21].mxu1 }
 0x29e   : > { %v3312_v35 = vadd.f32 %v3311_v16, %v3310_v53  ;;  %v3313_v32 = vpop.f32.mrb[22].mxu1 }
 0x29f   : > { %v3314_v36 = vpop.f32.mrb[23].mxu1 }
 0x2a0   : > { %v2578_v45 = vadd.f32 %v3312_v35, %v5101_v54  ;;  %v3315_v40 = vadd.f32 %v3314_v36, %v3313_v32 }
 0x2a2   : > { %v3221_v22 = vpack.c.bf16 %v2578_v45, %v2578_v45  ;;  %v2840_v38 = vsel %vm737_vm1, %v2578_v45, 0.0  ;;  %v2900_v42 = vmul.f32 %v2578_v45, %v2578_v45  ;;  %v2581_v43 = vadd.f32 %v3315_v40, %v5109_v11 }
 0x2a3   : > { %v2841_v2 = vadd.f32 %v2840_v38, %v2839_v28 }
 0x2a4   : > { %2797 = vst.msk [vmem:[%s5070_s16 + $0x30] sm:$0xf] %vm2784_vm4, %v3221_v22  ;;  %v2943_v29 = vsel %vm737_vm1, %v2900_v42, 0.0  ;;  %v3222_v50 = vpack.c.bf16 %v2581_v43, %v2581_v43  ;;  %v2842_v57 = vsel %vm737_vm1, %v2581_v43, 0.0  ;;  %v2901_v3 = vmul.f32 %v2581_v43, %v2581_v43 }
 0x2a5   : > { %v2944_v10 = vadd.f32 %v2943_v29, %v2942_v12  ;;  %v2843_v8 = vadd.f32 %v2842_v57, %v2841_v2 }
 0x2a6   : > { %2798 = vst.msk [vmem:[%s5070_s16 + $0x34] sm:$0xf] %vm2784_vm4, %v3222_v50  ;;  %v2945_v54 = vsel %vm737_vm1, %v2901_v3, 0.0 }
 0x2a7   : > { %v2946_v34 = vadd.f32 %v2945_v54, %v2944_v10 }
 0x2ac   : > { %v3316_v14 = vpop.f32.mrb[24].mxu1 }
 0x2ad   : > { %v3317_v18 = vpop.f32.mrb[25].mxu1 }
 0x2ae   : > { %v3318_v11 = vadd.f32 %v3317_v18, %v3316_v14  ;;  %v3319_v1 = vpop.f32.mrb[26].mxu1 }
 0x2af   : > { %v3320_v23 = vpop.f32.mrb[27].mxu1 }
 0x2b0   : > { %v2586_v37 = vadd.f32 %v5098_v46, %v3318_v11  ;;  %v3321_v39 = vadd.f32 %v3320_v23, %v3319_v1 }
 0x2b2   : > { %v3223_v13 = vpack.c.bf16 %v2586_v37, %v2586_v37  ;;  %v2844_v6 = vsel %vm737_vm1, %v2586_v37, 0.0  ;;  %v2902_v61 = vmul.f32 %v2586_v37, %v2586_v37  ;;  %v2589_v33 = vadd.f32 %v5103_v0, %v3321_v39 }
 0x2b3   : > { %v2845_v31 = vadd.f32 %v2844_v6, %v2843_v8 }
 0x2b4   : > { %2799 = vst.msk [vmem:[%s5070_s16 + $0x38] sm:$0xf] %vm2784_vm4, %v3223_v13  ;;  %v2947_v25 = vsel %vm737_vm1, %v2902_v61, 0.0  ;;  %v3224_v15 = vpack.c.bf16 %v2589_v33, %v2589_v33  ;;  %v2846_v55 = vsel %vm737_vm1, %v2589_v33, 0.0  ;;  %v2903_v27 = vmul.f32 %v2589_v33, %v2589_v33  ;;  %v3322_v49 = vpop.f32.mrb[28].mxu1 }
 0x2b5   : > { %v2948_v47 = vadd.f32 %v2947_v25, %v2946_v34  ;;  %v2847_v46 = vadd.f32 %v2846_v55, %v2845_v31  ;;  %v3323_v48 = vpop.f32.mrb[29].mxu1 }
 0x2b6   : > { %2800 = vst.msk [vmem:[%s5070_s16 + $0x3c] sm:$0xf] %vm2784_vm4, %v3224_v15  ;;  %v2949_v51 = vsel %vm737_vm1, %v2903_v27, 0.0  ;;  %v3324_v30 = vadd.f32 %v3323_v48, %v3322_v49  ;;  %v3325_v0 = vpop.f32.mrb[30].mxu1 }
 0x2b7   : > { %v2950_v44 = vadd.f32 %v2949_v51, %v2948_v47  ;;  %v3326_v62 = vpop.f32.mrb[31].mxu1 }
 0x2b8   : > { %v2594_v28 = vadd.f32 %v3324_v30, %v5118_v20  ;;  %v3327_v63 = vadd.f32 %v3326_v62, %v3325_v0 }
 0x2ba   : > { %v3225_v12 = vpack.c.bf16 %v2594_v28, %v2594_v28  ;;  %v2848_v53 = vsel %vm737_vm1, %v2594_v28, 0.0  ;;  %v2904_v16 = vmul.f32 %v2594_v28, %v2594_v28  ;;  %v2597_v35 = vadd.f32 %v3327_v63, %v5126_v17 }
 0x2bb   : > { %v2849_v32 = vadd.f32 %v2848_v53, %v2847_v46 }
 0x2bc   : > { %2801 = vst.msk [vmem:[%s5070_s16 + $0x40] sm:$0xf] %vm2784_vm4, %v3225_v12  ;;  %v2951_v36 = vsel %vm737_vm1, %v2904_v16, 0.0  ;;  %v3226_v45 = vpack.c.bf16 %v2597_v35, %v2597_v35  ;;  %v2850_v40 = vsel %vm737_vm1, %v2597_v35, 0.0  ;;  %v2905_v22 = vmul.f32 %v2597_v35, %v2597_v35 }
 0x2bd   : > { %v2952_v38 = vadd.f32 %v2951_v36, %v2950_v44  ;;  %v2851_v42 = vadd.f32 %v2850_v40, %v2849_v32 }
 0x2be   : > { %2802 = vst.msk [vmem:[%s5070_s16 + $0x44] sm:$0xf] %vm2784_vm4, %v3226_v45  ;;  %v2953_v20 = vsel %vm737_vm1, %v2905_v22, 0.0 }
 0x2bf   : > { %v2954_v43 = vadd.f32 %v2953_v20, %v2952_v38 }
 0x2c4   : > { %v3328_v2 = vpop.f32.mrb[32].mxu1 }
 0x2c5   : > { %v3329_v29 = vpop.f32.mrb[33].mxu1 }
 0x2c6   : > { %v3330_v17 = vadd.f32 %v3329_v29, %v3328_v2  ;;  %v3331_v50 = vpop.f32.mrb[34].mxu1 }
 0x2c7   : > { %v3332_v57 = vpop.f32.mrb[35].mxu1 }
 0x2c8   : > { %v2602_v3 = vadd.f32 %v5114_v41, %v3330_v17  ;;  %v3333_v10 = vadd.f32 %v3332_v57, %v3331_v50 }
 0x2ca   : > { %v3227_v8 = vpack.c.bf16 %v2602_v3, %v2602_v3  ;;  %v2852_v54 = vsel %vm737_vm1, %v2602_v3, 0.0  ;;  %v2906_v34 = vmul.f32 %v2602_v3, %v2602_v3  ;;  %v2605_v14 = vadd.f32 %v5120_v58, %v3333_v10 }
 0x2cb   : > { %v2853_v18 = vadd.f32 %v2852_v54, %v2851_v42 }
 0x2cc   : > { %2803 = vst.msk [vmem:[%s5070_s16 + $0x48] sm:$0xf] %vm2784_vm4, %v3227_v8  ;;  %v2955_v11 = vsel %vm737_vm1, %v2906_v34, 0.0  ;;  %v3228_v1 = vpack.c.bf16 %v2605_v14, %v2605_v14  ;;  %v2854_v23 = vsel %vm737_vm1, %v2605_v14, 0.0  ;;  %v2907_v37 = vmul.f32 %v2605_v14, %v2605_v14  ;;  %v3334_v39 = vpop.f32.mrb[36].mxu1 }
 0x2cd   : > { %v2956_v13 = vadd.f32 %v2955_v11, %v2954_v43  ;;  %v2855_v41 = vadd.f32 %v2854_v23, %v2853_v18  ;;  %v3335_v6 = vpop.f32.mrb[37].mxu1 }
 0x2ce   : > { %2804 = vst.msk [vmem:[%s5070_s16 + $0x4c] sm:$0xf] %vm2784_vm4, %v3228_v1  ;;  %v2957_v61 = vsel %vm737_vm1, %v2907_v37, 0.0  ;;  %v3336_v33 = vadd.f32 %v3335_v6, %v3334_v39  ;;  %v3337_v58 = vpop.f32.mrb[38].mxu1 }
 0x2cf   : > { %v2958_v31 = vadd.f32 %v2957_v61, %v2956_v13  ;;  %v3338_v25 = vpop.f32.mrb[39].mxu1 }
 0x2d0   : > { %v2610_v15 = vadd.f32 %v3336_v33, %v5134_v5  ;;  %v3339_v55 = vadd.f32 %v3338_v25, %v3337_v58 }
 0x2d2   : > { %v3229_v27 = vpack.c.bf16 %v2610_v15, %v2610_v15  ;;  %v2856_v49 = vsel %vm737_vm1, %v2610_v15, 0.0  ;;  %v2908_v47 = vmul.f32 %v2610_v15, %v2610_v15  ;;  %v2613_v46 = vadd.f32 %v3339_v55, %v5140_v59 }
 0x2d3   : > { %v2857_v48 = vadd.f32 %v2856_v49, %v2855_v41 }
 0x2d4   : > { %2805 = vst.msk [vmem:[%s5070_s16 + $0x50] sm:$0xf] %vm2784_vm4, %v3229_v27  ;;  %v2959_v51 = vsel %vm737_vm1, %v2908_v47, 0.0  ;;  %v3230_v30 = vpack.c.bf16 %v2613_v46, %v2613_v46  ;;  %v2858_v0 = vsel %vm737_vm1, %v2613_v46, 0.0  ;;  %v2909_v44 = vmul.f32 %v2613_v46, %v2613_v46 }
 0x2d5   : > { %v2960_v62 = vadd.f32 %v2959_v51, %v2958_v31  ;;  %v2859_v28 = vadd.f32 %v2858_v0, %v2857_v48 }
 0x2d6   : > { %2806 = vst.msk [vmem:[%s5070_s16 + $0x54] sm:$0xf] %vm2784_vm4, %v3230_v30  ;;  %v2961_v5 = vsel %vm737_vm1, %v2909_v44, 0.0 }
 0x2d7   : > { %v2962_v63 = vadd.f32 %v2961_v5, %v2960_v62 }
 0x2dc   : > { %v3340_v12 = vpop.f32.mrb[40].mxu1 }
 0x2dd   : > { %v3341_v53 = vpop.f32.mrb[41].mxu1 }
 0x2de   : > { %v3342_v59 = vadd.f32 %v3341_v53, %v3340_v12  ;;  %v3343_v16 = vpop.f32.mrb[42].mxu1 }
 0x2df   : > { %v3344_v35 = vpop.f32.mrb[43].mxu1 }
 0x2e0   : > { %v2618_v32 = vadd.f32 %v5132_v56, %v3342_v59  ;;  %v3345_v36 = vadd.f32 %v3344_v35, %v3343_v16 }
 0x2e2   : > { %v3231_v45 = vpack.c.bf16 %v2618_v32, %v2618_v32  ;;  %v2860_v40 = vsel %vm737_vm1, %v2618_v32, 0.0  ;;  %v2910_v22 = vmul.f32 %v2618_v32, %v2618_v32  ;;  %v2621_v38 = vadd.f32 %v5138_v21, %v3345_v36 }
 0x2e3   : > { %v2861_v42 = vadd.f32 %v2860_v40, %v2859_v28 }
 0x2e4   : > { %2807 = vst.msk [vmem:[%s5070_s16 + $0x58] sm:$0xf] %vm2784_vm4, %v3231_v45  ;;  %v2963_v20 = vsel %vm737_vm1, %v2910_v22, 0.0  ;;  %v3232_v43 = vpack.c.bf16 %v2621_v38, %v2621_v38  ;;  %v2862_v2 = vsel %vm737_vm1, %v2621_v38, 0.0  ;;  %v2911_v29 = vmul.f32 %v2621_v38, %v2621_v38  ;;  %v3346_v17 = vpop.f32.mrb[44].mxu1 }
 0x2e5   : > { %v2964_v50 = vadd.f32 %v2963_v20, %v2962_v63  ;;  %v2863_v56 = vadd.f32 %v2862_v2, %v2861_v42  ;;  %v3347_v57 = vpop.f32.mrb[45].mxu1 }
 0x2e6   : > { %2808 = vst.msk [vmem:[%s5070_s16 + $0x5c] sm:$0xf] %vm2784_vm4, %v3232_v43  ;;  %v2965_v3 = vsel %vm737_vm1, %v2911_v29, 0.0  ;;  %v3348_v10 = vadd.f32 %v3347_v57, %v3346_v17  ;;  %v3349_v21 = vpop.f32.mrb[46].mxu1 }
 0x2e7   : > { %v2966_v8 = vadd.f32 %v2965_v3, %v2964_v50  ;;  %v3350_v54 = vpop.f32.mrb[47].mxu1 }
 0x2e8   : > { %v2626_v34 = vadd.f32 %v3348_v10, %v5151_v19  ;;  %v3351_v14 = vadd.f32 %v3350_v54, %v3349_v21 }
 0x2ea   : > { %v3233_v18 = vpack.c.bf16 %v2626_v34, %v2626_v34  ;;  %v2864_v11 = vsel %vm737_vm1, %v2626_v34, 0.0  ;;  %v2912_v1 = vmul.f32 %v2626_v34, %v2626_v34  ;;  %v2629_v23 = vadd.f32 %v3351_v14, %v5155_v60 }
 0x2eb   : > { %v2865_v37 = vadd.f32 %v2864_v11, %v2863_v56 }
 0x2ec   : > { %2809 = vst.msk [vmem:[%s5070_s16 + $0x60] sm:$0xf] %vm2784_vm4, %v3233_v18  ;;  %v2967_v39 = vsel %vm737_vm1, %v2912_v1, 0.0  ;;  %v3234_v13 = vpack.c.bf16 %v2629_v23, %v2629_v23  ;;  %v2866_v41 = vsel %vm737_vm1, %v2629_v23, 0.0  ;;  %v2913_v6 = vmul.f32 %v2629_v23, %v2629_v23 }
 0x2ed   : > { %v2968_v61 = vadd.f32 %v2967_v39, %v2966_v8  ;;  %v2867_v33 = vadd.f32 %v2866_v41, %v2865_v37 }
 0x2ee   : > { %2810 = vst.msk [vmem:[%s5070_s16 + $0x64] sm:$0xf] %vm2784_vm4, %v3234_v13  ;;  %v2969_v19 = vsel %vm737_vm1, %v2913_v6, 0.0 }
 0x2ef   : > { %v2970_v58 = vadd.f32 %v2969_v19, %v2968_v61 }
 0x2f0   : > { %v3352_v31 = vpop.f32.mrb[48].mxu1 }
 0x2f1   : > { %v3353_v25 = vpop.f32.mrb[49].mxu1 }
 0x2f2   : > { %v3354_v60 = vadd.f32 %v3353_v25, %v3352_v31  ;;  %v3355_v15 = vpop.f32.mrb[50].mxu1 }
 0x2f3   : > { %v3356_v55 = vpop.f32.mrb[51].mxu1 }
 0x2f4   : > { %v2634_v27 = vadd.f32 %v5149_v24, %v3354_v60  ;;  %v3357_v49 = vadd.f32 %v3356_v55, %v3355_v15 }
 0x2f6   : > { %v3235_v47 = vpack.c.bf16 %v2634_v27, %v2634_v27  ;;  %v2868_v46 = vsel %vm737_vm1, %v2634_v27, 0.0  ;;  %v2914_v48 = vmul.f32 %v2634_v27, %v2634_v27  ;;  %v2637_v51 = vadd.f32 %v5153_v4, %v3357_v49 }
 0x2f7   : > { %v2869_v30 = vadd.f32 %v2868_v46, %v2867_v33 }
 0x2f8   : > { %2811 = vst.msk [vmem:[%s5070_s16 + $0x68] sm:$0xf] %vm2784_vm4, %v3235_v47  ;;  %v2971_v0 = vsel %vm737_vm1, %v2914_v48, 0.0  ;;  %v3236_v44 = vpack.c.bf16 %v2637_v51, %v2637_v51  ;;  %v2870_v62 = vsel %vm737_vm1, %v2637_v51, 0.0  ;;  %v2915_v28 = vmul.f32 %v2637_v51, %v2637_v51  ;;  %v3358_v5 = vpop.f32.mrb[52].mxu1 }
 0x2f9   : > { %v2972_v63 = vadd.f32 %v2971_v0, %v2970_v58  ;;  %v3359_v24 = vpop.f32.mrb[53].mxu1  ;;  %v2871_v12 = vadd.f32 %v2870_v62, %v2869_v30 }
 0x2fa   : > { %2812 = vst.msk [vmem:[%s5070_s16 + $0x6c] sm:$0xf] %vm2784_vm4, %v3236_v44  ;;  %v2973_v53 = vsel %vm737_vm1, %v2915_v28, 0.0  ;;  %v3360_v59 = vadd.f32 %v3359_v24, %v3358_v5  ;;  %v3361_v4 = vpop.f32.mrb[54].mxu1 }
 0x2fb   : > { %v3362_v16 = vpop.f32.mrb[55].mxu1  ;;  %v2974_v35 = vadd.f32 %v2973_v53, %v2972_v63 }
 0x2fc   : > { %v3363_v32 = vadd.f32 %v3362_v16, %v3361_v4  ;;  %v2642_v36 = vadd.f32 %v3360_v59, %v5166_v9 }
 0x2fe   : > { %v3237_v45 = vpack.c.bf16 %v2642_v36, %v2642_v36  ;;  %v2872_v40 = vsel %vm737_vm1, %v2642_v36, 0.0  ;;  %v2916_v22 = vmul.f32 %v2642_v36, %v2642_v36  ;;  %v2645_v38 = vadd.f32 %v3363_v32, %v5173_v7 }
 0x2ff   : > { %v2873_v42 = vadd.f32 %v2872_v40, %v2871_v12 }
 0x300   : > { %2813 = vst.msk [vmem:[%s5070_s16 + $0x70] sm:$0xf] %vm2784_vm4, %v3237_v45  ;;  %v2975_v20 = vsel %vm737_vm1, %v2916_v22, 0.0  ;;  %v3238_v43 = vpack.c.bf16 %v2645_v38, %v2645_v38  ;;  %v2874_v2 = vsel %vm737_vm1, %v2645_v38, 0.0  ;;  %v2917_v29 = vmul.f32 %v2645_v38, %v2645_v38  ;;  %v3364_v17 = vpop.f32.mrb[56].mxu1 }
 0x301   : > { %v2976_v50 = vadd.f32 %v2975_v20, %v2974_v35  ;;  %v2875_v56 = vadd.f32 %v2874_v2, %v2873_v42  ;;  %v3365_v9 = vpop.f32.mrb[57].mxu1 }
 0x302   : > { %2814 = vst.msk [vmem:[%s5070_s16 + $0x74] sm:$0xf] %vm2784_vm4, %v3238_v43  ;;  %v2977_v57 = vsel %vm737_vm1, %v2917_v29, 0.0  ;;  %v3366_v3 = vadd.f32 %v3365_v9, %v3364_v17  ;;  %v3367_v7 = vpop.f32.mrb[58].mxu1 }
 0x303   : > { %v2978_v10 = vadd.f32 %v2977_v57, %v2976_v50  ;;  %v3368_v21 = vpop.f32.mrb[59].mxu1 }
 0x304   : > { %v2650_v8 = vadd.f32 %v5160_v26, %v3366_v3  ;;  %v3369_v54 = vadd.f32 %v3368_v21, %v3367_v7 }
 0x306   : > { %v3239_v34 = vpack.c.bf16 %v2650_v8, %v2650_v8  ;;  %v2876_v14 = vsel %vm737_vm1, %v2650_v8, 0.0  ;;  %v2918_v18 = vmul.f32 %v2650_v8, %v2650_v8  ;;  %v2653_v11 = vadd.f32 %v5168_v52, %v3369_v54 }
 0x307   : > { %v2877_v1 = vadd.f32 %v2876_v14, %v2875_v56 }
 0x308   : > { %2815 = vst.msk [vmem:[%s5070_s16 + $0x78] sm:$0xf] %vm2784_vm4, %v3239_v34  ;;  %v2979_v23 = vsel %vm737_vm1, %v2918_v18, 0.0  ;;  %v3240_v37 = vpack.c.bf16 %v2653_v11, %v2653_v11  ;;  %v2878_v39 = vsel %vm737_vm1, %v2653_v11, 0.0  ;;  %v2919_v13 = vmul.f32 %v2653_v11, %v2653_v11 }
 0x309   : > { %v2980_v41 = vadd.f32 %v2979_v23, %v2978_v10  ;;  %v2879_v6 = vadd.f32 %v2878_v39, %v2877_v1 }
 0x30a   : > { %2816 = vst.msk [vmem:[%s5070_s16 + $0x7c] sm:$0xf] %vm2784_vm4, %v3240_v37  ;;  %v2981_v26 = vsel %vm737_vm1, %v2919_v13, 0.0 }
 0x30b   : > { %v2880_v61 = vrot.slane %v2879_v6, 4  ;;  %v2982_v33 = vadd.f32 %v2981_v26, %v2980_v41 }
 0x30d   : > { %v2881_v52 = vadd.f32 %v2880_v61, %v2879_v6  ;;  %v2983_v19 = vrot.slane %v2982_v33, 4 }
 0x30f   : > { %v2882_v58 = vrot.slane %v2881_v52, 2  ;;  %v2984_v31 = vadd.f32 %v2983_v19, %v2982_v33 }
 0x311   : > { %v2883_v25 = vadd.f32 %v2882_v58, %v2881_v52  ;;  %v2985_v60 = vrot.slane %v2984_v31, 2 }
 0x313   : > { %v2884_v15 = vrot.slane %v2883_v25, 1  ;;  %v2986_v55 = vadd.f32 %v2985_v60, %v2984_v31 }
 0x315   : > { %v2885_v27 = vadd.f32 %v2884_v15, %v2883_v25  ;;  %v2987_v49 = vrot.slane %v2986_v55, 1 }
 0x317   : > { %2887 = vst.msk [vmem:[%s292_s18] sm:$0x1] %vm2886_vm5, %v2885_v27  ;;  %v2988_v47 = vadd.f32 %v2987_v49, %v2986_v55 }
 0x319   : > { %2989 = vst.msk [vmem:[%s295_s21] sm:$0x1] %vm2886_vm5, %v2988_v47 }
 0x31a PF: > { %s18_s24 = sadd.s32 1, %s4009_s24  }
 0x31b   : > { %p15_p4 = scmp.ge.s32.totalorder %s18_s24, 4  }
 0x31d   :  { %17 = sbr.rel (!%p15_p4) target bundleno = 1 (0x1), region = 96 }

</bundles_post_ra>
